<compile_context>
chip_gen: v7x
topology: tpu7x:2x2x1
jax: 0.10.0
libtpu: 0.0.40
codegen_flags: <defaults>
</compile_context>

<pallas_src>
import math
import numpy as np
import jax
import jax.numpy as jnp
from jax.experimental import pallas as pl
from jax.experimental.pallas import tpu as pltpu

EMBED = 256                # embed_size (fc_out is hard-coded Linear(256, 2))
HEADS = 8
HEAD_DIM = EMBED // HEADS  # 32
FFN = 4 * EMBED            # forward_expansion * embed_size
NUM_LAYERS = 2
VOCAB = 1000               # small synthetic vocab for the demo
MAX_LEN = 100


# ----------------------------- Pallas kernel ------------------------------- #

def _layer_norm(x, w, b, eps=1e-5):
    mean = jnp.mean(x, axis=-1, keepdims=True)
    var = jnp.mean((x - mean) ** 2, axis=-1, keepdims=True)
    return (x - mean) * jax.lax.rsqrt(var + eps) * w + b


def bert_encoder_kernel(x_ref, mask_ref, wqkv_ref, wo_ref, bo_ref,
                        n1w_ref, n1b_ref, w1_ref, b1_ref, w2_ref, b2_ref,
                        n2w_ref, n2b_ref, wcls_ref, bcls_ref, out_ref):
    """Full 2-layer encoder + classifier head for one tile of B batch rows."""
    B, S, E = x_ref.shape
    H, D = HEADS, HEAD_DIM
    scale = jnp.float32(1.0 / math.sqrt(E))

    # Additive mask bias, built ONCE per tile and reused by both layers.
    # Reference semantics: masked_fill(mask==0, -1e20) BEFORE the 1/sqrt(E)
    # scaling; adding -1e20 to a small f32 energy rounds to exactly -1e20.
    mask_bias = jnp.where(mask_ref[...] == 0.0,
                          jnp.float32(-1e20), jnp.float32(0.0))      # (B,1,S)
    mask_bias = jnp.broadcast_to(mask_bias[None], (H, B, 1, S)).reshape(H * B, 1, S)

    x = x_ref[...].reshape(B * S, E)                # residual stream, f32

    for l in range(NUM_LAYERS):                     # static unroll (2 layers)
        # Hoist all per-layer parameter loads.
        wqkv = wqkv_ref[l]                          # (E, 3E) bf16, block-diag heads
        wo, bo = wo_ref[l], bo_ref[l]               # (E, E) bf16, (1, E) f32
        n1w, n1b = n1w_ref[l], n1b_ref[l]           # (1, E)  f32
        w1, b1 = w1_ref[l], b1_ref[l]               # (E, 4E) bf16, (1, 4E) f32
        w2, b2 = w2_ref[l], b2_ref[l]               # (4E, E) bf16, (1, E)  f32
        n2w, n2b = n2w_ref[l], n2b_ref[l]           # (1, E)  f32

        # ---- fused Q/K/V projection: one lane-dense MXU matmul, bf16 output ----
        qkv = jnp.dot(x.astype(jnp.bfloat16), wqkv,
                      preferred_element_type=jnp.float32
                      ).astype(jnp.bfloat16)                         # (B*S, 3E)

        # ---- head-batched attention: (H*B, S, D) per tensor, 2 batched einsums ----
        def heads_of(base):
            return jnp.stack(
                [qkv[:, base + h * D: base + (h + 1) * D] for h in range(H)],
                axis=0).reshape(H * B, S, D)                         # h-major batch

        q = heads_of(0)
        k = heads_of(E)
        v = heads_of(2 * E)

        scores = jnp.einsum('bqd,bkd->bqk', q, k,
                            preferred_element_type=jnp.float32)      # (H*B, S, S)
        scores = (scores + mask_bias) * scale       # masked_fill BEFORE scaling
        scores = scores - jnp.max(scores, axis=-1, keepdims=True)
        p = jnp.exp(scores)
        p = p * pl.reciprocal(jnp.sum(p, axis=-1, keepdims=True), approx=True)

        ctx = jnp.einsum('bqk,bkd->bqd', p.astype(jnp.bfloat16), v,
                         preferred_element_type=jnp.float32
                         ).astype(jnp.bfloat16)                      # (H*B, S, D)

        # un-batch heads and restore (B*S, E) lane-major layout: concat over heads
        ctx = ctx.reshape(H, B * S, D)
        ctx = jnp.concatenate([ctx[h] for h in range(H)], axis=-1)   # (B*S, E)

        # ---- dense fc_out: ONE full-K (B*S,256)@(256,256) matmul ----
        attn = jnp.dot(ctx, wo, preferred_element_type=jnp.float32) + bo

        # ---- residual + LayerNorm 1 (f32; dropout = identity in eval) ----
        h1 = _layer_norm(attn + x, n1w, n1b)

        # ---- feed-forward: lane-dense matmuls, bf16 intermediate after ReLU ----
        ff = jnp.dot(h1.astype(jnp.bfloat16), w1,
                     preferred_element_type=jnp.float32) + b1
        ff = jnp.maximum(ff, 0.0).astype(jnp.bfloat16)               # (B*S, 4E) bf16
        ff = jnp.dot(ff, w2, preferred_element_type=jnp.float32) + b2

        # ---- residual + LayerNorm 2 (dropout = identity in eval) ----
        x = _layer_norm(ff + h1, n2w, n2b)

    # ---- classifier head on [CLS] token; output padded to 128 lanes ----
    cls = x.reshape(B, S, E)[:, 0, :]                                # (B, E)
    logits = (jnp.dot(cls.astype(jnp.bfloat16), wcls_ref[...],
                      preferred_element_type=jnp.float32)
              + bcls_ref[...])                                       # (B, 128)
    out_ref[...] = logits.reshape(B, 1, 128)


# ------------------------------ JAX wrappers -------------------------------- #

def prepare_weights(params):
    """Host-side weight repacking: block-diagonal fused QKV, dense Wo,
    layer stacking, bf16 casts for all matmul operands, padded classifier."""
    eye = jnp.eye(HEADS, dtype=jnp.float32)

    def block_diag(w):                      # (D, D) -> (E, E), w on each head block
        return jnp.kron(eye, w)

    keys = ("wqkv", "wo", "bo", "n1w", "n1b", "w1", "b1", "w2", "b2", "n2w", "n2b")
    stacks = {k: [] for k in keys}
    for lp in params["layers"]:
        stacks["wqkv"].append(jnp.concatenate(
            [block_diag(lp["wq"]), block_diag(lp["wk"]), block_diag(lp["wv"])], axis=1))
        for k in ("wo", "bo", "n1w", "n1b", "w1", "b1", "w2", "b2", "n2w", "n2b"):
            stacks[k].append(lp[k])

    st = {k: jnp.stack(v, axis=0) for k, v in stacks.items()}
    wcls = jnp.zeros((EMBED, 128), jnp.float32).at[:, :2].set(params["wout"])
    bcls = jnp.zeros((1, 128), jnp.float32).at[:, :2].set(params["bout"])
    return {
        "wqkv": st["wqkv"].astype(jnp.bfloat16),
        "wo": st["wo"].astype(jnp.bfloat16),
        "bo": st["bo"], "n1w": st["n1w"], "n1b": st["n1b"],
        "w1": st["w1"].astype(jnp.bfloat16), "b1": st["b1"],
        "w2": st["w2"].astype(jnp.bfloat16), "b2": st["b2"],
        "n2w": st["n2w"], "n2b": st["n2b"],
        "wcls": wcls.astype(jnp.bfloat16), "bcls": bcls,
    }


def bert_encoder(x, mask3, wp, b_tile=None):
    """x: (N, S, E) f32 embeddings; mask3: (N, 1, S) f32. Returns (N, 2) logits."""
    N, S, E = x.shape
    if b_tile is None:
        # ~512 rows per grid step for MXU M-fill; but keep >= 2 grid steps when
        # the batch allows so both v7x TensorCores get work on the parallel axis.
        b_tile = max(1, min(64, -(-512 // S)))
        b_tile = min(b_tile, max(1, -(-N // 2)))
    n_pad = (-(-N // b_tile)) * b_tile
    if n_pad != N:
        x = jnp.pad(x, ((0, n_pad - N), (0, 0), (0, 0)))
        mask3 = jnp.pad(mask3, ((0, n_pad - N), (0, 0), (0, 0)), constant_values=1.0)

    def rep_spec(shape):                    # grid-invariant (weight) block
        zeros = (0,) * len(shape)
        return pl.BlockSpec(shape, lambda n, _z=zeros: _z)

    L = NUM_LAYERS
    in_specs = [
        pl.BlockSpec((b_tile, S, E), lambda n: (n, 0, 0)),   # x
        pl.BlockSpec((b_tile, 1, S), lambda n: (n, 0, 0)),   # mask
        rep_spec((L, E, 3 * E)),                             # fused block-diag Wqkv
        rep_spec((L, E, E)),                                 # dense Wo
        rep_spec((L, 1, E)),                                 # bo
        rep_spec((L, 1, E)), rep_spec((L, 1, E)),            # norm1 w, b
        rep_spec((L, E, FFN)), rep_spec((L, 1, FFN)),        # ff w1, b1
        rep_spec((L, FFN, E)), rep_spec((L, 1, E)),          # ff w2, b2
        rep_spec((L, 1, E)), rep_spec((L, 1, E)),            # norm2 w, b
        rep_spec((E, 128)), rep_spec((1, 128)),              # classifier (padded)
    ]
    out_specs = pl.BlockSpec((b_tile, 1, 128), lambda n: (n, 0, 0))

    # Advisory cost hint for the XLA scheduler.
    rows = n_pad * S
    flops = NUM_LAYERS * (2 * rows * E * (3 * E)             # qkv
                          + 4 * n_pad * HEADS * S * S * HEAD_DIM  # scores + ctx
                          + 2 * rows * E * E                 # fc_out
                          + 4 * rows * E * FFN)              # ffn
    flops += 2 * n_pad * E * 128                             # classifier
    transcendentals = NUM_LAYERS * n_pad * HEADS * S * S
    weight_bytes = sum(int(v.size) * v.dtype.itemsize for v in wp.values())
    bytes_accessed = int(x.size) * 4 + int(mask3.size) * 4 + weight_bytes + n_pad * 128 * 4

    logits_pad = pl.pallas_call(
        bert_encoder_kernel,
        out_shape=jax.ShapeDtypeStruct((n_pad, 1, 128), jnp.float32),
        grid_spec=pltpu.PrefetchScalarGridSpec(
            num_scalar_prefetch=0, grid=(n_pad // b_tile,),
            in_specs=in_specs, out_specs=out_specs),
        compiler_params=pltpu.CompilerParams(
            dimension_semantics=("parallel",),        # batch tiles independent
            vmem_limit_bytes=32 * 1024 * 1024),       # > v5e's 16 MiB scoped default
        cost_estimate=pl.CostEstimate(flops=flops,
                                      transcendentals=transcendentals,
                                      bytes_accessed=bytes_accessed),
    )(x, mask3,
      wp["wqkv"], wp["wo"], wp["bo"], wp["n1w"], wp["n1b"],
      wp["w1"], wp["b1"], wp["w2"], wp["b2"], wp["n2w"], wp["n2b"],
      wp["wcls"], wp["bcls"])
    return logits_pad[:N, 0, :2]


def positional_encoding(d_model, max_len):
    # Exact replica of the (non-standard) PyTorch PositionalEncoding table.
    pe = np.zeros((max_len, d_model), dtype=np.float64)
    for pos in range(max_len):
        for i in range(0, d_model, 2):
            pe[pos, i] = math.sin(pos / 10000 ** (2 * i / d_model))
            pe[pos, i + 1] = math.cos(pos / 10000 ** (2 * (i + 1) / d_model))
    return jnp.asarray(pe, dtype=jnp.float32)


def init_params(key):
    def dense(k, shape, scale=0.02):
        return (scale * jax.random.normal(k, shape)).astype(jnp.float32)

    keys = iter(jax.random.split(key, 2 + NUM_LAYERS * 6))
    params = {
        "emb": dense(next(keys), (VOCAB, EMBED)),
        "pe": positional_encoding(EMBED, MAX_LEN),
        "wout": dense(next(keys), (EMBED, 2)),
        "bout": jnp.zeros((1, 2), jnp.float32),
        "layers": [],
    }
    for _ in range(NUM_LAYERS):
        params["layers"].append({
            "wq": dense(next(keys), (HEAD_DIM, HEAD_DIM)),
            "wk": dense(next(keys), (HEAD_DIM, HEAD_DIM)),
            "wv": dense(next(keys), (HEAD_DIM, HEAD_DIM)),
            "wo": dense(next(keys), (EMBED, EMBED)),
            "bo": jnp.zeros((1, EMBED), jnp.float32),
            "n1w": jnp.ones((1, EMBED), jnp.float32),
            "n1b": jnp.zeros((1, EMBED), jnp.float32),
            "w1": dense(next(keys), (EMBED, FFN)),
            "b1": jnp.zeros((1, FFN), jnp.float32),
            "w2": dense(next(keys), (FFN, EMBED)),
            "b2": jnp.zeros((1, EMBED), jnp.float32),
            "n2w": jnp.ones((1, EMBED), jnp.float32),
            "n2b": jnp.zeros((1, EMBED), jnp.float32),
        })
    return params


def bert_forward(tokens, mask, params):
    N, S = tokens.shape
    # Glue: embedding gather + positional-encoding add (PositionalEncoding.forward
    # discards its scaled input and just returns pe[:, :S] repeated over batch).
    emb = jnp.take(params["emb"], tokens, axis=0)            # (N, S, E)
    pe = params["pe"][:S][None, :, :]                        # (1, S, E)
    out = emb + pe                                           # dropout = identity (eval)

    mask3 = mask.reshape(N, 1, S).astype(jnp.float32)
    wp = prepare_weights(params)                             # host-side repack + bf16
    return bert_encoder(out, mask3, wp)                      # fused Pallas hot path


if __name__ == "__main__":
    key = jax.random.PRNGKey(0)
    pkey, tkey = jax.random.split(key)
    params = init_params(pkey)

    N, S = 2, 8
    tokens = jax.random.randint(tkey, (N, S), 0, VOCAB)
    mask = jnp.ones((N, S), dtype=jnp.float32).at[1, S - 2:].set(0.0)

    scores = jax.block_until_ready(bert_forward(tokens, mask, params))
    assert scores.shape == (N, 2) and scores.dtype == jnp.float32
    assert bool(jnp.all(jnp.isfinite(scores)))
    print("KERNEL_OK")
</pallas_src>

<mosaic_0001>
module attributes {stable_mosaic.version = 11 : i64} {
  func.func @bert_encoder_kernel(%arg0: i32, %arg1: memref<1x8x256xf32, #tpu.memory_space<vmem>>, %arg2: memref<1x1x8xf32, #tpu.memory_space<vmem>>, %arg3: memref<2x256x768xbf16, #tpu.memory_space<vmem>>, %arg4: memref<2x256x256xbf16, #tpu.memory_space<vmem>>, %arg5: memref<2x1x256xf32, #tpu.memory_space<vmem>>, %arg6: memref<2x1x256xf32, #tpu.memory_space<vmem>>, %arg7: memref<2x1x256xf32, #tpu.memory_space<vmem>>, %arg8: memref<2x256x1024xbf16, #tpu.memory_space<vmem>>, %arg9: memref<2x1x1024xf32, #tpu.memory_space<vmem>>, %arg10: memref<2x1024x256xbf16, #tpu.memory_space<vmem>>, %arg11: memref<2x1x256xf32, #tpu.memory_space<vmem>>, %arg12: memref<2x1x256xf32, #tpu.memory_space<vmem>>, %arg13: memref<2x1x256xf32, #tpu.memory_space<vmem>>, %arg14: memref<256x128xbf16, #tpu.memory_space<vmem>>, %arg15: memref<1x128xf32, #tpu.memory_space<vmem>>, %arg16: memref<1x1x128xf32, #tpu.memory_space<vmem>>) attributes {dimension_semantics = [#tpu.dimension_semantics<parallel>], iteration_bounds = array<i64: 2>, scalar_prefetch = 0 : i64, scratch_operands = 0 : i64, tpu.core_type = #tpu.core_type<tc>, window_params = [{transform_indices = @transform_0, window_bounds = array<i64: 1, 8, 256>}, {transform_indices = @transform_1, window_bounds = array<i64: 1, 1, 8>}, {pipeline_mode = #tpu.pipeline_mode<synchronous>, transform_indices = @transform_2, window_bounds = array<i64: 2, 256, 768>}, {pipeline_mode = #tpu.pipeline_mode<synchronous>, transform_indices = @transform_3, window_bounds = array<i64: 2, 256, 256>}, {pipeline_mode = #tpu.pipeline_mode<synchronous>, transform_indices = @transform_4, window_bounds = array<i64: 2, 1, 256>}, {pipeline_mode = #tpu.pipeline_mode<synchronous>, transform_indices = @transform_5, window_bounds = array<i64: 2, 1, 256>}, {pipeline_mode = #tpu.pipeline_mode<synchronous>, transform_indices = @transform_6, window_bounds = array<i64: 2, 1, 256>}, {pipeline_mode = #tpu.pipeline_mode<synchronous>, transform_indices = @transform_7, window_bounds = array<i64: 2, 256, 1024>}, {pipeline_mode = #tpu.pipeline_mode<synchronous>, transform_indices = @transform_8, window_bounds = array<i64: 2, 1, 1024>}, {pipeline_mode = #tpu.pipeline_mode<synchronous>, transform_indices = @transform_9, window_bounds = array<i64: 2, 1024, 256>}, {pipeline_mode = #tpu.pipeline_mode<synchronous>, transform_indices = @transform_10, window_bounds = array<i64: 2, 1, 256>}, {pipeline_mode = #tpu.pipeline_mode<synchronous>, transform_indices = @transform_11, window_bounds = array<i64: 2, 1, 256>}, {pipeline_mode = #tpu.pipeline_mode<synchronous>, transform_indices = @transform_12, window_bounds = array<i64: 2, 1, 256>}, {pipeline_mode = #tpu.pipeline_mode<synchronous>, transform_indices = @transform_13, window_bounds = array<i64: 256, 128>}, {pipeline_mode = #tpu.pipeline_mode<synchronous>, transform_indices = @transform_14, window_bounds = array<i64: 1, 128>}, {transform_indices = @transform_15, window_bounds = array<i64: 1, 1, 128>}]} {
    %c0 = arith.constant 0 : index
    %c0_0 = arith.constant 0 : index
    %c0_1 = arith.constant 0 : index
    %0 = vector.load %arg2[%c0, %c0_0, %c0_1] : memref<1x1x8xf32, #tpu.memory_space<vmem>>, vector<1x1x8xf32>
    %cst = arith.constant 0.000000e+00 : f32
    %1 = vector.broadcast %cst : f32 to vector<1x1x8xf32>
    %2 = arith.cmpf oeq, %0, %1 : vector<1x1x8xf32>
    %cst_2 = arith.constant -1.000000e+20 : f32
    %cst_3 = arith.constant 0.000000e+00 : f32
    %3 = vector.broadcast %cst_2 : f32 to vector<1x1x8xf32>
    %4 = vector.broadcast %cst_3 : f32 to vector<1x1x8xf32>
    %5 = arith.select %2, %3, %4 : vector<1x1x8xi1>, vector<1x1x8xf32>
    %6 = vector.shape_cast %5 : vector<1x1x8xf32> to vector<1x1x1x8xf32>
    %7 = vector.shape_cast %6 : vector<1x1x1x8xf32> to vector<1x1x1x8xf32>
    %8 = vector.broadcast %7 : vector<1x1x1x8xf32> to vector<8x1x1x8xf32>
    %9 = vector.shape_cast %8 : vector<8x1x1x8xf32> to vector<8x1x8xf32>
    %c0_4 = arith.constant 0 : index
    %c0_5 = arith.constant 0 : index
    %c0_6 = arith.constant 0 : index
    %10 = vector.load %arg1[%c0_4, %c0_5, %c0_6] : memref<1x8x256xf32, #tpu.memory_space<vmem>>, vector<1x8x256xf32>
    %11 = vector.shape_cast %10 : vector<1x8x256xf32> to vector<8x256xf32>
    %c0_7 = arith.constant 0 : index
    %c0_8 = arith.constant 0 : index
    %c0_9 = arith.constant 0 : index
    %12 = vector.load %arg3[%c0_7, %c0_8, %c0_9] : memref<2x256x768xbf16, #tpu.memory_space<vmem>>, vector<1x256x768xbf16>
    %13 = vector.shape_cast %12 : vector<1x256x768xbf16> to vector<256x768xbf16>
    %c0_10 = arith.constant 0 : index
    %c0_11 = arith.constant 0 : index
    %c0_12 = arith.constant 0 : index
    %14 = vector.load %arg4[%c0_10, %c0_11, %c0_12] : memref<2x256x256xbf16, #tpu.memory_space<vmem>>, vector<1x256x256xbf16>
    %15 = vector.shape_cast %14 : vector<1x256x256xbf16> to vector<256x256xbf16>
    %c0_13 = arith.constant 0 : index
    %c0_14 = arith.constant 0 : index
    %c0_15 = arith.constant 0 : index
    %16 = vector.load %arg5[%c0_13, %c0_14, %c0_15] : memref<2x1x256xf32, #tpu.memory_space<vmem>>, vector<1x1x256xf32>
    %17 = vector.shape_cast %16 : vector<1x1x256xf32> to vector<1x256xf32>
    %c0_16 = arith.constant 0 : index
    %c0_17 = arith.constant 0 : index
    %c0_18 = arith.constant 0 : index
    %18 = vector.load %arg6[%c0_16, %c0_17, %c0_18] : memref<2x1x256xf32, #tpu.memory_space<vmem>>, vector<1x1x256xf32>
    %19 = vector.shape_cast %18 : vector<1x1x256xf32> to vector<1x256xf32>
    %c0_19 = arith.constant 0 : index
    %c0_20 = arith.constant 0 : index
    %c0_21 = arith.constant 0 : index
    %20 = vector.load %arg7[%c0_19, %c0_20, %c0_21] : memref<2x1x256xf32, #tpu.memory_space<vmem>>, vector<1x1x256xf32>
    %21 = vector.shape_cast %20 : vector<1x1x256xf32> to vector<1x256xf32>
    %c0_22 = arith.constant 0 : index
    %c0_23 = arith.constant 0 : index
    %c0_24 = arith.constant 0 : index
    %22 = vector.load %arg8[%c0_22, %c0_23, %c0_24] : memref<2x256x1024xbf16, #tpu.memory_space<vmem>>, vector<1x256x1024xbf16>
    %23 = vector.shape_cast %22 : vector<1x256x1024xbf16> to vector<256x1024xbf16>
    %c0_25 = arith.constant 0 : index
    %c0_26 = arith.constant 0 : index
    %c0_27 = arith.constant 0 : index
    %24 = vector.load %arg9[%c0_25, %c0_26, %c0_27] : memref<2x1x1024xf32, #tpu.memory_space<vmem>>, vector<1x1x1024xf32>
    %25 = vector.shape_cast %24 : vector<1x1x1024xf32> to vector<1x1024xf32>
    %c0_28 = arith.constant 0 : index
    %c0_29 = arith.constant 0 : index
    %c0_30 = arith.constant 0 : index
    %26 = vector.load %arg10[%c0_28, %c0_29, %c0_30] : memref<2x1024x256xbf16, #tpu.memory_space<vmem>>, vector<1x1024x256xbf16>
    %27 = vector.shape_cast %26 : vector<1x1024x256xbf16> to vector<1024x256xbf16>
    %c0_31 = arith.constant 0 : index
    %c0_32 = arith.constant 0 : index
    %c0_33 = arith.constant 0 : index
    %28 = vector.load %arg11[%c0_31, %c0_32, %c0_33] : memref<2x1x256xf32, #tpu.memory_space<vmem>>, vector<1x1x256xf32>
    %29 = vector.shape_cast %28 : vector<1x1x256xf32> to vector<1x256xf32>
    %c0_34 = arith.constant 0 : index
    %c0_35 = arith.constant 0 : index
    %c0_36 = arith.constant 0 : index
    %30 = vector.load %arg12[%c0_34, %c0_35, %c0_36] : memref<2x1x256xf32, #tpu.memory_space<vmem>>, vector<1x1x256xf32>
    %31 = vector.shape_cast %30 : vector<1x1x256xf32> to vector<1x256xf32>
    %c0_37 = arith.constant 0 : index
    %c0_38 = arith.constant 0 : index
    %c0_39 = arith.constant 0 : index
    %32 = vector.load %arg13[%c0_37, %c0_38, %c0_39] : memref<2x1x256xf32, #tpu.memory_space<vmem>>, vector<1x1x256xf32>
    %33 = vector.shape_cast %32 : vector<1x1x256xf32> to vector<1x256xf32>
    %34 = arith.truncf %11 : vector<8x256xf32> to vector<8x256xbf16>
    %cst_40 = arith.constant dense<0.000000e+00> : vector<8x768xf32>
    %35 = tpu.matmul %34, %13, %cst_40 {dimension_numbers = #tpu.dot_dimension_numbers<[1], [0], [0], [1], [0, 0, 1, 1], [], []>} : vector<8x256xbf16>, vector<256x768xbf16>, vector<8x768xf32> -> vector<8x768xf32>
    %36 = arith.truncf %35 : vector<8x768xf32> to vector<8x768xbf16>
    %37 = vector.extract_strided_slice %36 {offsets = [0, 0], sizes = [8, 32], strides = [1, 1]} : vector<8x768xbf16> to vector<8x32xbf16>
    %38 = vector.extract_strided_slice %36 {offsets = [0, 32], sizes = [8, 32], strides = [1, 1]} : vector<8x768xbf16> to vector<8x32xbf16>
    %39 = vector.extract_strided_slice %36 {offsets = [0, 64], sizes = [8, 32], strides = [1, 1]} : vector<8x768xbf16> to vector<8x32xbf16>
    %40 = vector.extract_strided_slice %36 {offsets = [0, 96], sizes = [8, 32], strides = [1, 1]} : vector<8x768xbf16> to vector<8x32xbf16>
    %41 = vector.extract_strided_slice %36 {offsets = [0, 128], sizes = [8, 32], strides = [1, 1]} : vector<8x768xbf16> to vector<8x32xbf16>
    %42 = vector.extract_strided_slice %36 {offsets = [0, 160], sizes = [8, 32], strides = [1, 1]} : vector<8x768xbf16> to vector<8x32xbf16>
    %43 = vector.extract_strided_slice %36 {offsets = [0, 192], sizes = [8, 32], strides = [1, 1]} : vector<8x768xbf16> to vector<8x32xbf16>
    %44 = vector.extract_strided_slice %36 {offsets = [0, 224], sizes = [8, 32], strides = [1, 1]} : vector<8x768xbf16> to vector<8x32xbf16>
    %45 = vector.shape_cast %37 : vector<8x32xbf16> to vector<1x8x32xbf16>
    %46 = vector.shape_cast %38 : vector<8x32xbf16> to vector<1x8x32xbf16>
    %47 = vector.shape_cast %39 : vector<8x32xbf16> to vector<1x8x32xbf16>
    %48 = vector.shape_cast %40 : vector<8x32xbf16> to vector<1x8x32xbf16>
    %49 = vector.shape_cast %41 : vector<8x32xbf16> to vector<1x8x32xbf16>
    %50 = vector.shape_cast %42 : vector<8x32xbf16> to vector<1x8x32xbf16>
    %51 = vector.shape_cast %43 : vector<8x32xbf16> to vector<1x8x32xbf16>
    %52 = vector.shape_cast %44 : vector<8x32xbf16> to vector<1x8x32xbf16>
    %53 = tpu.concatenate %45, %46, %47, %48, %49, %50, %51, %52 in 0 : vector<1x8x32xbf16>, vector<1x8x32xbf16>, vector<1x8x32xbf16>, vector<1x8x32xbf16>, vector<1x8x32xbf16>, vector<1x8x32xbf16>, vector<1x8x32xbf16>, vector<1x8x32xbf16> -> vector<8x8x32xbf16>
    %54 = vector.extract_strided_slice %36 {offsets = [0, 256], sizes = [8, 32], strides = [1, 1]} : vector<8x768xbf16> to vector<8x32xbf16>
    %55 = vector.extract_strided_slice %36 {offsets = [0, 288], sizes = [8, 32], strides = [1, 1]} : vector<8x768xbf16> to vector<8x32xbf16>
    %56 = vector.extract_strided_slice %36 {offsets = [0, 320], sizes = [8, 32], strides = [1, 1]} : vector<8x768xbf16> to vector<8x32xbf16>
    %57 = vector.extract_strided_slice %36 {offsets = [0, 352], sizes = [8, 32], strides = [1, 1]} : vector<8x768xbf16> to vector<8x32xbf16>
    %58 = vector.extract_strided_slice %36 {offsets = [0, 384], sizes = [8, 32], strides = [1, 1]} : vector<8x768xbf16> to vector<8x32xbf16>
    %59 = vector.extract_strided_slice %36 {offsets = [0, 416], sizes = [8, 32], strides = [1, 1]} : vector<8x768xbf16> to vector<8x32xbf16>
    %60 = vector.extract_strided_slice %36 {offsets = [0, 448], sizes = [8, 32], strides = [1, 1]} : vector<8x768xbf16> to vector<8x32xbf16>
    %61 = vector.extract_strided_slice %36 {offsets = [0, 480], sizes = [8, 32], strides = [1, 1]} : vector<8x768xbf16> to vector<8x32xbf16>
    %62 = vector.shape_cast %54 : vector<8x32xbf16> to vector<1x8x32xbf16>
    %63 = vector.shape_cast %55 : vector<8x32xbf16> to vector<1x8x32xbf16>
    %64 = vector.shape_cast %56 : vector<8x32xbf16> to vector<1x8x32xbf16>
    %65 = vector.shape_cast %57 : vector<8x32xbf16> to vector<1x8x32xbf16>
    %66 = vector.shape_cast %58 : vector<8x32xbf16> to vector<1x8x32xbf16>
    %67 = vector.shape_cast %59 : vector<8x32xbf16> to vector<1x8x32xbf16>
    %68 = vector.shape_cast %60 : vector<8x32xbf16> to vector<1x8x32xbf16>
    %69 = vector.shape_cast %61 : vector<8x32xbf16> to vector<1x8x32xbf16>
    %70 = tpu.concatenate %62, %63, %64, %65, %66, %67, %68, %69 in 0 : vector<1x8x32xbf16>, vector<1x8x32xbf16>, vector<1x8x32xbf16>, vector<1x8x32xbf16>, vector<1x8x32xbf16>, vector<1x8x32xbf16>, vector<1x8x32xbf16>, vector<1x8x32xbf16> -> vector<8x8x32xbf16>
    %71 = vector.extract_strided_slice %36 {offsets = [0, 512], sizes = [8, 32], strides = [1, 1]} : vector<8x768xbf16> to vector<8x32xbf16>
    %72 = vector.extract_strided_slice %36 {offsets = [0, 544], sizes = [8, 32], strides = [1, 1]} : vector<8x768xbf16> to vector<8x32xbf16>
    %73 = vector.extract_strided_slice %36 {offsets = [0, 576], sizes = [8, 32], strides = [1, 1]} : vector<8x768xbf16> to vector<8x32xbf16>
    %74 = vector.extract_strided_slice %36 {offsets = [0, 608], sizes = [8, 32], strides = [1, 1]} : vector<8x768xbf16> to vector<8x32xbf16>
    %75 = vector.extract_strided_slice %36 {offsets = [0, 640], sizes = [8, 32], strides = [1, 1]} : vector<8x768xbf16> to vector<8x32xbf16>
    %76 = vector.extract_strided_slice %36 {offsets = [0, 672], sizes = [8, 32], strides = [1, 1]} : vector<8x768xbf16> to vector<8x32xbf16>
    %77 = vector.extract_strided_slice %36 {offsets = [0, 704], sizes = [8, 32], strides = [1, 1]} : vector<8x768xbf16> to vector<8x32xbf16>
    %78 = vector.extract_strided_slice %36 {offsets = [0, 736], sizes = [8, 32], strides = [1, 1]} : vector<8x768xbf16> to vector<8x32xbf16>
    %79 = vector.shape_cast %71 : vector<8x32xbf16> to vector<1x8x32xbf16>
    %80 = vector.shape_cast %72 : vector<8x32xbf16> to vector<1x8x32xbf16>
    %81 = vector.shape_cast %73 : vector<8x32xbf16> to vector<1x8x32xbf16>
    %82 = vector.shape_cast %74 : vector<8x32xbf16> to vector<1x8x32xbf16>
    %83 = vector.shape_cast %75 : vector<8x32xbf16> to vector<1x8x32xbf16>
    %84 = vector.shape_cast %76 : vector<8x32xbf16> to vector<1x8x32xbf16>
    %85 = vector.shape_cast %77 : vector<8x32xbf16> to vector<1x8x32xbf16>
    %86 = vector.shape_cast %78 : vector<8x32xbf16> to vector<1x8x32xbf16>
    %87 = tpu.concatenate %79, %80, %81, %82, %83, %84, %85, %86 in 0 : vector<1x8x32xbf16>, vector<1x8x32xbf16>, vector<1x8x32xbf16>, vector<1x8x32xbf16>, vector<1x8x32xbf16>, vector<1x8x32xbf16>, vector<1x8x32xbf16>, vector<1x8x32xbf16> -> vector<8x8x32xbf16>
    "tpu.trace_start"() <{level = 10 : i32, message = "bqd,bkd->bqk"}> : () -> ()
    %cst_41 = arith.constant dense<0.000000e+00> : vector<8x8x8xf32>
    %88 = tpu.matmul %53, %70, %cst_41 {dimension_numbers = #tpu.dot_dimension_numbers<[2], [2], [1], [1], [0, 0, 0, 1, 1, 1], [0], [0]>} : vector<8x8x32xbf16>, vector<8x8x32xbf16>, vector<8x8x8xf32> -> vector<8x8x8xf32>
    "tpu.trace_stop"() : () -> ()
    %89 = vector.broadcast %9 : vector<8x1x8xf32> to vector<8x8x8xf32>
    %90 = arith.addf %88, %89 : vector<8x8x8xf32>
    %cst_42 = arith.constant 6.250000e-02 : f32
    %91 = vector.broadcast %cst_42 : f32 to vector<8x8x8xf32>
    %92 = arith.mulf %90, %91 : vector<8x8x8xf32>
    %cst_43 = arith.constant dense<0xFF800000> : vector<8x8xf32>
    %93 = vector.multi_reduction <maximumf>, %92, %cst_43 [2] : vector<8x8x8xf32> to vector<8x8xf32>
    %94 = vector.shape_cast %93 : vector<8x8xf32> to vector<8x8x1xf32>
    %95 = vector.broadcast %94 : vector<8x8x1xf32> to vector<8x8x8xf32>
    %96 = arith.subf %92, %95 : vector<8x8x8xf32>
    %97 = math.exp %96 : vector<8x8x8xf32>
    %cst_44 = arith.constant dense<0.000000e+00> : vector<8x8xf32>
    %98 = vector.multi_reduction <add>, %97, %cst_44 [2] : vector<8x8x8xf32> to vector<8x8xf32>
    %99 = vector.shape_cast %98 : vector<8x8xf32> to vector<8x8x1xf32>
    %100 = tpu.reciprocal %99 {approx = true} : vector<8x8x1xf32> -> vector<8x8x1xf32>
    %101 = vector.broadcast %100 : vector<8x8x1xf32> to vector<8x8x8xf32>
    %102 = arith.mulf %97, %101 : vector<8x8x8xf32>
    %103 = arith.truncf %102 : vector<8x8x8xf32> to vector<8x8x8xbf16>
    "tpu.trace_start"() <{level = 10 : i32, message = "bqk,bkd->bqd"}> : () -> ()
    %cst_45 = arith.constant dense<0.000000e+00> : vector<8x8x32xf32>
    %104 = tpu.matmul %103, %87, %cst_45 {dimension_numbers = #tpu.dot_dimension_numbers<[2], [1], [1], [2], [0, 0, 0, 1, 1, 2], [0], [0]>} : vector<8x8x8xbf16>, vector<8x8x32xbf16>, vector<8x8x32xf32> -> vector<8x8x32xf32>
    "tpu.trace_stop"() : () -> ()
    %105 = arith.truncf %104 : vector<8x8x32xf32> to vector<8x8x32xbf16>
    %106 = vector.extract_strided_slice %105 {offsets = [0, 0, 0], sizes = [1, 8, 32], strides = [1, 1, 1]} : vector<8x8x32xbf16> to vector<1x8x32xbf16>
    %107 = vector.shape_cast %106 : vector<1x8x32xbf16> to vector<8x32xbf16>
    %108 = vector.extract_strided_slice %105 {offsets = [1, 0, 0], sizes = [1, 8, 32], strides = [1, 1, 1]} : vector<8x8x32xbf16> to vector<1x8x32xbf16>
    %109 = vector.shape_cast %108 : vector<1x8x32xbf16> to vector<8x32xbf16>
    %110 = vector.extract_strided_slice %105 {offsets = [2, 0, 0], sizes = [1, 8, 32], strides = [1, 1, 1]} : vector<8x8x32xbf16> to vector<1x8x32xbf16>
    %111 = vector.shape_cast %110 : vector<1x8x32xbf16> to vector<8x32xbf16>
    %112 = vector.extract_strided_slice %105 {offsets = [3, 0, 0], sizes = [1, 8, 32], strides = [1, 1, 1]} : vector<8x8x32xbf16> to vector<1x8x32xbf16>
    %113 = vector.shape_cast %112 : vector<1x8x32xbf16> to vector<8x32xbf16>
    %114 = vector.extract_strided_slice %105 {offsets = [4, 0, 0], sizes = [1, 8, 32], strides = [1, 1, 1]} : vector<8x8x32xbf16> to vector<1x8x32xbf16>
    %115 = vector.shape_cast %114 : vector<1x8x32xbf16> to vector<8x32xbf16>
    %116 = vector.extract_strided_slice %105 {offsets = [5, 0, 0], sizes = [1, 8, 32], strides = [1, 1, 1]} : vector<8x8x32xbf16> to vector<1x8x32xbf16>
    %117 = vector.shape_cast %116 : vector<1x8x32xbf16> to vector<8x32xbf16>
    %118 = vector.extract_strided_slice %105 {offsets = [6, 0, 0], sizes = [1, 8, 32], strides = [1, 1, 1]} : vector<8x8x32xbf16> to vector<1x8x32xbf16>
    %119 = vector.shape_cast %118 : vector<1x8x32xbf16> to vector<8x32xbf16>
    %120 = vector.extract_strided_slice %105 {offsets = [7, 0, 0], sizes = [1, 8, 32], strides = [1, 1, 1]} : vector<8x8x32xbf16> to vector<1x8x32xbf16>
    %121 = vector.shape_cast %120 : vector<1x8x32xbf16> to vector<8x32xbf16>
    %122 = tpu.concatenate %107, %109, %111, %113, %115, %117, %119, %121 in 1 : vector<8x32xbf16>, vector<8x32xbf16>, vector<8x32xbf16>, vector<8x32xbf16>, vector<8x32xbf16>, vector<8x32xbf16>, vector<8x32xbf16>, vector<8x32xbf16> -> vector<8x256xbf16>
    %cst_46 = arith.constant dense<0.000000e+00> : vector<8x256xf32>
    %123 = tpu.matmul %122, %15, %cst_46 {dimension_numbers = #tpu.dot_dimension_numbers<[1], [0], [0], [1], [0, 0, 1, 1], [], []>} : vector<8x256xbf16>, vector<256x256xbf16>, vector<8x256xf32> -> vector<8x256xf32>
    %124 = vector.broadcast %17 : vector<1x256xf32> to vector<8x256xf32>
    %125 = arith.addf %123, %124 : vector<8x256xf32>
    %126 = arith.addf %125, %11 : vector<8x256xf32>
    %cst_47 = arith.constant dense<0.000000e+00> : vector<8xf32>
    %127 = vector.multi_reduction <add>, %126, %cst_47 [1] : vector<8x256xf32> to vector<8xf32>
    %128 = vector.shape_cast %127 : vector<8xf32> to vector<8x1xf32>
    %cst_48 = arith.constant 2.560000e+02 : f32
    %129 = vector.broadcast %cst_48 : f32 to vector<8x1xf32>
    %130 = arith.divf %128, %129 : vector<8x1xf32>
    %131 = vector.broadcast %130 : vector<8x1xf32> to vector<8x256xf32>
    %132 = arith.subf %126, %131 : vector<8x256xf32>
    %133 = arith.mulf %132, %132 : vector<8x256xf32>
    %cst_49 = arith.constant dense<0.000000e+00> : vector<8xf32>
    %134 = vector.multi_reduction <add>, %133, %cst_49 [1] : vector<8x256xf32> to vector<8xf32>
    %135 = vector.shape_cast %134 : vector<8xf32> to vector<8x1xf32>
    %cst_50 = arith.constant 2.560000e+02 : f32
    %136 = vector.broadcast %cst_50 : f32 to vector<8x1xf32>
    %137 = arith.divf %135, %136 : vector<8x1xf32>
    %138 = vector.broadcast %130 : vector<8x1xf32> to vector<8x256xf32>
    %139 = arith.subf %126, %138 : vector<8x256xf32>
    %cst_51 = arith.constant 9.99999974E-6 : f32
    %140 = vector.broadcast %cst_51 : f32 to vector<8x1xf32>
    %141 = arith.addf %137, %140 : vector<8x1xf32>
    %142 = math.rsqrt %141 : vector<8x1xf32>
    %143 = vector.broadcast %142 : vector<8x1xf32> to vector<8x256xf32>
    %144 = arith.mulf %139, %143 : vector<8x256xf32>
    %145 = vector.broadcast %19 : vector<1x256xf32> to vector<8x256xf32>
    %146 = arith.mulf %144, %145 : vector<8x256xf32>
    %147 = vector.broadcast %21 : vector<1x256xf32> to vector<8x256xf32>
    %148 = arith.addf %146, %147 : vector<8x256xf32>
    %149 = arith.truncf %148 : vector<8x256xf32> to vector<8x256xbf16>
    %cst_52 = arith.constant dense<0.000000e+00> : vector<8x1024xf32>
    %150 = tpu.matmul %149, %23, %cst_52 {dimension_numbers = #tpu.dot_dimension_numbers<[1], [0], [0], [1], [0, 0, 1, 1], [], []>} : vector<8x256xbf16>, vector<256x1024xbf16>, vector<8x1024xf32> -> vector<8x1024xf32>
    %151 = vector.broadcast %25 : vector<1x1024xf32> to vector<8x1024xf32>
    %152 = arith.addf %150, %151 : vector<8x1024xf32>
    %cst_53 = arith.constant 0.000000e+00 : f32
    %153 = vector.broadcast %cst_53 : f32 to vector<8x1024xf32>
    %154 = arith.maximumf %152, %153 : vector<8x1024xf32>
    %155 = arith.truncf %154 : vector<8x1024xf32> to vector<8x1024xbf16>
    %cst_54 = arith.constant dense<0.000000e+00> : vector<8x256xf32>
    %156 = tpu.matmul %155, %27, %cst_54 {dimension_numbers = #tpu.dot_dimension_numbers<[1], [0], [0], [1], [0, 0, 1, 1], [], []>} : vector<8x1024xbf16>, vector<1024x256xbf16>, vector<8x256xf32> -> vector<8x256xf32>
    %157 = vector.broadcast %29 : vector<1x256xf32> to vector<8x256xf32>
    %158 = arith.addf %156, %157 : vector<8x256xf32>
    %159 = arith.addf %158, %148 : vector<8x256xf32>
    %cst_55 = arith.constant dense<0.000000e+00> : vector<8xf32>
    %160 = vector.multi_reduction <add>, %159, %cst_55 [1] : vector<8x256xf32> to vector<8xf32>
    %161 = vector.shape_cast %160 : vector<8xf32> to vector<8x1xf32>
    %cst_56 = arith.constant 2.560000e+02 : f32
    %162 = vector.broadcast %cst_56 : f32 to vector<8x1xf32>
    %163 = arith.divf %161, %162 : vector<8x1xf32>
    %164 = vector.broadcast %163 : vector<8x1xf32> to vector<8x256xf32>
    %165 = arith.subf %159, %164 : vector<8x256xf32>
    %166 = arith.mulf %165, %165 : vector<8x256xf32>
    %cst_57 = arith.constant dense<0.000000e+00> : vector<8xf32>
    %167 = vector.multi_reduction <add>, %166, %cst_57 [1] : vector<8x256xf32> to vector<8xf32>
    %168 = vector.shape_cast %167 : vector<8xf32> to vector<8x1xf32>
    %cst_58 = arith.constant 2.560000e+02 : f32
    %169 = vector.broadcast %cst_58 : f32 to vector<8x1xf32>
    %170 = arith.divf %168, %169 : vector<8x1xf32>
    %171 = vector.broadcast %163 : vector<8x1xf32> to vector<8x256xf32>
    %172 = arith.subf %159, %171 : vector<8x256xf32>
    %cst_59 = arith.constant 9.99999974E-6 : f32
    %173 = vector.broadcast %cst_59 : f32 to vector<8x1xf32>
    %174 = arith.addf %170, %173 : vector<8x1xf32>
    %175 = math.rsqrt %174 : vector<8x1xf32>
    %176 = vector.broadcast %175 : vector<8x1xf32> to vector<8x256xf32>
    %177 = arith.mulf %172, %176 : vector<8x256xf32>
    %178 = vector.broadcast %31 : vector<1x256xf32> to vector<8x256xf32>
    %179 = arith.mulf %177, %178 : vector<8x256xf32>
    %180 = vector.broadcast %33 : vector<1x256xf32> to vector<8x256xf32>
    %181 = arith.addf %179, %180 : vector<8x256xf32>
    %c1 = arith.constant 1 : index
    %c0_60 = arith.constant 0 : index
    %c0_61 = arith.constant 0 : index
    %182 = vector.load %arg3[%c1, %c0_60, %c0_61] : memref<2x256x768xbf16, #tpu.memory_space<vmem>>, vector<1x256x768xbf16>
    %183 = vector.shape_cast %182 : vector<1x256x768xbf16> to vector<256x768xbf16>
    %c1_62 = arith.constant 1 : index
    %c0_63 = arith.constant 0 : index
    %c0_64 = arith.constant 0 : index
    %184 = vector.load %arg4[%c1_62, %c0_63, %c0_64] : memref<2x256x256xbf16, #tpu.memory_space<vmem>>, vector<1x256x256xbf16>
    %185 = vector.shape_cast %184 : vector<1x256x256xbf16> to vector<256x256xbf16>
    %c1_65 = arith.constant 1 : index
    %c0_66 = arith.constant 0 : index
    %c0_67 = arith.constant 0 : index
    %186 = vector.load %arg5[%c1_65, %c0_66, %c0_67] : memref<2x1x256xf32, #tpu.memory_space<vmem>>, vector<1x1x256xf32>
    %187 = vector.shape_cast %186 : vector<1x1x256xf32> to vector<1x256xf32>
    %c1_68 = arith.constant 1 : index
    %c0_69 = arith.constant 0 : index
    %c0_70 = arith.constant 0 : index
    %188 = vector.load %arg6[%c1_68, %c0_69, %c0_70] : memref<2x1x256xf32, #tpu.memory_space<vmem>>, vector<1x1x256xf32>
    %189 = vector.shape_cast %188 : vector<1x1x256xf32> to vector<1x256xf32>
    %c1_71 = arith.constant 1 : index
    %c0_72 = arith.constant 0 : index
    %c0_73 = arith.constant 0 : index
    %190 = vector.load %arg7[%c1_71, %c0_72, %c0_73] : memref<2x1x256xf32, #tpu.memory_space<vmem>>, vector<1x1x256xf32>
    %191 = vector.shape_cast %190 : vector<1x1x256xf32> to vector<1x256xf32>
    %c1_74 = arith.constant 1 : index
    %c0_75 = arith.constant 0 : index
    %c0_76 = arith.constant 0 : index
    %192 = vector.load %arg8[%c1_74, %c0_75, %c0_76] : memref<2x256x1024xbf16, #tpu.memory_space<vmem>>, vector<1x256x1024xbf16>
    %193 = vector.shape_cast %192 : vector<1x256x1024xbf16> to vector<256x1024xbf16>
    %c1_77 = arith.constant 1 : index
    %c0_78 = arith.constant 0 : index
    %c0_79 = arith.constant 0 : index
    %194 = vector.load %arg9[%c1_77, %c0_78, %c0_79] : memref<2x1x1024xf32, #tpu.memory_space<vmem>>, vector<1x1x1024xf32>
    %195 = vector.shape_cast %194 : vector<1x1x1024xf32> to vector<1x1024xf32>
    %c1_80 = arith.constant 1 : index
    %c0_81 = arith.constant 0 : index
    %c0_82 = arith.constant 0 : index
    %196 = vector.load %arg10[%c1_80, %c0_81, %c0_82] : memref<2x1024x256xbf16, #tpu.memory_space<vmem>>, vector<1x1024x256xbf16>
    %197 = vector.shape_cast %196 : vector<1x1024x256xbf16> to vector<1024x256xbf16>
    %c1_83 = arith.constant 1 : index
    %c0_84 = arith.constant 0 : index
    %c0_85 = arith.constant 0 : index
    %198 = vector.load %arg11[%c1_83, %c0_84, %c0_85] : memref<2x1x256xf32, #tpu.memory_space<vmem>>, vector<1x1x256xf32>
    %199 = vector.shape_cast %198 : vector<1x1x256xf32> to vector<1x256xf32>
    %c1_86 = arith.constant 1 : index
    %c0_87 = arith.constant 0 : index
    %c0_88 = arith.constant 0 : index
    %200 = vector.load %arg12[%c1_86, %c0_87, %c0_88] : memref<2x1x256xf32, #tpu.memory_space<vmem>>, vector<1x1x256xf32>
    %201 = vector.shape_cast %200 : vector<1x1x256xf32> to vector<1x256xf32>
    %c1_89 = arith.constant 1 : index
    %c0_90 = arith.constant 0 : index
    %c0_91 = arith.constant 0 : index
    %202 = vector.load %arg13[%c1_89, %c0_90, %c0_91] : memref<2x1x256xf32, #tpu.memory_space<vmem>>, vector<1x1x256xf32>
    %203 = vector.shape_cast %202 : vector<1x1x256xf32> to vector<1x256xf32>
    %204 = arith.truncf %181 : vector<8x256xf32> to vector<8x256xbf16>
    %cst_92 = arith.constant dense<0.000000e+00> : vector<8x768xf32>
    %205 = tpu.matmul %204, %183, %cst_92 {dimension_numbers = #tpu.dot_dimension_numbers<[1], [0], [0], [1], [0, 0, 1, 1], [], []>} : vector<8x256xbf16>, vector<256x768xbf16>, vector<8x768xf32> -> vector<8x768xf32>
    %206 = arith.truncf %205 : vector<8x768xf32> to vector<8x768xbf16>
    %207 = vector.extract_strided_slice %206 {offsets = [0, 0], sizes = [8, 32], strides = [1, 1]} : vector<8x768xbf16> to vector<8x32xbf16>
    %208 = vector.extract_strided_slice %206 {offsets = [0, 32], sizes = [8, 32], strides = [1, 1]} : vector<8x768xbf16> to vector<8x32xbf16>
    %209 = vector.extract_strided_slice %206 {offsets = [0, 64], sizes = [8, 32], strides = [1, 1]} : vector<8x768xbf16> to vector<8x32xbf16>
    %210 = vector.extract_strided_slice %206 {offsets = [0, 96], sizes = [8, 32], strides = [1, 1]} : vector<8x768xbf16> to vector<8x32xbf16>
    %211 = vector.extract_strided_slice %206 {offsets = [0, 128], sizes = [8, 32], strides = [1, 1]} : vector<8x768xbf16> to vector<8x32xbf16>
    %212 = vector.extract_strided_slice %206 {offsets = [0, 160], sizes = [8, 32], strides = [1, 1]} : vector<8x768xbf16> to vector<8x32xbf16>
    %213 = vector.extract_strided_slice %206 {offsets = [0, 192], sizes = [8, 32], strides = [1, 1]} : vector<8x768xbf16> to vector<8x32xbf16>
    %214 = vector.extract_strided_slice %206 {offsets = [0, 224], sizes = [8, 32], strides = [1, 1]} : vector<8x768xbf16> to vector<8x32xbf16>
    %215 = vector.shape_cast %207 : vector<8x32xbf16> to vector<1x8x32xbf16>
    %216 = vector.shape_cast %208 : vector<8x32xbf16> to vector<1x8x32xbf16>
    %217 = vector.shape_cast %209 : vector<8x32xbf16> to vector<1x8x32xbf16>
    %218 = vector.shape_cast %210 : vector<8x32xbf16> to vector<1x8x32xbf16>
    %219 = vector.shape_cast %211 : vector<8x32xbf16> to vector<1x8x32xbf16>
    %220 = vector.shape_cast %212 : vector<8x32xbf16> to vector<1x8x32xbf16>
    %221 = vector.shape_cast %213 : vector<8x32xbf16> to vector<1x8x32xbf16>
    %222 = vector.shape_cast %214 : vector<8x32xbf16> to vector<1x8x32xbf16>
    %223 = tpu.concatenate %215, %216, %217, %218, %219, %220, %221, %222 in 0 : vector<1x8x32xbf16>, vector<1x8x32xbf16>, vector<1x8x32xbf16>, vector<1x8x32xbf16>, vector<1x8x32xbf16>, vector<1x8x32xbf16>, vector<1x8x32xbf16>, vector<1x8x32xbf16> -> vector<8x8x32xbf16>
    %224 = vector.extract_strided_slice %206 {offsets = [0, 256], sizes = [8, 32], strides = [1, 1]} : vector<8x768xbf16> to vector<8x32xbf16>
    %225 = vector.extract_strided_slice %206 {offsets = [0, 288], sizes = [8, 32], strides = [1, 1]} : vector<8x768xbf16> to vector<8x32xbf16>
    %226 = vector.extract_strided_slice %206 {offsets = [0, 320], sizes = [8, 32], strides = [1, 1]} : vector<8x768xbf16> to vector<8x32xbf16>
    %227 = vector.extract_strided_slice %206 {offsets = [0, 352], sizes = [8, 32], strides = [1, 1]} : vector<8x768xbf16> to vector<8x32xbf16>
    %228 = vector.extract_strided_slice %206 {offsets = [0, 384], sizes = [8, 32], strides = [1, 1]} : vector<8x768xbf16> to vector<8x32xbf16>
    %229 = vector.extract_strided_slice %206 {offsets = [0, 416], sizes = [8, 32], strides = [1, 1]} : vector<8x768xbf16> to vector<8x32xbf16>
    %230 = vector.extract_strided_slice %206 {offsets = [0, 448], sizes = [8, 32], strides = [1, 1]} : vector<8x768xbf16> to vector<8x32xbf16>
    %231 = vector.extract_strided_slice %206 {offsets = [0, 480], sizes = [8, 32], strides = [1, 1]} : vector<8x768xbf16> to vector<8x32xbf16>
    %232 = vector.shape_cast %224 : vector<8x32xbf16> to vector<1x8x32xbf16>
    %233 = vector.shape_cast %225 : vector<8x32xbf16> to vector<1x8x32xbf16>
    %234 = vector.shape_cast %226 : vector<8x32xbf16> to vector<1x8x32xbf16>
    %235 = vector.shape_cast %227 : vector<8x32xbf16> to vector<1x8x32xbf16>
    %236 = vector.shape_cast %228 : vector<8x32xbf16> to vector<1x8x32xbf16>
    %237 = vector.shape_cast %229 : vector<8x32xbf16> to vector<1x8x32xbf16>
    %238 = vector.shape_cast %230 : vector<8x32xbf16> to vector<1x8x32xbf16>
    %239 = vector.shape_cast %231 : vector<8x32xbf16> to vector<1x8x32xbf16>
    %240 = tpu.concatenate %232, %233, %234, %235, %236, %237, %238, %239 in 0 : vector<1x8x32xbf16>, vector<1x8x32xbf16>, vector<1x8x32xbf16>, vector<1x8x32xbf16>, vector<1x8x32xbf16>, vector<1x8x32xbf16>, vector<1x8x32xbf16>, vector<1x8x32xbf16> -> vector<8x8x32xbf16>
    %241 = vector.extract_strided_slice %206 {offsets = [0, 512], sizes = [8, 32], strides = [1, 1]} : vector<8x768xbf16> to vector<8x32xbf16>
    %242 = vector.extract_strided_slice %206 {offsets = [0, 544], sizes = [8, 32], strides = [1, 1]} : vector<8x768xbf16> to vector<8x32xbf16>
    %243 = vector.extract_strided_slice %206 {offsets = [0, 576], sizes = [8, 32], strides = [1, 1]} : vector<8x768xbf16> to vector<8x32xbf16>
    %244 = vector.extract_strided_slice %206 {offsets = [0, 608], sizes = [8, 32], strides = [1, 1]} : vector<8x768xbf16> to vector<8x32xbf16>
    %245 = vector.extract_strided_slice %206 {offsets = [0, 640], sizes = [8, 32], strides = [1, 1]} : vector<8x768xbf16> to vector<8x32xbf16>
    %246 = vector.extract_strided_slice %206 {offsets = [0, 672], sizes = [8, 32], strides = [1, 1]} : vector<8x768xbf16> to vector<8x32xbf16>
    %247 = vector.extract_strided_slice %206 {offsets = [0, 704], sizes = [8, 32], strides = [1, 1]} : vector<8x768xbf16> to vector<8x32xbf16>
    %248 = vector.extract_strided_slice %206 {offsets = [0, 736], sizes = [8, 32], strides = [1, 1]} : vector<8x768xbf16> to vector<8x32xbf16>
    %249 = vector.shape_cast %241 : vector<8x32xbf16> to vector<1x8x32xbf16>
    %250 = vector.shape_cast %242 : vector<8x32xbf16> to vector<1x8x32xbf16>
    %251 = vector.shape_cast %243 : vector<8x32xbf16> to vector<1x8x32xbf16>
    %252 = vector.shape_cast %244 : vector<8x32xbf16> to vector<1x8x32xbf16>
    %253 = vector.shape_cast %245 : vector<8x32xbf16> to vector<1x8x32xbf16>
    %254 = vector.shape_cast %246 : vector<8x32xbf16> to vector<1x8x32xbf16>
    %255 = vector.shape_cast %247 : vector<8x32xbf16> to vector<1x8x32xbf16>
    %256 = vector.shape_cast %248 : vector<8x32xbf16> to vector<1x8x32xbf16>
    %257 = tpu.concatenate %249, %250, %251, %252, %253, %254, %255, %256 in 0 : vector<1x8x32xbf16>, vector<1x8x32xbf16>, vector<1x8x32xbf16>, vector<1x8x32xbf16>, vector<1x8x32xbf16>, vector<1x8x32xbf16>, vector<1x8x32xbf16>, vector<1x8x32xbf16> -> vector<8x8x32xbf16>
    "tpu.trace_start"() <{level = 10 : i32, message = "bqd,bkd->bqk"}> : () -> ()
    %cst_93 = arith.constant dense<0.000000e+00> : vector<8x8x8xf32>
    %258 = tpu.matmul %223, %240, %cst_93 {dimension_numbers = #tpu.dot_dimension_numbers<[2], [2], [1], [1], [0, 0, 0, 1, 1, 1], [0], [0]>} : vector<8x8x32xbf16>, vector<8x8x32xbf16>, vector<8x8x8xf32> -> vector<8x8x8xf32>
    "tpu.trace_stop"() : () -> ()
    %259 = vector.broadcast %9 : vector<8x1x8xf32> to vector<8x8x8xf32>
    %260 = arith.addf %258, %259 : vector<8x8x8xf32>
    %cst_94 = arith.constant 6.250000e-02 : f32
    %261 = vector.broadcast %cst_94 : f32 to vector<8x8x8xf32>
    %262 = arith.mulf %260, %261 : vector<8x8x8xf32>
    %cst_95 = arith.constant dense<0xFF800000> : vector<8x8xf32>
    %263 = vector.multi_reduction <maximumf>, %262, %cst_95 [2] : vector<8x8x8xf32> to vector<8x8xf32>
    %264 = vector.shape_cast %263 : vector<8x8xf32> to vector<8x8x1xf32>
    %265 = vector.broadcast %264 : vector<8x8x1xf32> to vector<8x8x8xf32>
    %266 = arith.subf %262, %265 : vector<8x8x8xf32>
    %267 = math.exp %266 : vector<8x8x8xf32>
    %cst_96 = arith.constant dense<0.000000e+00> : vector<8x8xf32>
    %268 = vector.multi_reduction <add>, %267, %cst_96 [2] : vector<8x8x8xf32> to vector<8x8xf32>
    %269 = vector.shape_cast %268 : vector<8x8xf32> to vector<8x8x1xf32>
    %270 = tpu.reciprocal %269 {approx = true} : vector<8x8x1xf32> -> vector<8x8x1xf32>
    %271 = vector.broadcast %270 : vector<8x8x1xf32> to vector<8x8x8xf32>
    %272 = arith.mulf %267, %271 : vector<8x8x8xf32>
    %273 = arith.truncf %272 : vector<8x8x8xf32> to vector<8x8x8xbf16>
    "tpu.trace_start"() <{level = 10 : i32, message = "bqk,bkd->bqd"}> : () -> ()
    %cst_97 = arith.constant dense<0.000000e+00> : vector<8x8x32xf32>
    %274 = tpu.matmul %273, %257, %cst_97 {dimension_numbers = #tpu.dot_dimension_numbers<[2], [1], [1], [2], [0, 0, 0, 1, 1, 2], [0], [0]>} : vector<8x8x8xbf16>, vector<8x8x32xbf16>, vector<8x8x32xf32> -> vector<8x8x32xf32>
    "tpu.trace_stop"() : () -> ()
    %275 = arith.truncf %274 : vector<8x8x32xf32> to vector<8x8x32xbf16>
    %276 = vector.extract_strided_slice %275 {offsets = [0, 0, 0], sizes = [1, 8, 32], strides = [1, 1, 1]} : vector<8x8x32xbf16> to vector<1x8x32xbf16>
    %277 = vector.shape_cast %276 : vector<1x8x32xbf16> to vector<8x32xbf16>
    %278 = vector.extract_strided_slice %275 {offsets = [1, 0, 0], sizes = [1, 8, 32], strides = [1, 1, 1]} : vector<8x8x32xbf16> to vector<1x8x32xbf16>
    %279 = vector.shape_cast %278 : vector<1x8x32xbf16> to vector<8x32xbf16>
    %280 = vector.extract_strided_slice %275 {offsets = [2, 0, 0], sizes = [1, 8, 32], strides = [1, 1, 1]} : vector<8x8x32xbf16> to vector<1x8x32xbf16>
    %281 = vector.shape_cast %280 : vector<1x8x32xbf16> to vector<8x32xbf16>
    %282 = vector.extract_strided_slice %275 {offsets = [3, 0, 0], sizes = [1, 8, 32], strides = [1, 1, 1]} : vector<8x8x32xbf16> to vector<1x8x32xbf16>
    %283 = vector.shape_cast %282 : vector<1x8x32xbf16> to vector<8x32xbf16>
    %284 = vector.extract_strided_slice %275 {offsets = [4, 0, 0], sizes = [1, 8, 32], strides = [1, 1, 1]} : vector<8x8x32xbf16> to vector<1x8x32xbf16>
    %285 = vector.shape_cast %284 : vector<1x8x32xbf16> to vector<8x32xbf16>
    %286 = vector.extract_strided_slice %275 {offsets = [5, 0, 0], sizes = [1, 8, 32], strides = [1, 1, 1]} : vector<8x8x32xbf16> to vector<1x8x32xbf16>
    %287 = vector.shape_cast %286 : vector<1x8x32xbf16> to vector<8x32xbf16>
    %288 = vector.extract_strided_slice %275 {offsets = [6, 0, 0], sizes = [1, 8, 32], strides = [1, 1, 1]} : vector<8x8x32xbf16> to vector<1x8x32xbf16>
    %289 = vector.shape_cast %288 : vector<1x8x32xbf16> to vector<8x32xbf16>
    %290 = vector.extract_strided_slice %275 {offsets = [7, 0, 0], sizes = [1, 8, 32], strides = [1, 1, 1]} : vector<8x8x32xbf16> to vector<1x8x32xbf16>
    %291 = vector.shape_cast %290 : vector<1x8x32xbf16> to vector<8x32xbf16>
    %292 = tpu.concatenate %277, %279, %281, %283, %285, %287, %289, %291 in 1 : vector<8x32xbf16>, vector<8x32xbf16>, vector<8x32xbf16>, vector<8x32xbf16>, vector<8x32xbf16>, vector<8x32xbf16>, vector<8x32xbf16>, vector<8x32xbf16> -> vector<8x256xbf16>
    %cst_98 = arith.constant dense<0.000000e+00> : vector<8x256xf32>
    %293 = tpu.matmul %292, %185, %cst_98 {dimension_numbers = #tpu.dot_dimension_numbers<[1], [0], [0], [1], [0, 0, 1, 1], [], []>} : vector<8x256xbf16>, vector<256x256xbf16>, vector<8x256xf32> -> vector<8x256xf32>
    %294 = vector.broadcast %187 : vector<1x256xf32> to vector<8x256xf32>
    %295 = arith.addf %293, %294 : vector<8x256xf32>
    %296 = arith.addf %295, %181 : vector<8x256xf32>
    %cst_99 = arith.constant dense<0.000000e+00> : vector<8xf32>
    %297 = vector.multi_reduction <add>, %296, %cst_99 [1] : vector<8x256xf32> to vector<8xf32>
    %298 = vector.shape_cast %297 : vector<8xf32> to vector<8x1xf32>
    %cst_100 = arith.constant 2.560000e+02 : f32
    %299 = vector.broadcast %cst_100 : f32 to vector<8x1xf32>
    %300 = arith.divf %298, %299 : vector<8x1xf32>
    %301 = vector.broadcast %300 : vector<8x1xf32> to vector<8x256xf32>
    %302 = arith.subf %296, %301 : vector<8x256xf32>
    %303 = arith.mulf %302, %302 : vector<8x256xf32>
    %cst_101 = arith.constant dense<0.000000e+00> : vector<8xf32>
    %304 = vector.multi_reduction <add>, %303, %cst_101 [1] : vector<8x256xf32> to vector<8xf32>
    %305 = vector.shape_cast %304 : vector<8xf32> to vector<8x1xf32>
    %cst_102 = arith.constant 2.560000e+02 : f32
    %306 = vector.broadcast %cst_102 : f32 to vector<8x1xf32>
    %307 = arith.divf %305, %306 : vector<8x1xf32>
    %308 = vector.broadcast %300 : vector<8x1xf32> to vector<8x256xf32>
    %309 = arith.subf %296, %308 : vector<8x256xf32>
    %cst_103 = arith.constant 9.99999974E-6 : f32
    %310 = vector.broadcast %cst_103 : f32 to vector<8x1xf32>
    %311 = arith.addf %307, %310 : vector<8x1xf32>
    %312 = math.rsqrt %311 : vector<8x1xf32>
    %313 = vector.broadcast %312 : vector<8x1xf32> to vector<8x256xf32>
    %314 = arith.mulf %309, %313 : vector<8x256xf32>
    %315 = vector.broadcast %189 : vector<1x256xf32> to vector<8x256xf32>
    %316 = arith.mulf %314, %315 : vector<8x256xf32>
    %317 = vector.broadcast %191 : vector<1x256xf32> to vector<8x256xf32>
    %318 = arith.addf %316, %317 : vector<8x256xf32>
    %319 = arith.truncf %318 : vector<8x256xf32> to vector<8x256xbf16>
    %cst_104 = arith.constant dense<0.000000e+00> : vector<8x1024xf32>
    %320 = tpu.matmul %319, %193, %cst_104 {dimension_numbers = #tpu.dot_dimension_numbers<[1], [0], [0], [1], [0, 0, 1, 1], [], []>} : vector<8x256xbf16>, vector<256x1024xbf16>, vector<8x1024xf32> -> vector<8x1024xf32>
    %321 = vector.broadcast %195 : vector<1x1024xf32> to vector<8x1024xf32>
    %322 = arith.addf %320, %321 : vector<8x1024xf32>
    %cst_105 = arith.constant 0.000000e+00 : f32
    %323 = vector.broadcast %cst_105 : f32 to vector<8x1024xf32>
    %324 = arith.maximumf %322, %323 : vector<8x1024xf32>
    %325 = arith.truncf %324 : vector<8x1024xf32> to vector<8x1024xbf16>
    %cst_106 = arith.constant dense<0.000000e+00> : vector<8x256xf32>
    %326 = tpu.matmul %325, %197, %cst_106 {dimension_numbers = #tpu.dot_dimension_numbers<[1], [0], [0], [1], [0, 0, 1, 1], [], []>} : vector<8x1024xbf16>, vector<1024x256xbf16>, vector<8x256xf32> -> vector<8x256xf32>
    %327 = vector.broadcast %199 : vector<1x256xf32> to vector<8x256xf32>
    %328 = arith.addf %326, %327 : vector<8x256xf32>
    %329 = arith.addf %328, %318 : vector<8x256xf32>
    %cst_107 = arith.constant dense<0.000000e+00> : vector<8xf32>
    %330 = vector.multi_reduction <add>, %329, %cst_107 [1] : vector<8x256xf32> to vector<8xf32>
    %331 = vector.shape_cast %330 : vector<8xf32> to vector<8x1xf32>
    %cst_108 = arith.constant 2.560000e+02 : f32
    %332 = vector.broadcast %cst_108 : f32 to vector<8x1xf32>
    %333 = arith.divf %331, %332 : vector<8x1xf32>
    %334 = vector.broadcast %333 : vector<8x1xf32> to vector<8x256xf32>
    %335 = arith.subf %329, %334 : vector<8x256xf32>
    %336 = arith.mulf %335, %335 : vector<8x256xf32>
    %cst_109 = arith.constant dense<0.000000e+00> : vector<8xf32>
    %337 = vector.multi_reduction <add>, %336, %cst_109 [1] : vector<8x256xf32> to vector<8xf32>
    %338 = vector.shape_cast %337 : vector<8xf32> to vector<8x1xf32>
    %cst_110 = arith.constant 2.560000e+02 : f32
    %339 = vector.broadcast %cst_110 : f32 to vector<8x1xf32>
    %340 = arith.divf %338, %339 : vector<8x1xf32>
    %341 = vector.broadcast %333 : vector<8x1xf32> to vector<8x256xf32>
    %342 = arith.subf %329, %341 : vector<8x256xf32>
    %cst_111 = arith.constant 9.99999974E-6 : f32
    %343 = vector.broadcast %cst_111 : f32 to vector<8x1xf32>
    %344 = arith.addf %340, %343 : vector<8x1xf32>
    %345 = math.rsqrt %344 : vector<8x1xf32>
    %346 = vector.broadcast %345 : vector<8x1xf32> to vector<8x256xf32>
    %347 = arith.mulf %342, %346 : vector<8x256xf32>
    %348 = vector.broadcast %201 : vector<1x256xf32> to vector<8x256xf32>
    %349 = arith.mulf %347, %348 : vector<8x256xf32>
    %350 = vector.broadcast %203 : vector<1x256xf32> to vector<8x256xf32>
    %351 = arith.addf %349, %350 : vector<8x256xf32>
    %352 = vector.shape_cast %351 : vector<8x256xf32> to vector<1x8x256xf32>
    %353 = vector.extract_strided_slice %352 {offsets = [0, 0, 0], sizes = [1, 1, 256], strides = [1, 1, 1]} : vector<1x8x256xf32> to vector<1x1x256xf32>
    %354 = vector.shape_cast %353 : vector<1x1x256xf32> to vector<1x256xf32>
    %355 = arith.truncf %354 : vector<1x256xf32> to vector<1x256xbf16>
    %c0_112 = arith.constant 0 : index
    %c0_113 = arith.constant 0 : index
    %356 = vector.load %arg14[%c0_112, %c0_113] : memref<256x128xbf16, #tpu.memory_space<vmem>>, vector<256x128xbf16>
    %cst_114 = arith.constant dense<0.000000e+00> : vector<1x128xf32>
    %357 = tpu.matmul %355, %356, %cst_114 {dimension_numbers = #tpu.dot_dimension_numbers<[1], [0], [0], [1], [0, 0, 1, 1], [], []>} : vector<1x256xbf16>, vector<256x128xbf16>, vector<1x128xf32> -> vector<1x128xf32>
    %c0_115 = arith.constant 0 : index
    %c0_116 = arith.constant 0 : index
    %358 = vector.load %arg15[%c0_115, %c0_116] : memref<1x128xf32, #tpu.memory_space<vmem>>, vector<1x128xf32>
    %359 = arith.addf %357, %358 : vector<1x128xf32>
    %360 = vector.shape_cast %359 : vector<1x128xf32> to vector<1x1x128xf32>
    %c0_117 = arith.constant 0 : index
    %c0_118 = arith.constant 0 : index
    %c0_119 = arith.constant 0 : index
    %361 = vector.load %arg16[%c0_117, %c0_118, %c0_119] : memref<1x1x128xf32, #tpu.memory_space<vmem>>, vector<1x1x128xf32>
    tpu.vector_store %arg16[%c0_117, %c0_118, %c0_119], %360 {strides = array<i32>} : memref<1x1x128xf32, #tpu.memory_space<vmem>>, vector<1x1x128xf32>,
    return
  }
  func.func @transform_0(%arg0: i32) -> (i32, i32, i32) {
    %c0_i32 = arith.constant 0 : i32
    %c0_i32_0 = arith.constant 0 : i32
    %c0_i32_1 = arith.constant 0 : i32
    return %arg0, %c0_i32, %c0_i32_0 : i32, i32, i32
  }
  func.func @transform_1(%arg0: i32) -> (i32, i32, i32) {
    %c0_i32 = arith.constant 0 : i32
    %c0_i32_0 = arith.constant 0 : i32
    %c0_i32_1 = arith.constant 0 : i32
    return %arg0, %c0_i32, %c0_i32_0 : i32, i32, i32
  }
  func.func @transform_2(%arg0: i32) -> (i32, i32, i32) {
    %c0_i32 = arith.constant 0 : i32
    %c0_i32_0 = arith.constant 0 : i32
    %c0_i32_1 = arith.constant 0 : i32
    %c0_i32_2 = arith.constant 0 : i32
    return %c0_i32, %c0_i32_0, %c0_i32_1 : i32, i32, i32
  }
  func.func @transform_3(%arg0: i32) -> (i32, i32, i32) {
    %c0_i32 = arith.constant 0 : i32
    %c0_i32_0 = arith.constant 0 : i32
    %c0_i32_1 = arith.constant 0 : i32
    %c0_i32_2 = arith.constant 0 : i32
    return %c0_i32, %c0_i32_0, %c0_i32_1 : i32, i32, i32
  }
  func.func @transform_4(%arg0: i32) -> (i32, i32, i32) {
    %c0_i32 = arith.constant 0 : i32
    %c0_i32_0 = arith.constant 0 : i32
    %c0_i32_1 = arith.constant 0 : i32
    %c0_i32_2 = arith.constant 0 : i32
    return %c0_i32, %c0_i32_0, %c0_i32_1 : i32, i32, i32
  }
  func.func @transform_5(%arg0: i32) -> (i32, i32, i32) {
    %c0_i32 = arith.constant 0 : i32
    %c0_i32_0 = arith.constant 0 : i32
    %c0_i32_1 = arith.constant 0 : i32
    %c0_i32_2 = arith.constant 0 : i32
    return %c0_i32, %c0_i32_0, %c0_i32_1 : i32, i32, i32
  }
  func.func @transform_6(%arg0: i32) -> (i32, i32, i32) {
    %c0_i32 = arith.constant 0 : i32
    %c0_i32_0 = arith.constant 0 : i32
    %c0_i32_1 = arith.constant 0 : i32
    %c0_i32_2 = arith.constant 0 : i32
    return %c0_i32, %c0_i32_0, %c0_i32_1 : i32, i32, i32
  }
  func.func @transform_7(%arg0: i32) -> (i32, i32, i32) {
    %c0_i32 = arith.constant 0 : i32
    %c0_i32_0 = arith.constant 0 : i32
    %c0_i32_1 = arith.constant 0 : i32
    %c0_i32_2 = arith.constant 0 : i32
    return %c0_i32, %c0_i32_0, %c0_i32_1 : i32, i32, i32
  }
  func.func @transform_8(%arg0: i32) -> (i32, i32, i32) {
    %c0_i32 = arith.constant 0 : i32
    %c0_i32_0 = arith.constant 0 : i32
    %c0_i32_1 = arith.constant 0 : i32
    %c0_i32_2 = arith.constant 0 : i32
    return %c0_i32, %c0_i32_0, %c0_i32_1 : i32, i32, i32
  }
  func.func @transform_9(%arg0: i32) -> (i32, i32, i32) {
    %c0_i32 = arith.constant 0 : i32
    %c0_i32_0 = arith.constant 0 : i32
    %c0_i32_1 = arith.constant 0 : i32
    %c0_i32_2 = arith.constant 0 : i32
    return %c0_i32, %c0_i32_0, %c0_i32_1 : i32, i32, i32
  }
  func.func @transform_10(%arg0: i32) -> (i32, i32, i32) {
    %c0_i32 = arith.constant 0 : i32
    %c0_i32_0 = arith.constant 0 : i32
    %c0_i32_1 = arith.constant 0 : i32
    %c0_i32_2 = arith.constant 0 : i32
    return %c0_i32, %c0_i32_0, %c0_i32_1 : i32, i32, i32
  }
  func.func @transform_11(%arg0: i32) -> (i32, i32, i32) {
    %c0_i32 = arith.constant 0 : i32
    %c0_i32_0 = arith.constant 0 : i32
    %c0_i32_1 = arith.constant 0 : i32
    %c0_i32_2 = arith.constant 0 : i32
    return %c0_i32, %c0_i32_0, %c0_i32_1 : i32, i32, i32
  }
  func.func @transform_12(%arg0: i32) -> (i32, i32, i32) {
    %c0_i32 = arith.constant 0 : i32
    %c0_i32_0 = arith.constant 0 : i32
    %c0_i32_1 = arith.constant 0 : i32
    %c0_i32_2 = arith.constant 0 : i32
    return %c0_i32, %c0_i32_0, %c0_i32_1 : i32, i32, i32
  }
  func.func @transform_13(%arg0: i32) -> (i32, i32) {
    %c0_i32 = arith.constant 0 : i32
    %c0_i32_0 = arith.constant 0 : i32
    %c0_i32_1 = arith.constant 0 : i32
    return %c0_i32, %c0_i32_0 : i32, i32
  }
  func.func @transform_14(%arg0: i32) -> (i32, i32) {
    %c0_i32 = arith.constant 0 : i32
    %c0_i32_0 = arith.constant 0 : i32
    %c0_i32_1 = arith.constant 0 : i32
    return %c0_i32, %c0_i32_0 : i32, i32
  }
  func.func @transform_15(%arg0: i32) -> (i32, i32, i32) {
    %c0_i32 = arith.constant 0 : i32
    %c0_i32_0 = arith.constant 0 : i32
    %c0_i32_1 = arith.constant 0 : i32
    return %arg0, %c0_i32, %c0_i32_0 : i32, i32, i32
  }
}

</mosaic_0001>

<bundles_post_ra>
// kernel: tpu_custom_call.1
= control target key start
LH: loop header
LB: loop body
LE: loop exit
PB: predicated region body
PF: predicated region fallthrough
CT: control target
= control target key end

     0   :  { %s12206_s0 = inlined_call_operand.hbm [shape: f32[2,8,256], index: 0, kind: input, shape index: {}]   ;;  %s12207_s1 = inlined_call_operand.hbm [shape: f32[2,1,8], index: 1, kind: input, shape index: {}]   ;;  %s12208_s2 = inlined_call_operand.hbm [shape: bf16[2,256,768], index: 2, kind: input, shape index: {}]   ;;  %s12209_s3 = inlined_call_operand.hbm [shape: bf16[2,256,256], index: 3, kind: input, shape index: {}]   ;;  %s12210_s4 = inlined_call_operand.vmem [shape: f32[2,1,256], index: 4, kind: input, shape index: {}]   ;;  %s12211_s5 = inlined_call_operand.vmem [shape: f32[2,1,256], index: 5, kind: input, shape index: {}]   ;;  %s12212_s6 = inlined_call_operand.vmem [shape: f32[2,1,256], index: 6, kind: input, shape index: {}]   ;;  %s12213_s7 = inlined_call_operand.hbm [shape: bf16[2,256,1024], index: 7, kind: input, shape index: {}]   ;;  %s12214_s8 = inlined_call_operand.vmem [shape: f32[2,1,1024], index: 8, kind: input, shape index: {}]   ;;  %s12215_s9 = inlined_call_operand.hbm [shape: bf16[2,1024,256], index: 9, kind: input, shape index: {}]   ;;  %s12216_s10 = inlined_call_operand.vmem [shape: f32[2,1,256], index: 10, kind: input, shape index: {}]   ;;  %s12217_s11 = inlined_call_operand.vmem [shape: f32[2,1,256], index: 11, kind: input, shape index: {}]   ;;  %s12218_s12 = inlined_call_operand.vmem [shape: f32[2,1,256], index: 12, kind: input, shape index: {}]   ;;  %s12219_s13 = inlined_call_operand.hbm [shape: bf16[256,128], index: 13, kind: input, shape index: {}]   ;;  %s12220_s14 = inlined_call_operand.vmem [shape: f32[1,128], index: 14, kind: input, shape index: {}]   ;;  %s12221_s15 = inlined_call_operand.hbm [shape: f32[2,1,128], index: 15, kind: output, shape index: {}]  }
   0x1   :  { %12233 = sst [smem:[#allocation21_spill]] %s12206_s0 }
   0x2   :  { %12234 = sst [smem:[#allocation22_spill]] %s12208_s2 }
   0x3   :  { %12235 = sst [smem:[#allocation23_spill]] %s12209_s3 }
   0x4   :  { %12236 = sst [smem:[#allocation24_spill]] %s12212_s6 }
   0x5   :  { %12237 = sst [smem:[#allocation25_spill]] %s12214_s8 }
   0x6   :  { %12238 = sst [smem:[#allocation26_spill]] %s12216_s10 }
   0x7   :  { %12239 = sst [smem:[#allocation27_spill]] %s12217_s11 }
   0x8   :  { %12240 = sst [smem:[#allocation28_spill]] %s12218_s12 }
   0x9   :  { %12241 = sst [smem:[#allocation29_spill]] %s12220_s14 }
   0xa   :  { %12242 = sst [smem:[#allocation30_spill]] %s12221_s15 }
   0xb   :  { %20 = vsyncpa [#allocation3], 0 }
   0xc   :  { %22 = vsyncpa [#allocation3 + $0x1], 0 }
   0xd   :  { %23 = vsyncpa [#allocation6], 0 }
   0xe   :  { %25 = vsyncpa [#allocation6 + $0x1], 0 }
   0xf   :  { %26 = vsyncpa [#allocation9], 0 }
  0x10   :  { %27 = vsyncpa [#allocation12], 0 }
  0x11   :  { %28 = vsyncpa [#allocation4], 0 }
  0x12   :  { %30 = vsyncpa [#allocation4 + $0x1], 0  ;;  %s11253_s18 = smov 0   ;;  %s11255_s19 = smov 0  }
  0x13   :  { %s11257_s20 = smov 0   ;;  %s11259_s21 = smov 0  }
  0x14 LB: > { %s11152_s22 = smov [#allocation7]   ;;  %s11274_s24 = sadd.s32 4294967295, %s11150_s21   ;;  %s11150_s21 = sphi %s11259_s21, %s12276_s21   ;;  %s11146_s20 = sphi %s11257_s20, %s12275_s20   ;;  %s11142_s19 = sphi %s11255_s19, %s12274_s19   ;;  %s11138_s18 = sphi %s11253_s18, %s12273_s18  }
  0x15   : > { %s404_s23 = sshll.u32 %s11152_s22, 4  ;;  %p8772_p0 = scmp.ge.s32.totalorder %s11150_s21, 1  ;;  %s11279_s23 = int_to_ptr.vmem [resolvable:$true] %s404_s23 }
  0x16   : > { %p12228_p1 = scmp.eq.s32.totalorder %s11274_s24, 0  ;;  %p392_p2 = scmp.lt.s32.totalorder %s11150_s21, 3 }
  0x17   : > { %s11153_s26 = smov [#allocation8]   ;;  %s11154_s29 = smov [#allocation11]  }
  0x18   : > { %p11281_p3 = pnand %p8772_p0, %p392_p2  ;;  %s417_s27 = sshll.u32 %s11153_s26, 4  ;;  %s11294_s27 = int_to_ptr.vmem [resolvable:$true] %s417_s27 }
  0x19   : > { %s11296_s30 = sshll.u32 %s11154_s29, 4  ;;  %s12245_s2 = sld [smem:[#allocation22_spill]]  ;;  %s456_s30 = int_to_ptr.vmem [resolvable:$true] %s11296_s30 }
  0x1a   : > { %s12243_s25 = scalar_select %p11281_p3, 1, 0 }
  0x1b   : > { %p9921_p5 = pneg %p11281_p3 }
  0x1d   : > { %p11290_p6 = pnand %p9921_p5, %p12228_p1 }
  0x1f   : > { %s10868_s22 = scalar_lea.hbm %s12245_s2, 24576  ;;  %p11306_p8 = pneg %p11290_p6 }
  0x20   : > { %p10869_p7 = scmp.ne.s32.totalorder %s12245_s2, %s10868_s22  ;;  %p10875_p11 = scmp.lt.u32.totalorder %s10868_s22, %s12245_s2 }
  0x22   : > { %p10871_p9 = pnand %p11306_p8, %p10869_p7 }
  0x24   : > { %p10872_p10 = pneg %p10871_p9 }
  0x26   : > { %p10877_p12 = pnand %p10875_p11, %p10872_p10 }
  0x28   : > { %10880 = shalt.err (!%p10877_p12)
}
  0x29   : > { %s10881_s14 = scalar_lea.vmem %s11279_s23, 24576  ;;  %p10889_p5 = scmp.lt.s32.totalorder %s11279_s23, %s11279_s23 }
  0x2a   : > { %p10882_p13 = scmp.ne.s32.totalorder %s11279_s23, %s10881_s14  ;;  %p10890_p4 = scmp.lt.s32.totalorder %s10881_s14, %s10881_s14 }
  0x2c   : > { %p10884_p0 = pnand %p10882_p13, %p11306_p8  ;;  %p10891_p7 = por %p10890_p4, %p10889_p5 }
  0x2e   : > { %p10885_p2 = pneg %p10884_p0 }
  0x30   : > { %p10892_p9 = pnand %p10891_p7, %p10885_p2 }
  0x32   : > { %10895 = shalt.err (!%p10892_p9)
}
  0x33   : > { %s11155_s15 = smov 384   ;;  %s11156_s12 = smov 24  }
  0x34   : > { %9924 = dma.hbm_to_vmem [thread:$0]  (!%p11290_p6), %s12245_s2, 24576, %s11279_s23, [#allocation6], %s11155_s15, %s11155_s15, %s11156_s12  }
  0x35   : > { %s12247_s3 = sld [smem:[#allocation23_spill]] }
  0x3b   : > { %s10896_s11 = scalar_lea.hbm %s12247_s3, 8192 }
  0x3c   : > { %p10897_p4 = scmp.ne.s32.totalorder %s12247_s3, %s10896_s11  ;;  %p10903_p12 = scmp.lt.u32.totalorder %s10896_s11, %s12247_s3 }
  0x3e   : > { %p10899_p10 = pnand %p10897_p4, %p11306_p8 }
  0x40   : > { %p10900_p11 = pneg %p10899_p10 }
  0x42   : > { %p10905_p13 = pnand %p10903_p12, %p10900_p11 }
  0x44   : > { %10908 = shalt.err (!%p10905_p13)
}
  0x45   : > { %s10909_s23 = scalar_lea.vmem %s11294_s27, 8192  ;;  %p10917_p7 = scmp.lt.s32.totalorder %s11294_s27, %s11294_s27 }
  0x46   : > { %p10910_p0 = scmp.ne.s32.totalorder %s11294_s27, %s10909_s23  ;;  %p10918_p9 = scmp.lt.s32.totalorder %s10909_s23, %s10909_s23 }
  0x48   : > { %p10912_p2 = pnand %p10910_p0, %p11306_p8  ;;  %p10919_p4 = por %p10918_p9, %p10917_p7 }
  0x4a   : > { %p10913_p5 = pneg %p10912_p2 }
  0x4c   : > { %p10920_p10 = pnand %p10919_p4, %p10913_p5 }
  0x4e   : > { %10923 = shalt.err (!%p10920_p10)
}
  0x4f   : > { %s11157_s8 = smov 128   ;;  %s11158_s6 = smov 8  }
  0x50   : > { %9927 = dma.hbm_to_vmem [thread:$0]  (!%p11290_p6), %s12247_s3, 8192, %s11294_s27, [#allocation9], %s11157_s8, %s11157_s8, %s11158_s6  }
  0x51   : > { %s10924_s16 = scalar_lea.hbm %s12215_s9, 32768 }
  0x52   : > { %p10925_p11 = scmp.ne.s32.totalorder %s12215_s9, %s10924_s16  ;;  %p10931_p0 = scmp.lt.u32.totalorder %s10924_s16, %s12215_s9 }
  0x54   : > { %p10927_p12 = pnand %p10925_p11, %p11306_p8 }
  0x56   : > { %p10928_p13 = pneg %p10927_p12 }
  0x58   : > { %p10933_p2 = pnand %p10931_p0, %p10928_p13 }
  0x5a   : > { %10936 = shalt.err (!%p10933_p2)
}
  0x5b   : > { %s10937_s23 = scalar_lea.vmem %s456_s30, 32768  ;;  %p10945_p4 = scmp.lt.s32.totalorder %s456_s30, %s456_s30 }
  0x5c   : > { %p10938_p5 = scmp.ne.s32.totalorder %s456_s30, %s10937_s23  ;;  %p10946_p10 = scmp.lt.s32.totalorder %s10937_s23, %s10937_s23 }
  0x5e   : > { %p10940_p7 = pnand %p10938_p5, %p11306_p8  ;;  %p10947_p1 = por %p10946_p10, %p10945_p4 }
  0x60   : > { %p10941_p9 = pneg %p10940_p7 }
  0x62   : > { %p10948_p3 = pnand %p10947_p1, %p10941_p9 }
  0x64   : > { %10951 = shalt.err (!%p10948_p3)
}
  0x65   : > { %9933 = dma.hbm_to_vmem [thread:$0]  (!%p11290_p6), %s12215_s9, 32768, %s456_s30, [#allocation12], %s11157_s8, %s11157_s8, %s11158_s6  }
  0x66   : > { %s11159_s11 = smov [#allocation10]   ;;  %s10952_s17 = scalar_lea.hbm %s12213_s7, 32768 }
  0x67   : > { %s439_s15 = sshll.u32 %s11159_s11, 4  ;;  %p10953_p11 = scmp.ne.s32.totalorder %s12213_s7, %s10952_s17  ;;  %s440_s15 = int_to_ptr.vmem [resolvable:$true] %s439_s15 }
  0x68   : > { %p10959_p12 = scmp.lt.u32.totalorder %s10952_s17, %s12213_s7 }
  0x69   : > { %p10955_p1 = pnand %p10953_p11, %p11306_p8 }
  0x6b   : > { %p10956_p3 = pneg %p10955_p1 }
  0x6d   : > { %p10961_p13 = pnand %p10959_p12, %p10956_p3 }
  0x6f   : > { %10964 = shalt.err (!%p10961_p13)
}
  0x70   : > { %s10965_s30 = scalar_lea.vmem %s440_s15, 32768  ;;  %p10973_p7 = scmp.lt.s32.totalorder %s440_s15, %s440_s15 }
  0x71   : > { %p10966_p0 = scmp.ne.s32.totalorder %s440_s15, %s10965_s30  ;;  %p10974_p9 = scmp.lt.s32.totalorder %s10965_s30, %s10965_s30 }
  0x73   : > { %p10968_p2 = pnand %p10966_p0, %p11306_p8  ;;  %p10975_p4 = por %p10974_p9, %p10973_p7 }
  0x75   : > { %p10969_p5 = pneg %p10968_p2 }
  0x77   : > { %p10976_p10 = pnand %p10975_p4, %p10969_p5 }
  0x79   : > { %10979 = shalt.err (!%p10976_p10)
}
  0x7a   : > { %s11160_s8 = smov 512   ;;  %s11161_s6 = smov 32  }
  0x7b   : > { %9930 = dma.hbm_to_vmem [thread:$0]  (!%p11290_p6), %s12213_s7, 32768, %s440_s15, [#allocation9], %s11160_s8, %s11160_s8, %s11161_s6  }
  0x7c   : > { %s11162_s11 = smov [#allocation13]   ;;  %s10980_s22 = scalar_lea.hbm %s12219_s13, 2048 }
  0x7d   : > { %s477_s12 = sshll.u32 %s11162_s11, 4  ;;  %p10981_p11 = scmp.ne.s32.totalorder %s12219_s13, %s10980_s22  ;;  %s478_s12 = int_to_ptr.vmem [resolvable:$true] %s477_s12 }
  0x7e   : > { %p10987_p12 = scmp.lt.u32.totalorder %s10980_s22, %s12219_s13 }
  0x7f   : > { %p10983_p1 = pnand %p10981_p11, %p11306_p8 }
  0x81   : > { %p10984_p3 = pneg %p10983_p1 }
  0x83   : > { %p10989_p13 = pnand %p10987_p12, %p10984_p3 }
  0x85   : > { %10992 = shalt.err (!%p10989_p13)
}
  0x86   : > { %s10993_s15 = scalar_lea.vmem %s478_s12, 2048  ;;  %p11001_p7 = scmp.lt.s32.totalorder %s478_s12, %s478_s12 }
  0x87   : > { %p10994_p0 = scmp.ne.s32.totalorder %s478_s12, %s10993_s15  ;;  %p11002_p9 = scmp.lt.s32.totalorder %s10993_s15, %s10993_s15 }
  0x89   : > { %p10996_p2 = pnand %p10994_p0, %p11306_p8  ;;  %p11003_p4 = por %p11002_p9, %p11001_p7 }
  0x8b   : > { %p10997_p5 = pneg %p10996_p2 }
  0x8d   : > { %p11004_p10 = pnand %p11003_p4, %p10997_p5 }
  0x8f   : > { %11007 = shalt.err (!%p11004_p10)
}
  0x90   : > { %s11163_s8 = smov 64   ;;  %s11164_s26 = smov 4  }
  0x91   : > { %9936 = dma.hbm_to_vmem [thread:$0]  (!%p11290_p6), %s12219_s13, 2048, %s478_s12, [#allocation12], %s11163_s8, %s11163_s8, %s11164_s26  }
  0x92   : > { %s8771_s10 = sadd.s32 4294967294, %s11150_s21   ;;  %s11407_s11 = sadd.s32 1, %s11150_s21  }
  0x93   : > { %s43_s16 = sadd.s32 1, %s11146_s20  ;;  %s40_s17 = ssub.s32 %s11150_s21, %s11407_s11 }
  0x94   : > { %p50_p8 = scmp.ne.s32.totalorder %s11146_s20, %s11142_s19  ;;  %p41_p11 = scmp.eq.s32.totalorder %s40_s17, 0 }
  0x95   : > { %p51_p1 = scmp.eq.s32.totalorder %s11150_s21, 0  ;;  %p56_p3 = scmp.ne.s32.totalorder %s11142_s19, %s11138_s18 }
  0x96   : > { %p379_p12 = scmp.eq.s32.totalorder %s11274_s24, 1  ;;  %p12248_p0 = scmp.eq.s32.totalorder %s11274_s24, 0 }
  0x97   : > { %s11419_s28 = scalar_select %p41_p11, %s11146_s20, %s43_s16  }
  0x98   : > { %p52_p13 = por %p51_p1, %p50_p8  ;;  %p11423_p2 = por %p12248_p0, %p56_p3 }
  0x99   : > { %p11427_p6 = por %p379_p12, %p50_p8  ;;  %p385_p5 = scmp.eq.s32.totalorder %s8771_s10, 1 }
  0x9a   : > { %s12249_s12 = scalar_select %p11423_p2, 1, 0 }
  0x9b   : > { %s12250_s22 = scalar_select %p11427_p6, 1, 0 }
  0x9c   : > { %p9953_p7 = scmp.lt.s32.totalorder %s11150_s21, 2  ;;  %s11433_s29 = sand.u32 1, %s11146_s20  }
  0x9d   : > { %p11435_p9 = por %p385_p5, %p56_p3  ;;  %s8779_s23 = sshll.u32 %s11433_s29, 4 }
  0x9e   : > { %s9616_s30 = sshll.u32 %s11150_s21, 8  ;;  %s12252_s0 = sld [smem:[#allocation21_spill]] }
  0x9f   : > { %s12251_s14 = scalar_select %p11435_p9, 1, 0 }
  0xa0   : > { %s498_s6 = scalar_lea.vmem [#allocation2], %s8779_s23  ;;  %p11446_p4 = pnand %p9953_p7, %p52_p13 }
  0xa1   : > { %s506_s27 = sshll.u32 %s498_s6, 4  ;;  %s495_s17 = scalar_lea.sflag [#allocation3], %s11433_s29  ;;  %s11450_s27 = int_to_ptr.vmem [resolvable:$true] %s506_s27 }
  0xa2   : > { %p11010_p8 = pneg %p11446_p4 }
  0xa4   : > { %s11444_s26 = scalar_lea.hbm %s12252_s0, %s9616_s30  ;;  %s11013_s15 = scalar_lea.hbm %s12252_s0, 512 }
  0xa5   : > { %s11008_s2 = scalar_lea.hbm %s11444_s26, 256  ;;  %p11014_p3 = scmp.lt.u32.totalorder %s11444_s26, %s12252_s0 }
  0xa6   : > { %p11009_p10 = scmp.ne.s32.totalorder %s11444_s26, %s11008_s2  ;;  %p11015_p12 = scmp.lt.u32.totalorder %s11013_s15, %s11008_s2 }
  0xa7   : > { %p11017_p0 = scmp.lt.u32.totalorder %s11008_s2, %s11444_s26 }
  0xa8   : > { %p11011_p11 = pnand %p11010_p8, %p11009_p10  ;;  %p11016_p13 = por %p11015_p12, %p11014_p3 }
  0xaa   : > { %p11012_p1 = pneg %p11011_p11  ;;  %p11018_p5 = por %p11017_p0, %p11016_p13 }
  0xac   : > { %p11019_p7 = pnand %p11018_p5, %p11012_p1 }
  0xae   : > { %11022 = shalt.err (!%p11019_p7)
}
  0xaf   : > { %s11023_s16 = scalar_lea.vmem %s11450_s27, 256  ;;  %s11165_s23 = smov [#allocation2]  }
  0xb0   : > { %p11024_p10 = scmp.ne.s32.totalorder %s11450_s27, %s11023_s16  ;;  %s11028_s30 = sshll.u32 %s11165_s23, 4  ;;  %s11029_s30 = int_to_ptr.vmem [resolvable:$false] %s11028_s30 }
  0xb1   : > { %s11030_s8 = scalar_lea.vmem %s11029_s30, 512  ;;  %p11031_p6 = scmp.lt.s32.totalorder %s11450_s27, %s11029_s30 }
  0xb2   : > { %p11026_p11 = pnand %p11024_p10, %p11010_p8  ;;  %p11032_p3 = scmp.lt.s32.totalorder %s11030_s8, %s11023_s16 }
  0xb4   : > { %p11027_p9 = pneg %p11026_p11  ;;  %p11033_p12 = por %p11032_p3, %p11031_p6 }
  0xb6   : > { %p11034_p13 = pnand %p11033_p12, %p11027_p9 }
  0xb8   : > { %11037 = shalt.err (!%p11034_p13)
}
  0xb9   : > { %9940 = dma.hbm_to_vmem [thread:$0]  (!%p11446_p4), %s11444_s26, 256, %s11450_s27, %s495_s17  }
  0xba   : > { %s8782_s2 = sshll.u32 %s11150_s21, 4  ;;  %s516_s16 = scalar_lea.vmem [#allocation5], %s11433_s29 }
  0xbb   : > { %s11483_s23 = scalar_lea.hbm %s12207_s1, %s8782_s2  ;;  %s523_s30 = sshll.u32 %s516_s16, 4  ;;  %s524_s30 = int_to_ptr.vmem [resolvable:$true] %s523_s30 }
  0xbc   : > { %s12254_s8 = sand.u32 1, %s11150_s21   ;;  %s11038_s3 = scalar_lea.hbm %s11483_s23, 16 }
  0xbd   : > { %s514_s0 = scalar_lea.sflag [#allocation6], %s12254_s8  ;;  %p11039_p6 = scmp.ne.s32.totalorder %s11483_s23, %s11038_s3 }
  0xbe   : > { %s11043_s17 = scalar_lea.hbm %s12207_s1, 32  ;;  %p11044_p0 = scmp.lt.u32.totalorder %s11483_s23, %s12207_s1 }
  0xbf   : > { %p11041_p9 = pnand %p11039_p6, %p11010_p8  ;;  %p11045_p5 = scmp.lt.u32.totalorder %s11043_s17, %s11038_s3 }
  0xc0   : > { %p11047_p10 = scmp.lt.u32.totalorder %s11038_s3, %s11483_s23 }
  0xc1   : > { %p11042_p1 = pneg %p11041_p9  ;;  %p11046_p7 = por %p11045_p5, %p11044_p0 }
  0xc3   : > { %p11048_p11 = por %p11047_p10, %p11046_p7 }
  0xc5   : > { %p11049_p3 = pnand %p11048_p11, %p11042_p1 }
  0xc7   : > { %11052 = shalt.err (!%p11049_p3)
}
  0xc8   : > { %s11053_s29 = scalar_lea.vmem %s524_s30, 16  ;;  %s11166_s6 = smov [#allocation5]  }
  0xc9   : > { %p11054_p12 = scmp.ne.s32.totalorder %s524_s30, %s11053_s29  ;;  %s11058_s16 = sshll.u32 %s11166_s6, 4  ;;  %s11059_s16 = int_to_ptr.vmem [resolvable:$false] %s11058_s16 }
  0xca   : > { %s11060_s8 = scalar_lea.vmem %s11059_s16, 32  ;;  %p11061_p9 = scmp.lt.s32.totalorder %s524_s30, %s11059_s16 }
  0xcb   : > { %p11056_p13 = pnand %p11054_p12, %p11010_p8  ;;  %p11062_p2 = scmp.lt.s32.totalorder %s11060_s8, %s11053_s29 }
  0xcd   : > { %p11057_p6 = pneg %p11056_p13  ;;  %p11063_p0 = por %p11062_p2, %p11061_p9 }
  0xcf   : > { %p11064_p5 = pnand %p11063_p0, %p11057_p6 }
  0xd1   : > { %11067 = shalt.err (!%p11064_p5)
}
  0xd2   : > { %9943 = dma.hbm_to_vmem [thread:$0]  (!%p11446_p4), %s11483_s23, 16, %s524_s30, %s514_s0  }
  0xd3   : > { %p12255_p1 = scmp.ne.s32.totalorder %s12243_s25, 0 }
  0xd4   : > { %s11510_s3 = sand.u32 (!%p12255_p1), 1, %s11142_s19   ;;  %p12256_p2 = scmp.ne.s32.totalorder (!%p12255_p1), %s12249_s12, 0 }
  0xd5   : > { %532 = sbr.rel (%p12255_p1) target bundleno = 5776 (0x1690), region = 80  ;;  %s8784_s26 = sshll.u32 (!%p12255_p1), %s11510_s3, 4 }
  0xd6   : > { %s535_s27 = scalar_lea.sflag (!%p12255_p1), [#allocation3], %s11510_s3  ;;  %s11514_s17 = scalar_lea.vmem (!%p12255_p1), [#allocation2], %s8784_s26 }
  0xdc   : > { %11113 = dma.done.wait (%p12256_p2), %s535_s27, 256  }
  0xdd   : > { %11115 = vsyncadd (%p12256_p2), %s535_s27, 4294967040  ;;  %s543_s0 = sand.u32 1, %s11274_s24   ;;  %s546_s10 = scalar_lea.vmem [#allocation5], %s11510_s3 }
  0xde   : > { %s544_s25 = scalar_lea.sflag [#allocation6], %s543_s0 }
  0xdf   : > { %11117 = dma.done.wait (%p12256_p2), %s544_s25, 16  }
  0xe0   : > { %11119 = vsyncadd (%p12256_p2), %s544_s25, 4294967280  ;;  %p12257_p4 = scmp.eq.s32.totalorder %s11274_s24, 0 }
  0xe2   : > { %11121 = dma.done.wait (%p12257_p4), [#allocation6], 24576   ;;  %p12258_p8 = pmov %p12257_p4 }
  0xe3   : > { %p12259_p7 = pmov %p12257_p4 }
  0xe4   : > { %11123 = vsyncadd (%p12258_p8), [#allocation6], 4294942720 }
  0xe5   : > { %11125 = dma.done.wait (%p12259_p7), [#allocation9], 40960   ;;  %p12260_p10 = pmov %p12257_p4 }
  0xe6   : > { %p12261_p11 = pmov %p12257_p4 }
  0xe7   : > { %11127 = vsyncadd (%p12260_p10), [#allocation9], 4294926336 }
  0xe8   : > { %11129 = dma.done.wait (%p12261_p11), [#allocation12], 34816   ;;  %p12262_p3 = pmov %p12257_p4 }
  0xe9   : > { %v10010_v0 = vld [vmem:[#allocation7 + $0xc] ss:$24 sps:$4 sm:$0xff]   ;;  %v10012_v1 = vld [vmem:[#allocation7 + $0x8] ss:$24 sps:$4 sm:$0xff]   ;;  %v10015_v3 = vld [vmem:[#allocation7 + $0x3c] ss:$24 sps:$4 sm:$0xff]  }
  0xea   : > { %11131 = vsyncadd (%p12262_p3), [#allocation12], 4294932480  ;;  %1536 = vmatprep.subr.bf16.mxu1 %v10010_v0  ;;  %v10013_v2 = vld [vmem:[#allocation7 + $0x4] ss:$24 sps:$4 sm:$0xff]   ;;  %v10017_v4 = vld [vmem:[#allocation7] ss:$24 sps:$4 sm:$0xff]  }
  0xeb   : > { %1537 = vmatpush1.bf16.msra.mxu1 %v10012_v1  ;;  %v10018_v5 = vld [vmem:[#allocation7 + $0x38] ss:$24 sps:$4 sm:$0xff]   ;;  %1495 = vmatprep.subr.bf16.mxu0 %v10013_v2  ;;  %v10019_v6 = vld [vmem:[#allocation7 + $0x34] ss:$24 sps:$4 sm:$0xff]   ;;  %v10024_v9 = vld [vmem:[#allocation7 + $0x68] ss:$24 sps:$4 sm:$0xff]  }
  0xec   : > { %1538 = vmatprep.subr.bf16.mxu1 %v10015_v3  ;;  %1496 = vmatpush1.bf16.msra.mxu0 %v10017_v4  ;;  %v10021_v7 = vld [vmem:[#allocation7 + $0x6c] ss:$24 sps:$4 sm:$0xff]   ;;  %v10023_v8 = vld [vmem:[#allocation7 + $0x30] ss:$24 sps:$4 sm:$0xff]   ;;  %v10027_v11 = vld [vmem:[#allocation7 + $0x9c] ss:$24 sps:$4 sm:$0xff]  }
  0xed   : > { %1497 = vmatprep.subr.bf16.mxu0 %v10019_v6  ;;  %v10025_v10 = vld [vmem:[#allocation7 + $0x64] ss:$24 sps:$4 sm:$0xff]   ;;  %v10029_v12 = vld [vmem:[#allocation7 + $0x60] ss:$24 sps:$4 sm:$0xff]   ;;  %v10031_v13 = vld [vmem:[#allocation7 + $0x94] ss:$24 sps:$4 sm:$0xff]  }
  0xee   : > { %v10030_v14 = vld [vmem:[#allocation7 + $0x98] ss:$24 sps:$4 sm:$0xff]   ;;  %v10033_v15 = vld [vmem:[#allocation7 + $0xcc] ss:$24 sps:$4 sm:$0xff]   ;;  %v10036_v18 = vld [vmem:[#allocation7 + $0xc8] ss:$24 sps:$4 sm:$0xff]  }
  0xef   : > { %1539 = vmatpush1.bf16.msra.mxu1 %v10018_v5  ;;  %v10035_v16 = vld [vmem:[#allocation7 + $0x90] ss:$24 sps:$4 sm:$0xff]   ;;  %v10037_v17 = vld [vmem:[#allocation7 + $0xc4] ss:$24 sps:$4 sm:$0xff]   ;;  %v10041_v20 = vld [vmem:[#allocation7 + $0xc0] ss:$24 sps:$4 sm:$0xff]  }
  0xf0   : > { %1540 = vmatprep.subr.bf16.mxu1 %v10021_v7  ;;  %1498 = vmatpush1.bf16.msra.mxu0 %v10023_v8  ;;  %v10039_v19 = vld [vmem:[#allocation7 + $0xfc] ss:$24 sps:$4 sm:$0xff]   ;;  %v10042_v22 = vld [vmem:[#allocation7 + $0xf8] ss:$24 sps:$4 sm:$0xff]   ;;  %v10045_v23 = vld [vmem:[#allocation7 + $0x12c] ss:$24 sps:$4 sm:$0xff]  }
  0xf1   : > { %1499 = vmatprep.subr.bf16.mxu0 %v10025_v10  ;;  %v10043_v21 = vld [vmem:[#allocation7 + $0xf4] ss:$24 sps:$4 sm:$0xff]   ;;  %v10047_v24 = vld [vmem:[#allocation7 + $0xf0] ss:$24 sps:$4 sm:$0xff]   ;;  %v10049_v25 = vld [vmem:[#allocation7 + $0x124] ss:$24 sps:$4 sm:$0xff]  }
  0xf2   : > { %v10048_v26 = vld [vmem:[#allocation7 + $0x128] ss:$24 sps:$4 sm:$0xff]   ;;  %v10051_v27 = vld [vmem:[#allocation7 + $0x15c] ss:$24 sps:$4 sm:$0xff]   ;;  %v10054_v30 = vld [vmem:[#allocation7 + $0x158] ss:$24 sps:$4 sm:$0xff]  }
  0xf3   : > { %1541 = vmatpush1.bf16.msra.mxu1 %v10024_v9  ;;  %v10053_v28 = vld [vmem:[#allocation7 + $0x120] ss:$24 sps:$4 sm:$0xff]   ;;  %v10055_v29 = vld [vmem:[#allocation7 + $0x154] ss:$24 sps:$4 sm:$0xff]   ;;  %v10059_v32 = vld [vmem:[#allocation7 + $0x150] ss:$24 sps:$4 sm:$0xff]  }
  0xf4   : > { %1542 = vmatprep.subr.bf16.mxu1 %v10027_v11  ;;  %1500 = vmatpush1.bf16.msra.mxu0 %v10029_v12  ;;  %v10057_v31 = vld [vmem:[#allocation7 + $0x18c] ss:$24 sps:$4 sm:$0xff]   ;;  %v10060_v34 = vld [vmem:[#allocation7 + $0x188] ss:$24 sps:$4 sm:$0xff]   ;;  %v10063_v35 = vld [vmem:[#allocation7 + $0x1bc] ss:$24 sps:$4 sm:$0xff]  }
  0xf5   : > { %1501 = vmatprep.subr.bf16.mxu0 %v10031_v13  ;;  %v10061_v33 = vld [vmem:[#allocation7 + $0x184] ss:$24 sps:$4 sm:$0xff]   ;;  %v10065_v36 = vld [vmem:[#allocation7 + $0x180] ss:$24 sps:$4 sm:$0xff]   ;;  %v10067_v37 = vld [vmem:[#allocation7 + $0x1b4] ss:$24 sps:$4 sm:$0xff]  }
  0xf6   : > { %v10066_v38 = vld [vmem:[#allocation7 + $0x1b8] ss:$24 sps:$4 sm:$0xff]   ;;  %v10069_v39 = vld [vmem:[#allocation7 + $0x1ec] ss:$24 sps:$4 sm:$0xff]   ;;  %v10072_v42 = vld [vmem:[#allocation7 + $0x1e8] ss:$24 sps:$4 sm:$0xff]  }
  0xf7   : > { %1543 = vmatpush1.bf16.msra.mxu1 %v10030_v14  ;;  %v10071_v40 = vld [vmem:[#allocation7 + $0x1b0] ss:$24 sps:$4 sm:$0xff]   ;;  %v10073_v41 = vld [vmem:[#allocation7 + $0x1e4] ss:$24 sps:$4 sm:$0xff]   ;;  %v10077_v44 = vld [vmem:[#allocation7 + $0x1e0] ss:$24 sps:$4 sm:$0xff]  }
  0xf8   : > { %1544 = vmatprep.subr.bf16.mxu1 %v10033_v15  ;;  %1502 = vmatpush1.bf16.msra.mxu0 %v10035_v16  ;;  %v10075_v43 = vld [vmem:[#allocation7 + $0x21c] ss:$24 sps:$4 sm:$0xff]   ;;  %v10078_v45 = vld [vmem:[#allocation7 + $0x218] ss:$24 sps:$4 sm:$0xff]   ;;  %v10081_v48 = vld [vmem:[#allocation7 + $0x24c] ss:$24 sps:$4 sm:$0xff]  }
  0xf9   : > { %1503 = vmatprep.subr.bf16.mxu0 %v10037_v17  ;;  %v621_v46 = vld [vmem:[%s11514_s17 + $0x8] sm:$0xff]  ;;  %v620_v1 = vld [vmem:[%s11514_s17] sm:$0xff]  ;;  %v11167_v4 = vmov 0.0   ;;  %vm11168_vm0 = vmmov 0   ;;  %vm1672_vm1 = vcmask 261120   ;;  %s11169_s12 = smov 64  }
  0xfa   : > { %v10079_v47 = vld [vmem:[#allocation7 + $0x214] ss:$24 sps:$4 sm:$0xff]   ;;  %v1014_v49 = vpack.c.bf16 %v621_v46, %v621_v46  ;;  %v10083_v50 = vld [vmem:[#allocation7 + $0x210] ss:$24 sps:$4 sm:$0xff]   ;;  %v10085_v51 = vld [vmem:[#allocation7 + $0x244] ss:$24 sps:$4 sm:$0xff]   ;;  %v11540_v3 = vpack.c.bf16 %v620_v1, %v620_v1 }
  0xfb   : > { %1545 = vmatpush1.bf16.msra.mxu1 %v10036_v18  ;;  %v10084_v52 = vld [vmem:[#allocation7 + $0x248] ss:$24 sps:$4 sm:$0xff]   ;;  %v10087_v53 = vld [vmem:[#allocation7 + $0x27c] ss:$24 sps:$4 sm:$0xff]   ;;  %v10090_v56 = vld [vmem:[#allocation7 + $0x278] ss:$24 sps:$4 sm:$0xff]  }
  0xfc   : > { %1546 = vmatprep.subr.bf16.mxu1 %v10039_v19  ;;  %1504 = vmatpush1.bf16.msra.mxu0 %v10041_v20  ;;  %v10089_v54 = vld [vmem:[#allocation7 + $0x240] ss:$24 sps:$4 sm:$0xff]   ;;  %v10091_v55 = vld [vmem:[#allocation7 + $0x274] ss:$24 sps:$4 sm:$0xff]   ;;  %v10095_v58 = vld [vmem:[#allocation7 + $0x270] ss:$24 sps:$4 sm:$0xff]  }
  0xfd   : > { %1505 = vmatprep.subr.bf16.mxu0 %v10043_v21  ;;  %1568 = vmatprep.mubr.bf16.mxu1 %v1014_v49  ;;  %v10093_v57 = vld [vmem:[#allocation7 + $0x2ac] ss:$24 sps:$4 sm:$0xff]   ;;  %v10096_v60 = vld [vmem:[#allocation7 + $0x2a8] ss:$24 sps:$4 sm:$0xff]   ;;  %v10099_v61 = vld [vmem:[#allocation7 + $0x2dc] ss:$24 sps:$4 sm:$0xff]  }
  0xfe   : > { %1527 = vmatprep.mubr.bf16.mxu0 %v1014_v49  ;;  %v10097_v59 = vld [vmem:[#allocation7 + $0x2a4] ss:$24 sps:$4 sm:$0xff]   ;;  %v10101_v62 = vld [vmem:[#allocation7 + $0x2a0] ss:$24 sps:$4 sm:$0xff]   ;;  %v10103_v63 = vld [vmem:[#allocation7 + $0x2d4] ss:$24 sps:$4 sm:$0xff]  }
  0xff   : > { %1547 = vmatpush1.bf16.msra.mxu1 %v10042_v22  ;;  %v10102_v0 = vld [vmem:[#allocation7 + $0x2d8] ss:$24 sps:$4 sm:$0xff]   ;;  %s11170_s23 = smov 96   ;;  %s11171_s30 = smov 32   ;;  %v10108_v19 = vld [vmem:[#allocation7 + $0x14] ss:$24 sps:$4 sm:$0xff]  }
 0x100   : > { %1548 = vmatprep.subr.bf16.mxu1 %v10045_v23  ;;  %1506 = vmatpush1.bf16.msra.mxu0 %v10047_v24  ;;  %v10105_v2 = vld [vmem:[#allocation7 + $0x2d0] ss:$24 sps:$4 sm:$0xff]   ;;  %v10111_v20 = vld [vmem:[#allocation7 + $0x44] ss:$24 sps:$4 sm:$0xff]   ;;  %v10109_v21 = vld [vmem:[#allocation7 + $0x40] ss:$24 sps:$4 sm:$0xff]  }
 0x101   : > { %1507 = vmatprep.subr.bf16.mxu0 %v10049_v25  ;;  %v10106_v18 = vld [vmem:[#allocation7 + $0x10] ss:$24 sps:$4 sm:$0xff]   ;;  %v10114_v22 = vld [vmem:[#allocation7 + $0x74] ss:$24 sps:$4 sm:$0xff]   ;;  %v10117_v24 = vld [vmem:[#allocation7 + $0xa4] ss:$24 sps:$4 sm:$0xff]  }
 0x102   : > { %v10112_v23 = vld [vmem:[#allocation7 + $0x70] ss:$24 sps:$4 sm:$0xff]   ;;  %v10115_v25 = vld [vmem:[#allocation7 + $0xa0] ss:$24 sps:$4 sm:$0xff]   ;;  %vm2049_vm3 = vcmask 64512   ;;  %vm2149_vm4 = vcmask 1043456  }
 0x103   : > { %1549 = vmatpush1.bf16.msra.mxu1 %v10048_v26  ;;  %v10120_v26 = vld [vmem:[#allocation7 + $0xd4] ss:$24 sps:$4 sm:$0xff]   ;;  %v10145_v46 = vld [vmem:[#allocation7 + $0x280] ss:$24 sps:$4 sm:$0xff]   ;;  %vm2544_vm5 = vcmask 523264   ;;  %vm2547_vm6 = vcmask 785408  }
 0x104   : > { %1550 = vmatprep.subr.bf16.mxu1 %v10051_v27  ;;  %1508 = vmatpush1.bf16.msra.mxu0 %v10053_v28  ;;  %v10118_v27 = vld [vmem:[#allocation7 + $0xd0] ss:$24 sps:$4 sm:$0xff]   ;;  %v10123_v28 = vld [vmem:[#allocation7 + $0x104] ss:$24 sps:$4 sm:$0xff]   ;;  %s12263_s26 = sld [smem:[#allocation24_spill]]  ;;  %s12264_s0 = sld [smem:[#allocation25_spill]] }
 0x105   : > { %1509 = vmatprep.subr.bf16.mxu0 %v10055_v29  ;;  %v10121_v29 = vld [vmem:[#allocation7 + $0x100] ss:$24 sps:$4 sm:$0xff]   ;;  %s12265_s2 = sld [smem:[#allocation26_spill]]  ;;  %s12266_s6 = sld [smem:[#allocation27_spill]] }
 0x106   : > { %s12267_s27 = sld [smem:[#allocation28_spill]]  ;;  %s12268_s15 = sld [smem:[#allocation29_spill]] }
 0x107   : > { %1551 = vmatpush1.bf16.msra.mxu1 %v10054_v30  ;;  %v10126_v30 = vld [vmem:[#allocation7 + $0x134] ss:$24 sps:$4 sm:$0xff]   ;;  %s9613_s29 = sshll.u32 %s11274_s24, 4  ;;  %s615_s16 = scalar_lea.vmem [#allocation14], %s11510_s3 }
 0x108   : > { %1552 = vmatprep.subr.bf16.mxu1 %v10057_v31  ;;  %1510 = vmatpush1.bf16.msra.mxu0 %v10059_v32  ;;  %v10124_v31 = vld [vmem:[#allocation7 + $0x130] ss:$24 sps:$4 sm:$0xff]   ;;  %v10129_v32 = vld [vmem:[#allocation7 + $0x164] ss:$24 sps:$4 sm:$0xff]   ;;  %s8638_s8 = sshll.u32 %s615_s16, 4  ;;  %s8626_s25 = scalar_lea.sflag [#allocation4], %s11510_s3  ;;  %s12164_s8 = int_to_ptr.vmem [resolvable:$true] %s8638_s8 }
 0x109   : > { %1511 = vmatprep.subr.bf16.mxu0 %v10061_v33  ;;  %v10127_v33 = vld [vmem:[#allocation7 + $0x160] ss:$24 sps:$4 sm:$0xff]   ;;  %p12270_p13 = scmp.ne.s32.totalorder %s12250_s22, 0  ;;  %s11172_s24 = smov [#allocation14]  }
 0x10b   : > { %1553 = vmatpush1.bf16.msra.mxu1 %v10060_v34  ;;  %v10130_v34 = vld [vmem:[#allocation7 + $0x190] ss:$24 sps:$4 sm:$0xff]  }
 0x10c   : > { %1554 = vmatprep.subr.bf16.mxu1 %v10063_v35  ;;  %1512 = vmatpush1.bf16.msra.mxu0 %v10065_v36  ;;  %v10132_v35 = vld [vmem:[#allocation7 + $0x194] ss:$24 sps:$4 sm:$0xff]   ;;  %v10133_v36 = vld [vmem:[#allocation7 + $0x1c0] ss:$24 sps:$4 sm:$0xff]  }
 0x10d   : > { %1513 = vmatprep.subr.bf16.mxu0 %v10067_v37  ;;  %v10135_v37 = vld [vmem:[#allocation7 + $0x1c4] ss:$24 sps:$4 sm:$0xff]  }
 0x10f   : > { %1555 = vmatpush1.bf16.msra.mxu1 %v10066_v38  ;;  %v10138_v38 = vld [vmem:[#allocation7 + $0x1f4] ss:$24 sps:$4 sm:$0xff]  }
 0x110   : > { %1556 = vmatprep.subr.bf16.mxu1 %v10069_v39  ;;  %1514 = vmatpush1.bf16.msra.mxu0 %v10071_v40  ;;  %v10136_v39 = vld [vmem:[#allocation7 + $0x1f0] ss:$24 sps:$4 sm:$0xff]   ;;  %v10141_v40 = vld [vmem:[#allocation7 + $0x224] ss:$24 sps:$4 sm:$0xff]  }
 0x111   : > { %1515 = vmatprep.subr.bf16.mxu0 %v10073_v41  ;;  %v10139_v41 = vld [vmem:[#allocation7 + $0x220] ss:$24 sps:$4 sm:$0xff]  }
 0x113   : > { %1557 = vmatpush1.bf16.msra.mxu1 %v10072_v42  ;;  %v10144_v42 = vld [vmem:[#allocation7 + $0x254] ss:$24 sps:$4 sm:$0xff]  }
 0x114   : > { %1558 = vmatprep.subr.bf16.mxu1 %v10075_v43  ;;  %1516 = vmatpush1.bf16.msra.mxu0 %v10077_v44  ;;  %v10142_v43 = vld [vmem:[#allocation7 + $0x250] ss:$24 sps:$4 sm:$0xff]   ;;  %v10147_v44 = vld [vmem:[#allocation7 + $0x284] ss:$24 sps:$4 sm:$0xff]  }
 0x115   : > { %1517 = vmatprep.subr.bf16.mxu0 %v10079_v47 }
 0x117   : > { %1559 = vmatpush1.bf16.msra.mxu1 %v10078_v45 }
 0x118   : > { %1560 = vmatprep.subr.bf16.mxu1 %v10081_v48  ;;  %1518 = vmatpush1.bf16.msra.mxu0 %v10083_v50  ;;  %v10150_v48 = vld [vmem:[#allocation7 + $0x2b4] ss:$24 sps:$4 sm:$0xff]   ;;  %v10153_v50 = vld [vmem:[#allocation7 + $0x2e4] ss:$24 sps:$4 sm:$0xff]  }
 0x119   : > { %1519 = vmatprep.subr.bf16.mxu0 %v10085_v51 }
 0x11b   : > { %1561 = vmatpush1.bf16.msra.mxu1 %v10084_v52 }
 0x11c   : > { %1562 = vmatprep.subr.bf16.mxu1 %v10087_v53  ;;  %1520 = vmatpush1.bf16.msra.mxu0 %v10089_v54  ;;  %v10151_v53 = vld [vmem:[#allocation7 + $0x2e0] ss:$24 sps:$4 sm:$0xff]  }
 0x11d   : > { %1521 = vmatprep.subr.bf16.mxu0 %v10091_v55 }
 0x11f   : > { %1563 = vmatpush1.bf16.msra.mxu1 %v10090_v56 }
 0x120   : > { %1564 = vmatprep.subr.bf16.mxu1 %v10093_v57  ;;  %1522 = vmatpush1.bf16.msra.mxu0 %v10095_v58 }
 0x121   : > { %1523 = vmatprep.subr.bf16.mxu0 %v10097_v59 }
 0x123   : > { %1565 = vmatpush1.bf16.msra.mxu1 %v10096_v60 }
 0x124   : > { %1566 = vmatprep.subr.bf16.mxu1 %v10099_v61  ;;  %1524 = vmatpush1.bf16.msra.mxu0 %v10101_v62 }
 0x125   : > { %1525 = vmatprep.subr.bf16.mxu0 %v10103_v63 }
 0x127   : > { %1567 = vmatpush1.bf16.msra.mxu1 %v10102_v0 }
 0x128   : > { %1526 = vmatpush1.bf16.msra.mxu0 %v10105_v2  ;;  %9703 = vmatprep.subr.bf16.mxu1 %v11167_v4 }
 0x129   : > { %1577 = vmatprep.subr.bf16.mxu0 %v10108_v19 }
 0x12a   : > { %1569 = vmatmul.mubr.bf16.vlgmr.msra.gmra.mrb[0].mxu1 %v11540_v3 }
 0x12b   : > { %1528 = vmatmul.mubr.bf16.vlgmr.msra.gmra.mrb[0].mxu0 %v11540_v3  ;;  %9705 = vmatprep.mubr.msk.bf16.mxu1 %vm11168_vm0, %v11167_v4 }
 0x12c   : > { %1609 = vmatprep.mubr.bf16.mxu0 %v1014_v49  ;;  %1578 = vmatpush1.bf16.msra.mxu0 %v10106_v18  ;;  %v10148_v49 = vld [vmem:[#allocation7 + $0x2b0] ss:$24 sps:$4 sm:$0xff]  }
 0x12d   : > { %1579 = vmatprep.subr.bf16.mxu0 %v10111_v20 }
 0x130   : > { %1580 = vmatpush1.bf16.msra.mxu0 %v10109_v21 }
 0x131   : > { %1581 = vmatprep.subr.bf16.mxu0 %v10114_v22 }
 0x134   : > { %1582 = vmatpush1.bf16.msra.mxu0 %v10112_v23 }
 0x135   : > { %1583 = vmatprep.subr.bf16.mxu0 %v10117_v24 }
 0x138   : > { %1584 = vmatpush1.bf16.msra.mxu0 %v10115_v25 }
 0x139   : > { %1585 = vmatprep.subr.bf16.mxu0 %v10120_v26 }
 0x13c   : > { %1586 = vmatpush1.bf16.msra.mxu0 %v10118_v27 }
 0x13d   : > { %1587 = vmatprep.subr.bf16.mxu0 %v10123_v28 }
 0x140   : > { %1588 = vmatpush1.bf16.msra.mxu0 %v10121_v29 }
 0x141   : > { %1589 = vmatprep.subr.bf16.mxu0 %v10126_v30 }
 0x144   : > { %1590 = vmatpush1.bf16.msra.mxu0 %v10124_v31 }
 0x145   : > { %1591 = vmatprep.subr.bf16.mxu0 %v10129_v32 }
 0x148   : > { %1592 = vmatpush1.bf16.msra.mxu0 %v10127_v33 }
 0x149   : > { %1593 = vmatprep.subr.bf16.mxu0 %v10132_v35 }
 0x14c   : > { %1594 = vmatpush1.bf16.msra.mxu0 %v10130_v34 }
 0x14d   : > { %1595 = vmatprep.subr.bf16.mxu0 %v10135_v37 }
 0x150   : > { %1596 = vmatpush1.bf16.msra.mxu0 %v10133_v36 }
 0x151   : > { %1597 = vmatprep.subr.bf16.mxu0 %v10138_v38 }
 0x154   : > { %1598 = vmatpush1.bf16.msra.mxu0 %v10136_v39 }
 0x155   : > { %1599 = vmatprep.subr.bf16.mxu0 %v10141_v40 }
 0x158   : > { %1600 = vmatpush1.bf16.msra.mxu0 %v10139_v41 }
 0x159   : > { %1601 = vmatprep.subr.bf16.mxu0 %v10144_v42 }
 0x15c   : > { %1602 = vmatpush1.bf16.msra.mxu0 %v10142_v43 }
 0x15d   : > { %1603 = vmatprep.subr.bf16.mxu0 %v10147_v44 }
 0x160   : > { %1604 = vmatpush1.bf16.msra.mxu0 %v10145_v46 }
 0x161   : > { %1605 = vmatprep.subr.bf16.mxu0 %v10150_v48 }
 0x164   : > { %1606 = vmatpush1.bf16.msra.mxu0 %v10148_v49 }
 0x165   : > { %1607 = vmatprep.subr.bf16.mxu0 %v10153_v50 }
 0x168   : > { %1608 = vmatpush1.bf16.msra.mxu0 %v10151_v53 }
 0x169   : > { %9775 = vmatprep.subr.bf16.mxu0 %v11167_v4 }
 0x16b   : > { %1610 = vmatmul.mubr.bf16.vlgmr.msra.gmra.mrb[4].mxu0 %v11540_v3 }
 0x16c   : > { %9777 = vmatprep.mubr.msk.bf16.mxu0 %vm11168_vm0, %v11167_v4 }
 0x1fd   : > { %v1570_v5 = vpop.f32.mrb[0].mxu1 }
 0x1fe   : > { %v1620_v6 = vpack.c.bf16 %v1570_v5, %v1570_v5  ;;  %v1572_v7 = vpop.f32.mrb[1].mxu1  ;;  %v1529_v9 = vpop.f32.mrb[0].mxu0 }
 0x1ff   : > { %v1574_v8 = vpop.f32.mrb[2].mxu1  ;;  %v1618_v11 = vpack.c.bf16 %v1529_v9, %v1529_v9  ;;  %v1531_v13 = vpop.f32.mrb[1].mxu0  ;;  %v11556_v16 = vpack.c.bf16 %v1572_v7, %v1572_v7  ;;  %v617_v7 = vld [vmem:[%s546_s10] sm:$0x1]  ;;  %s11068_s10 = scalar_lea.vmem %s12164_s8, 16 }
 0x200   : > { %1641 = vrot.lane.b32.xlu1 %v1620_v6, %s11169_s12  ;;  %1639 = vrot.lane.b32.xlu0 %v1620_v6, %s11170_s23  ;;  %v1575_v10 = vpop.f32.mrb[3].mxu1  ;;  %v1677_v12 = vsel %vm1672_vm1, %v1620_v6, 0  ;;  %v1533_v14 = vpop.f32.mrb[2].mxu0  ;;  %v11558_v17 = vpack.c.bf16 %v1531_v13, %v1531_v13  ;;  %vm618_vm2 = vcmp.eq.f32.partialorder %v617_v7, 0.0  ;;  %p11069_p12 = scmp.ne.s32.totalorder %s12164_s8, %s11068_s10 }
 0x201   : > { %9704 = vmatpush3.bf16.xpose.msra.mxu1 %v1677_v12  ;;  %v1534_v15 = vpop.f32.mrb[3].mxu0  ;;  %v1861_v59 = vsel %vm1672_vm1, %v11556_v16, 0  ;;  %v619_v10 = vsel %vm618_vm2, -1e+20, %v11167_v4 }
 0x202   : > { %9709 = vmatprep.subr.bf16.mxu1 %v11167_v4  ;;  %p11070_p6 = pnand %p11069_p12, %p12270_p13 }
 0x204   : > { %1627 = vrot.lane.b32.xlu1 %v1618_v11, %s11169_s12  ;;  %1625 = vrot.lane.b32.xlu0 %v1618_v11, %s11170_s23  ;;  %p11071_p9 = pneg %p11070_p6 }
 0x208   : > { %1629 = vrot.lane.b32.xlu1 %v1618_v11, %s11171_s30  ;;  %1643 = vrot.lane.b32.xlu0 %v1620_v6, %s11171_s30  ;;  %v1667_v6 = vlaneseq }
 0x209   : > { %9706 = vmatmul.mubr.msk.bf16.vlgmr.msra.gmra.mrb[4].mxu1 %vm1672_vm1, %v1618_v11 }
 0x20a   : > { %9711 = vmatprep.mubr.msk.bf16.mxu1 %vm11168_vm0, %v11167_v4  ;;  %v11617_v8 = vshrl.u32 %v1667_v6, 7 }
 0x20c   : > { %1646 = vrot.lane.b32.xlu0 %v11556_v16, %s11170_s23  ;;  %1632 = vrot.lane.b32.xlu1 %v11558_v17, %s11170_s23  ;;  %v11620_v9 = vsub.s32 0, %v11617_v8 }
 0x20e   : > { %v11624_v11 = vrot.slane %v619_v10, %v11620_v9 }
 0x210   : > { %1648 = vrot.lane.b32.xlu0 %v11556_v16, %s11169_s12  ;;  %1634 = vrot.lane.b32.xlu1 %v11558_v17, %s11169_s12 }
 0x214   : > { %1650 = vrot.lane.b32.xlu0 %v11556_v16, %s11171_s30  ;;  %1636 = vrot.lane.b32.xlu1 %v11558_v17, %s11171_s30 }
 0x23e   : > { %v1611_v26 = vpop.f32.mrb[4].mxu0 }
 0x272   : > { %v1640_v45 = vpop.permute.xlu0 %1639  ;;  %v1642_v51 = vpop.permute.xlu1 %1641 }
 0x273   : > { %v1723_v47 = vsel %vm1672_vm1, %v1640_v45, 0  ;;  %v1769_v54 = vsel %vm1672_vm1, %v1642_v51, 0 }
 0x274   : > { %9710 = vmatpush3.bf16.xpose.msra.mxu1 %v1723_v47 }
 0x275   : > { %9715 = vmatprep.subr.bf16.mxu1 %v11167_v4 }
 0x276   : > { %v1626_v52 = vpop.permute.xlu0 %1625  ;;  %v1628_v56 = vpop.permute.xlu1 %1627 }
 0x27a   : > { %v1644_v55 = vpop.permute.xlu0 %1643  ;;  %v1630_v58 = vpop.permute.xlu1 %1629 }
 0x27b   : > { %9712 = vmatmul.mubr.msk.bf16.vlgmr.msra.gmra.mrb[8].mxu1 %vm1672_vm1, %v1626_v52  ;;  %v1815_v57 = vsel %vm1672_vm1, %v1644_v55, 0 }
 0x27c   : > { %9716 = vmatpush3.bf16.xpose.msra.mxu1 %v1769_v54  ;;  %9717 = vmatprep.mubr.msk.bf16.mxu1 %vm11168_vm0, %v11167_v4 }
 0x27d   : > { %9721 = vmatprep.subr.bf16.mxu1 %v11167_v4 }
 0x27e   : > { %v1647_v60 = vpop.permute.xlu0 %1646  ;;  %v1633_v63 = vpop.permute.xlu1 %1632 }
 0x27f   : > { %v1907_v61 = vsel %vm1672_vm1, %v1647_v60, 0 }
 0x282   : > { %v1649_v62 = vpop.permute.xlu0 %1648  ;;  %v1635_v2 = vpop.permute.xlu1 %1634 }
 0x283   : > { %9718 = vmatmul.mubr.msk.bf16.vlgmr.msra.gmra.mrb[12].mxu1 %vm1672_vm1, %v1628_v56  ;;  %v1953_v0 = vsel %vm1672_vm1, %v1649_v62, 0  ;;  %v11653_v62 = vpack.c.bf16 %v1611_v26, %v1611_v26 }
 0x284   : > { %9722 = vmatpush3.bf16.xpose.msra.mxu1 %v1815_v57  ;;  %9723 = vmatprep.mubr.msk.bf16.mxu1 %vm11168_vm0, %v11167_v4 }
 0x285   : > { %9727 = vmatprep.subr.bf16.mxu1 %v11167_v4 }
 0x286   : > { %v1651_v1 = vpop.permute.xlu0 %1650  ;;  %v1637_v5 = vpop.permute.xlu1 %1636 }
 0x287   : > { %v1999_v3 = vsel %vm1672_vm1, %v1651_v1, 0 }
 0x28b   : > { %9724 = vmatmul.mubr.msk.bf16.vlgmr.msra.gmra.mrb[16].mxu1 %vm1672_vm1, %v1630_v58  ;;  %v1613_v58 = vpop.f32.mrb[5].mxu0 }
 0x28c   : > { %9728 = vmatpush3.bf16.xpose.msra.mxu1 %v1861_v59  ;;  %9729 = vmatprep.mubr.msk.bf16.mxu1 %vm11168_vm0, %v11167_v4  ;;  %v1615_v59 = vpop.f32.mrb[6].mxu0 }
 0x28d   : > { %9733 = vmatprep.subr.bf16.mxu1 %v11167_v4  ;;  %v1616_v60 = vpop.f32.mrb[7].mxu0 }
 0x293   : > { %9730 = vmatmul.mubr.msk.bf16.vlgmr.msra.gmra.mrb[20].mxu1 %vm1672_vm1, %v11558_v17 }
 0x294   : > { %9734 = vmatpush3.bf16.xpose.msra.mxu1 %v1907_v61  ;;  %9735 = vmatprep.mubr.msk.bf16.mxu1 %vm11168_vm0, %v11167_v4 }
 0x295   : > { %9739 = vmatprep.subr.bf16.mxu1 %v11167_v4 }
 0x29b   : > { %9736 = vmatmul.mubr.msk.bf16.vlgmr.msra.gmra.mrb[24].mxu1 %vm1672_vm1, %v1633_v63  ;;  %v11655_v63 = vpack.c.bf16 %v1613_v58, %v1613_v58 }
 0x29c   : > { %9740 = vmatpush3.bf16.xpose.msra.mxu1 %v1953_v0  ;;  %9741 = vmatprep.mubr.msk.bf16.mxu1 %vm11168_vm0, %v11167_v4 }
 0x29d   : > { %9745 = vmatprep.subr.bf16.mxu1 %v11167_v4 }
 0x2a3   : > { %9742 = vmatmul.mubr.msk.bf16.vlgmr.msra.gmra.mrb[28].mxu1 %vm1672_vm1, %v1635_v2 }
 0x2a4   : > { %9746 = vmatpush3.bf16.xpose.msra.mxu1 %v1999_v3  ;;  %9747 = vmatprep.mubr.msk.bf16.mxu1 %vm11168_vm0, %v11167_v4  ;;  %v2151_v3 = vsel %vm2149_vm4, %v11653_v62, 0 }
 0x2a5   : > { %9751 = vmatprep.subr.bf16.mxu1 %v11167_v4 }
 0x2ab   : > { %9748 = vmatmul.mubr.msk.bf16.vlgmr.msra.gmra.mrb[32].mxu1 %vm1672_vm1, %v1637_v5  ;;  %v2335_v5 = vsel %vm2149_vm4, %v11655_v63, 0 }
 0x2ac   : > { %9753 = vmatprep.mubr.msk.bf16.mxu1 %vm11168_vm0, %v11167_v4  ;;  %9752 = vmatpush3.bf16.msra.mxu1 %v2151_v3 }
 0x2ad   : > { %9776 = vmatpush3.bf16.msra.mxu0 %v2335_v5  ;;  %9757 = vmatprep.subr.bf16.mxu1 %v11167_v4 }
 0x2ae   : > { %9787 = vmatprep.subr.bf16.mxu0 %v11167_v4 }
 0x2dc   : > { %v1713_v12 = vpop.f32.mrb[4].mxu1 }
 0x2dd   : > { %v1714_v13 = vadd.f32 %v1713_v12, %v11624_v11  ;;  %v9707_v14 = vpop.f32.mrb[5].mxu1 }
 0x2de   : > { %v1716_v15 = vpop.f32.mrb[6].mxu1 }
 0x2df   : > { %v2041_v16 = vmul.f32 0.0625, %v1714_v13  ;;  %v9708_v17 = vpop.f32.mrb[7].mxu1 }
 0x2e1   : > { %v2050_v18 = vsel %vm2049_vm3, %v2041_v16, -inf }
 0x2e2   : > { %2051 = vmax.xlane.f32.xlu0 %v2050_v18 }
 0x34e   : > { %v1759_v19 = vpop.f32.mrb[8].mxu1 }
 0x34f   : > { %v1760_v20 = vadd.f32 %v1759_v19, %v11624_v11  ;;  %v9713_v21 = vpop.f32.mrb[9].mxu1 }
 0x350   : > { %v1762_v22 = vpop.f32.mrb[10].mxu1 }
 0x351   : > { %v11629_v23 = vmul.f32 0.0625, %v1760_v20  ;;  %v9714_v24 = vpop.f32.mrb[11].mxu1 }
 0x353   : > { %v2053_v25 = vsel %vm2049_vm3, %v11629_v23, -inf }
 0x354   : > { %2054 = vmax.xlane.f32.xlu1 %v2053_v25 }
 0x356   : > { %v1805_v27 = vpop.f32.mrb[12].mxu1 }
 0x357   : > { %v1806_v28 = vadd.f32 %v1805_v27, %v11624_v11  ;;  %v9719_v29 = vpop.f32.mrb[13].mxu1 }
 0x358   : > { %v1808_v30 = vpop.f32.mrb[14].mxu1 }
 0x359   : > { %v11634_v31 = vmul.f32 0.0625, %v1806_v28  ;;  %v9720_v32 = vpop.f32.mrb[15].mxu1 }
 0x35b   : > { %v2056_v33 = vsel %vm2049_vm3, %v11634_v31, -inf }
 0x35c   : > { %2057 = vmax.xlane.f32.xlu0 %v2056_v33 }
 0x35e   : > { %v1851_v34 = vpop.f32.mrb[16].mxu1 }
 0x35f   : > { %v1852_v35 = vadd.f32 %v1851_v34, %v11624_v11  ;;  %v9725_v36 = vpop.f32.mrb[17].mxu1 }
 0x360   : > { %v1854_v37 = vpop.f32.mrb[18].mxu1 }
 0x361   : > { %v11639_v38 = vmul.f32 0.0625, %v1852_v35  ;;  %v9726_v39 = vpop.f32.mrb[19].mxu1 }
 0x363   : > { %v2059_v40 = vsel %vm2049_vm3, %v11639_v38, -inf }
 0x364   : > { %2060 = vmax.xlane.f32.xlu0 %v2059_v40 }
 0x366   : > { %v1897_v41 = vpop.f32.mrb[20].mxu1 }
 0x367   : > { %v1898_v42 = vadd.f32 %v1897_v41, %v11624_v11  ;;  %v9731_v43 = vpop.f32.mrb[21].mxu1 }
 0x368   : > { %v1900_v44 = vpop.f32.mrb[22].mxu1 }
 0x369   : > { %v11644_v45 = vmul.f32 0.0625, %v1898_v42  ;;  %v9732_v46 = vpop.f32.mrb[23].mxu1 }
 0x36b   : > { %v2062_v47 = vsel %vm2049_vm3, %v11644_v45, -inf }
 0x36c   : > { %2063 = vmax.xlane.f32.xlu1 %v2062_v47 }
 0x36e   : > { %v1943_v48 = vpop.f32.mrb[24].mxu1 }
 0x36f   : > { %v1944_v49 = vadd.f32 %v1943_v48, %v11624_v11  ;;  %v2052_v50 = vpop.xlane.xlu0 %2051  ;;  %v9737_v51 = vpop.f32.mrb[25].mxu1 }
 0x370   : > { %v2074_v52 = vsub.f32 %v2041_v16, %v2052_v50  ;;  %v1946_v53 = vpop.f32.mrb[26].mxu1 }
 0x371   : > { %v11649_v54 = vmul.f32 0.0625, %v1944_v49  ;;  %v9738_v55 = vpop.f32.mrb[27].mxu1 }
 0x372   : > { %v2082_v56 = vmul.f32 1.442695, %v2074_v52 }
 0x373   : > { %v2065_v57 = vsel %vm2049_vm3, %v11649_v54, -inf }
 0x374   : > { %10794 = vpow2.f32 %v2082_v56  ;;  %2066 = vmax.xlane.f32.xlu0 %v2065_v57 }
 0x376   : > { %v1989_v61 = vpop.f32.mrb[28].mxu1 }
 0x377   : > { %v1990_v0 = vadd.f32 %v1989_v61, %v11624_v11  ;;  %v9743_v1 = vpop.f32.mrb[29].mxu1 }
 0x378   : > { %v1992_v2 = vpop.f32.mrb[30].mxu1 }
 0x379   : > { %v2047_v6 = vmul.f32 0.0625, %v1990_v0  ;;  %v9744_v7 = vpop.f32.mrb[31].mxu1 }
 0x37b   : > { %v2068_v10 = vsel %vm2049_vm3, %v2047_v6, -inf }
 0x37c   : > { %2069 = vmax.xlane.f32.xlu1 %v2068_v10 }
 0x37e   : > { %v10795_v12 = vpop.eup %10794  ;;  %v2035_v13 = vpop.f32.mrb[32].mxu1 }
 0x37f   : > { %v2036_v14 = vadd.f32 %v2035_v13, %v11624_v11  ;;  %v9749_v15 = vpop.f32.mrb[33].mxu1  ;;  %v2098_v16 = vsel %vm2049_vm3, %v10795_v12, 0.0 }
 0x380   : > { %v2038_v17 = vpop.f32.mrb[34].mxu1  ;;  %2099 = vadd.xlane.f32.xlu1 %v2098_v16 }
 0x381   : > { %v2048_v18 = vmul.f32 0.0625, %v2036_v14  ;;  %v9750_v19 = vpop.f32.mrb[35].mxu1 }
 0x383   : > { %v2071_v20 = vsel %vm2049_vm3, %v2048_v18, -inf }
 0x384   : > { %2072 = vmax.xlane.f32.xlu0 %v2071_v20 }
 0x391   : > { %1653 = vrot.lane.b32.xlu1 %v11653_v62, %s11170_s23 }
 0x3e1   : > { %v2055_v21 = vpop.xlane.xlu1 %2054 }
 0x3e2   : > { %v2075_v22 = vsub.f32 %v11629_v23, %v2055_v21 }
 0x3e4   : > { %v2084_v24 = vmul.f32 1.442695, %v2075_v22 }
 0x3e6   : > { %10796 = vpow2.f32 %v2084_v24 }
 0x3e9   : > { %v2058_v25 = vpop.xlane.xlu0 %2057 }
 0x3ea   : > { %v2076_v26 = vsub.f32 %v11634_v31, %v2058_v25 }
 0x3ec   : > { %v2086_v27 = vmul.f32 1.442695, %v2076_v26 }
 0x3ee   : > { %10798 = vpow2.f32 %v2086_v27 }
 0x3f0   : > { %v10797_v28 = vpop.eup %10796 }
 0x3f1   : > { %v2061_v29 = vpop.xlane.xlu0 %2060  ;;  %v2101_v30 = vsel %vm2049_vm3, %v10797_v28, 0.0 }
 0x3f2   : > { %v2077_v32 = vsub.f32 %v11639_v38, %v2061_v29  ;;  %2102 = vadd.xlane.f32.xlu0 %v2101_v30 }
 0x3f4   : > { %v2088_v33 = vmul.f32 1.442695, %v2077_v32 }
 0x3f6   : > { %10800 = vpow2.f32 %v2088_v33 }
 0x3f8   : > { %v11674_v34 = vpop.eup %10798 }
 0x3f9   : > { %v2064_v35 = vpop.xlane.xlu1 %2063  ;;  %v2104_v23 = vsel %vm2049_vm3, %v11674_v34, 0.0 }
 0x3fa   : > { %v2078_v36 = vsub.f32 %v11644_v45, %v2064_v35  ;;  %2105 = vadd.xlane.f32.xlu1 %v2104_v23 }
 0x3fc   : > { %v2090_v31 = vmul.f32 1.442695, %v2078_v36 }
 0x3fe   : > { %10802 = vpow2.f32 %v2090_v31 }
 0x400   : > { %v11679_v37 = vpop.eup %10800 }
 0x401   : > { %v2067_v39 = vpop.xlane.xlu0 %2066  ;;  %v2107_v38 = vsel %vm2049_vm3, %v11679_v37, 0.0 }
 0x402   : > { %v2079_v40 = vsub.f32 %v11649_v54, %v2067_v39  ;;  %2108 = vadd.xlane.f32.xlu0 %v2107_v38 }
 0x404   : > { %v2092_v41 = vmul.f32 1.442695, %v2079_v40 }
 0x406   : > { %10804 = vpow2.f32 %v2092_v41 }
 0x408   : > { %v10803_v42 = vpop.eup %10802 }
 0x409   : > { %v2070_v43 = vpop.xlane.xlu1 %2069  ;;  %v2110_v44 = vsel %vm2049_vm3, %v10803_v42, 0.0 }
 0x40a   : > { %v2080_v46 = vsub.f32 %v2047_v6, %v2070_v43  ;;  %2111 = vadd.xlane.f32.xlu1 %v2110_v44  ;;  %v10154_v44 = vld [vmem:[#allocation8] ss:$8 sps:$4 sm:$0xff]  }
 0x40c   : > { %v2094_v45 = vmul.f32 1.442695, %v2080_v46  ;;  %v10156_v46 = vld [vmem:[#allocation8 + $0x4] ss:$8 sps:$4 sm:$0xff]  }
 0x40d   : > { %v2100_v47 = vpop.xlane.xlu1 %2099 }
 0x40e   : > { %10806 = vpow2.f32 %v2094_v45  ;;  %v10159_v45 = vld [vmem:[#allocation8 + $0x14] ss:$8 sps:$4 sm:$0xff]  }
 0x40f   : > { %10808 = vrcp.f32 %v2100_v47  ;;  %v10157_v47 = vld [vmem:[#allocation8 + $0x10] ss:$8 sps:$4 sm:$0xff]  }
 0x410   : > { %v11685_v48 = vpop.eup %10804 }
 0x411   : > { %v2073_v49 = vpop.xlane.xlu0 %2072  ;;  %v2113_v50 = vsel %vm2049_vm3, %v11685_v48, 0.0  ;;  %v1654_v56 = vpop.permute.xlu1 %1653 }
 0x412   : > { %v2081_v51 = vsub.f32 %v2048_v18, %v2073_v49  ;;  %2114 = vadd.xlane.f32.xlu0 %v2113_v50  ;;  %v2197_v59 = vsel %vm2149_vm4, %v1654_v56, 0  ;;  %v10160_v49 = vld [vmem:[#allocation8 + $0x20] ss:$8 sps:$4 sm:$0xff]   ;;  %v10165_v50 = vld [vmem:[#allocation8 + $0x34] ss:$8 sps:$4 sm:$0xff]  }
 0x413   : > { %v10168_v56 = vld [vmem:[#allocation8 + $0x44] ss:$8 sps:$4 sm:$0xff]  }
 0x414   : > { %v2096_v52 = vmul.f32 1.442695, %v2081_v51 }
 0x416   : > { %10810 = vpow2.f32 %v2096_v52 }
 0x418   : > { %v10807_v53 = vpop.eup %10806 }
 0x419   : > { %v10809_v54 = vpop.eup %10808  ;;  %v2116_v55 = vsel %vm2049_vm3, %v10807_v53, 0.0 }
 0x41a   : > { %v2130_v57 = vmul.f32 %v10809_v54, %v10795_v12  ;;  %2117 = vadd.xlane.f32.xlu0 %v2116_v55  ;;  %v10163_v54 = vld [vmem:[#allocation8 + $0x30] ss:$8 sps:$4 sm:$0xff]  }
 0x41b   : > { %1657 = vrot.lane.b32.xlu1 %v11653_v62, %s11171_s30 }
 0x41c   : > { %v2138_v58 = vpack.c.bf16 %v2130_v57, %v2130_v57 }
 0x41e   : > { %9754 = vmatmul.mubr.msk.bf16.vlgmr.msra.gmra.mrb[36].mxu1 %vm2049_vm3, %v2138_v58  ;;  %v10166_v58 = vld [vmem:[#allocation8 + $0x40] ss:$8 sps:$4 sm:$0xff]  }
 0x41f   : > { %1660 = vrot.lane.b32.xlu1 %v11655_v63, %s11170_s23  ;;  %9758 = vmatpush3.bf16.msra.mxu1 %v2197_v59  ;;  %v10171_v59 = vld [vmem:[#allocation8 + $0x54] ss:$8 sps:$4 sm:$0xff]  }
 0x420   : > { %v11696_v60 = vpop.eup %10810  ;;  %9759 = vmatprep.mubr.msk.bf16.mxu1 %vm11168_vm0, %v11167_v4  ;;  %9763 = vmatprep.subr.bf16.mxu1 %v11167_v4 }
 0x421   : > { %v2119_v61 = vsel %vm2049_vm3, %v11696_v60, 0.0 }
 0x422   : > { %2120 = vadd.xlane.f32.xlu0 %v2119_v61  ;;  %v10174_v61 = vld [vmem:[#allocation8 + $0x64] ss:$8 sps:$4 sm:$0xff]  }
 0x423   : > { %1662 = vrot.lane.b32.xlu1 %v11655_v63, %s11169_s12 }
 0x427   : > { %1664 = vrot.lane.b32.xlu1 %v11655_v63, %s11171_s30 }
 0x438   : > { %1655 = vrot.lane.b32.xlu0 %v11653_v62, %s11169_s12 }
 0x47f   : > { %v2103_v0 = vpop.xlane.xlu0 %2102 }
 0x480   : > { %10812 = vrcp.f32 %v2103_v0  ;;  %v10172_v0 = vld [vmem:[#allocation8 + $0x60] ss:$8 sps:$4 sm:$0xff]  }
 0x487   : > { %v2106_v5 = vpop.xlane.xlu1 %2105 }
 0x48a   : > { %v10813_v1 = vpop.eup %10812 }
 0x48b   : > { %v2131_v2 = vmul.f32 %v10813_v1, %v10797_v28  ;;  %v10177_v1 = vld [vmem:[#allocation8 + $0x74] ss:$8 sps:$4 sm:$0xff]  }
 0x48d   : > { %v2139_v3 = vpack.c.bf16 %v2131_v2, %v2131_v2  ;;  %v10175_v2 = vld [vmem:[#allocation8 + $0x70] ss:$8 sps:$4 sm:$0xff]  }
 0x48f   : > { %9760 = vmatmul.mubr.msk.bf16.vlgmr.msra.gmra.mrb[40].mxu1 %vm2049_vm3, %v2139_v3  ;;  %v2109_v10 = vpop.xlane.xlu0 %2108  ;;  %v10180_v3 = vld [vmem:[#allocation8 + $0x84] ss:$8 sps:$4 sm:$0xff]  }
 0x490   : > { %9765 = vmatprep.mubr.msk.bf16.mxu1 %vm11168_vm0, %v11167_v4 }
 0x497   : > { %v2112_v6 = vpop.xlane.xlu1 %2111 }
 0x498   : > { %10814 = vrcp.f32 %v2112_v6  ;;  %v10183_v6 = vld [vmem:[#allocation8 + $0x94] ss:$8 sps:$4 sm:$0xff]  }
 0x499   : > { %10816 = vrcp.f32 %v2106_v5  ;;  %v10178_v5 = vld [vmem:[#allocation8 + $0x80] ss:$8 sps:$4 sm:$0xff]  }
 0x49b   : > { %v1658_v7 = vpop.permute.xlu1 %1657 }
 0x49c   : > { %v2289_v29 = vsel %vm2149_vm4, %v1658_v7, 0 }
 0x49f   : > { %v1661_v12 = vpop.permute.xlu1 %1660  ;;  %v2115_v14 = vpop.xlane.xlu0 %2114 }
 0x4a2   : > { %v10815_v63 = vpop.eup %10814 }
 0x4a3   : > { %v2134_v13 = vmul.f32 %v10815_v63, %v10803_v42  ;;  %v1663_v62 = vpop.permute.xlu1 %1662  ;;  %v10817_v18 = vpop.eup %10816 }
 0x4a4   : > { %v2427_v16 = vsel %vm2149_vm4, %v1663_v62, 0  ;;  %v2132_v21 = vmul.f32 %v10817_v18, %v11674_v34  ;;  %v2381_v34 = vsel %vm2149_vm4, %v1661_v12, 0  ;;  %v10181_v12 = vld [vmem:[#allocation8 + $0x90] ss:$8 sps:$4 sm:$0xff]   ;;  %v10186_v62 = vld [vmem:[#allocation8 + $0xa4] ss:$8 sps:$4 sm:$0xff]  }
 0x4a5   : > { %v2142_v15 = vpack.c.bf16 %v2134_v13, %v2134_v13  ;;  %v10192_v18 = vld [vmem:[#allocation8 + $0xc4] ss:$8 sps:$4 sm:$0xff]  }
 0x4a6   : > { %v2140_v27 = vpack.c.bf16 %v2132_v21, %v2132_v21 }
 0x4a7   : > { %9778 = vmatmul.mubr.msk.bf16.vlgmr.msra.gmra.mrb[8].mxu0 %vm2049_vm3, %v2142_v15  ;;  %v2118_v17 = vpop.xlane.xlu0 %2117  ;;  %v1665_v23 = vpop.permute.xlu1 %1664  ;;  %v10189_v15 = vld [vmem:[#allocation8 + $0xb4] ss:$8 sps:$4 sm:$0xff]  }
 0x4a8   : > { %9788 = vmatpush3.bf16.msra.mxu0 %v2427_v16  ;;  %10818 = vrcp.f32 %v2118_v17  ;;  %9789 = vmatprep.mubr.msk.bf16.mxu0 %vm11168_vm0, %v11167_v4  ;;  %v10187_v16 = vld [vmem:[#allocation8 + $0xb0] ss:$8 sps:$4 sm:$0xff]   ;;  %v10190_v17 = vld [vmem:[#allocation8 + $0xc0] ss:$8 sps:$4 sm:$0xff]  }
 0x4a9   : > { %10820 = vrcp.f32 %v2109_v10  ;;  %2730 = vmatprep.subr.bf16.mxu0 %v10156_v46 }
 0x4aa   : > { %10822 = vrcp.f32 %v2115_v14  ;;  %v10184_v14 = vld [vmem:[#allocation8 + $0xa0] ss:$8 sps:$4 sm:$0xff]  }
 0x4af   : > { %v2121_v19 = vpop.xlane.xlu0 %2120 }
 0x4b0   : > { %10824 = vrcp.f32 %v2121_v19 }
 0x4b2   : > { %v10819_v20 = vpop.eup %10818 }
 0x4b3   : > { %v2136_v22 = vmul.f32 %v10819_v20, %v10807_v53  ;;  %v1656_v24 = vpop.permute.xlu0 %1655  ;;  %v10821_v28 = vpop.eup %10820  ;;  %v10195_v20 = vld [vmem:[#allocation8 + $0xd4] ss:$8 sps:$4 sm:$0xff]  }
 0x4b4   : > { %v2243_v25 = vsel %vm2149_vm4, %v1656_v24, 0  ;;  %v2133_v30 = vmul.f32 %v10821_v28, %v11679_v37  ;;  %v10823_v33 = vpop.eup %10822  ;;  %v2473_v37 = vsel %vm2149_vm4, %v1665_v23, 0 }
 0x4b5   : > { %9764 = vmatpush3.bf16.msra.mxu1 %v2243_v25  ;;  %v2144_v26 = vpack.c.bf16 %v2136_v22, %v2136_v22  ;;  %v2135_v35 = vmul.f32 %v10823_v33, %v11685_v48  ;;  %v10162_v48 = vld [vmem:[#allocation8 + $0x24] ss:$8 sps:$4 sm:$0xff]  }
 0x4b6   : > { %9769 = vmatprep.subr.bf16.mxu1 %v11167_v4  ;;  %v2141_v32 = vpack.c.bf16 %v2133_v30, %v2133_v30  ;;  %v10198_v33 = vld [vmem:[#allocation8 + $0xe4] ss:$8 sps:$4 sm:$0xff]  }
 0x4b7   : > { %9790 = vmatmul.mubr.msk.bf16.vlgmr.msra.gmra.mrb[12].mxu0 %vm2049_vm3, %v2144_v26  ;;  %v2143_v36 = vpack.c.bf16 %v2135_v35, %v2135_v35 }
 0x4b8   : > { %9766 = vmatmul.mubr.msk.bf16.vlgmr.msra.gmra.mrb[44].mxu1 %vm2049_vm3, %v2140_v27  ;;  %2731 = vmatpush1.bf16.msra.mxu0 %v10154_v44  ;;  %v10193_v27 = vld [vmem:[#allocation8 + $0xd0] ss:$8 sps:$4 sm:$0xff]  }
 0x4b9   : > { %9770 = vmatpush3.bf16.msra.mxu1 %v2289_v29  ;;  %9771 = vmatprep.mubr.msk.bf16.mxu1 %vm11168_vm0, %v11167_v4 }
 0x4ba   : > { %9781 = vmatprep.subr.bf16.mxu1 %v11167_v4  ;;  %v10825_v31 = vpop.eup %10824  ;;  %2732 = vmatprep.subr.bf16.mxu0 %v10159_v45 }
 0x4bb   : > { %v2137_v39 = vmul.f32 %v10825_v31, %v11696_v60  ;;  %v10169_v60 = vld [vmem:[#allocation8 + $0x50] ss:$8 sps:$4 sm:$0xff]  }
 0x4bc   : > { %2733 = vmatpush1.bf16.msra.mxu0 %v10157_v47  ;;  %v10199_v31 = vld [vmem:[#allocation8 + $0xf0] ss:$8 sps:$4 sm:$0xff]  }
 0x4bd   : > { %v2145_v38 = vpack.c.bf16 %v2137_v39, %v2137_v39  ;;  %2734 = vmatprep.subr.bf16.mxu0 %v10162_v48 }
 0x4c0   : > { %9772 = vmatmul.mubr.msk.bf16.vlgmr.msra.gmra.mrb[48].mxu1 %vm2049_vm3, %v2141_v32  ;;  %2735 = vmatpush1.bf16.msra.mxu0 %v10160_v49  ;;  %v10196_v32 = vld [vmem:[#allocation8 + $0xe0] ss:$8 sps:$4 sm:$0xff]  }
 0x4c1   : > { %9782 = vmatpush3.bf16.msra.mxu1 %v2381_v34  ;;  %9783 = vmatprep.mubr.msk.bf16.mxu1 %vm11168_vm0, %v11167_v4 }
 0x4c2   : > { %9793 = vmatprep.subr.bf16.mxu1 %v11167_v4  ;;  %2736 = vmatprep.subr.bf16.mxu0 %v10165_v50 }
 0x4c4   : > { %2737 = vmatpush1.bf16.msra.mxu0 %v10163_v54 }
 0x4c5   : > { %2738 = vmatprep.subr.bf16.mxu0 %v10168_v56 }
 0x4c8   : > { %9784 = vmatmul.mubr.msk.bf16.vlgmr.msra.gmra.mrb[52].mxu1 %vm2049_vm3, %v2143_v36  ;;  %2739 = vmatpush1.bf16.msra.mxu0 %v10166_v58 }
 0x4c9   : > { %9794 = vmatpush3.bf16.msra.mxu1 %v2473_v37  ;;  %9795 = vmatprep.mubr.msk.bf16.mxu1 %vm11168_vm0, %v11167_v4  ;;  %v10201_v37 = vld [vmem:[#allocation8 + $0xf4] ss:$8 sps:$4 sm:$0xff]  }
 0x4ca   : > { %2740 = vmatprep.subr.bf16.mxu0 %v10171_v59 }
 0x4cc   : > { %2741 = vmatpush1.bf16.msra.mxu0 %v10169_v60 }
 0x4cd   : > { %2742 = vmatprep.subr.bf16.mxu0 %v10174_v61 }
 0x4d0   : > { %9796 = vmatmul.mubr.msk.bf16.vlgmr.msra.gmra.mrb[56].mxu1 %vm2049_vm3, %v2145_v38  ;;  %2743 = vmatpush1.bf16.msra.mxu0 %v10172_v0 }
 0x4d1   : > { %2744 = vmatprep.subr.bf16.mxu0 %v10177_v1 }
 0x4d4   : > { %2745 = vmatpush1.bf16.msra.mxu0 %v10175_v2 }
 0x4d5   : > { %2746 = vmatprep.subr.bf16.mxu0 %v10180_v3  ;;  %v11762_v3 = vsub.s32 1, %v11617_v8 }
 0x4d8   : > { %2747 = vmatpush1.bf16.msra.mxu0 %v10178_v5 }
 0x4d9   : > { %2748 = vmatprep.subr.bf16.mxu0 %v10183_v6 }
 0x4dc   : > { %2749 = vmatpush1.bf16.msra.mxu0 %v10181_v12 }
 0x4dd   : > { %2750 = vmatprep.subr.bf16.mxu0 %v10186_v62 }
 0x4e0   : > { %2751 = vmatpush1.bf16.msra.mxu0 %v10184_v14  ;;  %v10866_v14 = vld [vmem:[%s11514_s17] sm:$0xff] }
 0x4e1   : > { %2752 = vmatprep.subr.bf16.mxu0 %v10189_v15 }
 0x4e4   : > { %2753 = vmatpush1.bf16.msra.mxu0 %v10187_v16  ;;  %v10867_v16 = vld [vmem:[%s11514_s17 + $0x8] sm:$0xff] }
 0x4e5   : > { %2754 = vmatprep.subr.bf16.mxu0 %v10192_v18 }
 0x4e8   : > { %2755 = vmatpush1.bf16.msra.mxu0 %v10190_v17 }
 0x4e9   : > { %2756 = vmatprep.subr.bf16.mxu0 %v10195_v20  ;;  %v757_v20 = vld [vmem:[#allocation10 + $0x20] sm:$0xff] }
 0x4ec   : > { %2757 = vmatpush1.bf16.msra.mxu0 %v10193_v27  ;;  %v765_v27 = vld [vmem:[#allocation10 + $0x60] sm:$0xff] }
 0x4ed   : > { %2758 = vmatprep.subr.bf16.mxu0 %v10198_v33  ;;  %v766_v33 = vld [vmem:[#allocation10 + $0x68] sm:$0xff] }
 0x4f0   : > { %2759 = vmatpush1.bf16.msra.mxu0 %v10196_v32  ;;  %v762_v32 = vld [vmem:[#allocation10 + $0x48] sm:$0xff] }
 0x4f1   : > { %v11738_v40 = vpop.f32.mrb[36].mxu1  ;;  %2760 = vmatprep.subr.bf16.mxu0 %v10201_v37 }
 0x4f2   : > { %v9755_v41 = vpop.f32.mrb[37].mxu1  ;;  %v2515_v56 = vpack.c.bf16 %v11738_v40, %v11738_v40  ;;  %v750_v40 = vld [vmem:[%s12210_s4] sm:$0x3] }
 0x4f3   : > { %v2190_v42 = vpop.f32.mrb[38].mxu1  ;;  %v2563_v5 = vrot.slane %v750_v40, %v11620_v9  ;;  %v2567_v6 = vrot.slane %v750_v40, %v11762_v3 }
 0x4f4   : > { %v9756_v43 = vpop.f32.mrb[39].mxu1  ;;  %2761 = vmatpush1.bf16.msra.mxu0 %v10199_v31  ;;  %v774_v31 = vld [vmem:[#allocation10 + $0xa8] sm:$0xff] }
 0x562   : > { %v2233_v51 = vpop.f32.mrb[40].mxu1 }
 0x563   : > { %v2516_v52 = vpack.c.bf16 %v2233_v51, %v2233_v51  ;;  %v9761_v53 = vpop.f32.mrb[41].mxu1 }
 0x564   : > { %v2236_v55 = vpop.f32.mrb[42].mxu1 }
 0x565   : > { %2524 = vrot.lane.b32.xlu1 %v2516_v52, %s11171_s30  ;;  %v9762_v57 = vpop.f32.mrb[43].mxu1 }
 0x57a   : > { %v11741_v7 = vpop.f32.mrb[8].mxu0 }
 0x57b   : > { %v9779_v10 = vpop.f32.mrb[9].mxu0  ;;  %v2519_v55 = vpack.c.bf16 %v11741_v7, %v11741_v7 }
 0x57c   : > { %v2374_v63 = vpop.f32.mrb[10].mxu0 }
 0x57d   : > { %v9780_v13 = vpop.f32.mrb[11].mxu0 }
 0x58a   : > { %v2463_v19 = vpop.f32.mrb[12].mxu0 }
 0x58b   : > { %v2279_v21 = vpop.f32.mrb[44].mxu1  ;;  %v9791_v22 = vpop.f32.mrb[13].mxu0  ;;  %v2521_v46 = vpack.c.bf16 %v2463_v19, %v2463_v19  ;;  %v753_v19 = vld [vmem:[#allocation10] sm:$0xff] }
 0x58c   : > { %v2517_v24 = vpack.c.bf16 %v2279_v21, %v2279_v21  ;;  %v9767_v25 = vpop.f32.mrb[45].mxu1  ;;  %v2466_v26 = vpop.f32.mrb[14].mxu0  ;;  %v754_v21 = vld [vmem:[#allocation10 + $0x8] sm:$0xff]  ;;  %v8934_v22 = vcombine.low %v753_v19, %v757_v20 }
 0x58d   : > { %v2282_v28 = vpop.f32.mrb[46].mxu1  ;;  %v9792_v29 = vpop.f32.mrb[15].mxu0  ;;  %v758_v25 = vld [vmem:[#allocation10 + $0x28] sm:$0xff]  ;;  %v761_v26 = vld [vmem:[#allocation10 + $0x40] sm:$0xff] }
 0x58e   : > { %2527 = vrot.lane.b32.xlu1 %v2517_v24, %s11169_s12  ;;  %v9768_v30 = vpop.f32.mrb[47].mxu1  ;;  %v8935_v24 = vcombine.high %v753_v19, %v757_v20  ;;  %v8936_v28 = vcombine.low %v754_v21, %v758_v25  ;;  %v8937_v29 = vcombine.high %v754_v21, %v758_v25  ;;  %v8942_v37 = vcombine.low %v761_v26, %v765_v27  ;;  %v814_v19 = vld [vmem:[#allocation10 + $0x1e8] sm:$0xff]  ;;  %v817_v25 = vld [vmem:[#allocation10 + $0x200] sm:$0xff] }
 0x58f   : > { %v8943_v30 = vcombine.high %v761_v26, %v765_v27  ;;  %v821_v26 = vld [vmem:[#allocation10 + $0x220] sm:$0xff]  ;;  %v818_v27 = vld [vmem:[#allocation10 + $0x208] sm:$0xff] }
 0x590   : > { %3499 = vmatprep.subr.bf16.mxu1 %v8935_v24  ;;  %3540 = vmatprep.subr.bf16.mxu0 %v8937_v29 }
 0x591   : > { %3500 = vmatpush1.bf16.msra.mxu1 %v8934_v22 }
 0x592   : > { %3501 = vmatprep.subr.bf16.mxu1 %v8943_v30 }
 0x593   : > { %v2325_v34 = vpop.f32.mrb[48].mxu1 }
 0x594   : > { %v2518_v35 = vpack.c.bf16 %v2325_v34, %v2325_v34  ;;  %v9773_v23 = vpop.f32.mrb[49].mxu1  ;;  %v769_v34 = vld [vmem:[#allocation10 + $0x80] sm:$0xff] }
 0x595   : > { %v2328_v36 = vpop.f32.mrb[50].mxu1  ;;  %v773_v23 = vld [vmem:[#allocation10 + $0xa0] sm:$0xff]  ;;  %3502 = vmatpush1.bf16.msra.mxu1 %v8942_v37 }
 0x596   : > { %2530 = vrot.lane.b32.xlu1 %v2518_v35, %s11170_s23  ;;  %v9774_v39 = vpop.f32.mrb[51].mxu1  ;;  %v8945_v35 = vcombine.high %v762_v32, %v766_v33  ;;  %v770_v36 = vld [vmem:[#allocation10 + $0x88] sm:$0xff] }
 0x597   : > { %v8944_v39 = vcombine.low %v762_v32, %v766_v33  ;;  %v8999_v32 = vcombine.high %v817_v25, %v821_v26 }
 0x59b   : > { %v2417_v38 = vpop.f32.mrb[52].mxu1 }
 0x59c   : > { %v2520_v41 = vpack.c.bf16 %v2417_v38, %v2417_v38  ;;  %v9785_v42 = vpop.f32.mrb[53].mxu1  ;;  %v8951_v38 = vcombine.high %v769_v34, %v773_v23 }
 0x59d   : > { %v2420_v43 = vpop.f32.mrb[54].mxu1  ;;  %v777_v42 = vld [vmem:[#allocation10 + $0xc0] sm:$0xff] }
 0x59e   : > { %2533 = vrot.lane.b32.xlu0 %v2520_v41, %s11171_s30  ;;  %v9786_v44 = vpop.f32.mrb[55].mxu1  ;;  %v8953_v41 = vcombine.high %v770_v36, %v774_v31  ;;  %v781_v43 = vld [vmem:[#allocation10 + $0xe0] sm:$0xff]  ;;  %3503 = vmatprep.subr.bf16.mxu1 %v8951_v38 }
 0x59f   : > { %v778_v44 = vld [vmem:[#allocation10 + $0xc8] sm:$0xff] }
 0x5a2   : > { %2536 = vrot.lane.b32.xlu0 %v2521_v46, %s11169_s12  ;;  %v782_v46 = vld [vmem:[#allocation10 + $0xe8] sm:$0xff] }
 0x5a3   : > { %v2509_v45 = vpop.f32.mrb[56].mxu1 }
 0x5a4   : > { %v2522_v47 = vpack.c.bf16 %v2509_v45, %v2509_v45  ;;  %v9797_v48 = vpop.f32.mrb[57].mxu1  ;;  %v8950_v45 = vcombine.low %v769_v34, %v773_v23  ;;  %v825_v34 = vld [vmem:[#allocation10 + $0x240] sm:$0xff]  ;;  %v826_v23 = vld [vmem:[#allocation10 + $0x248] sm:$0xff] }
 0x5a5   : > { %v2512_v49 = vpop.f32.mrb[58].mxu1  ;;  %v8959_v48 = vcombine.high %v777_v42, %v781_v43 }
 0x5a6   : > { %2539 = vrot.lane.b32.xlu0 %v2522_v47, %s11170_s23  ;;  %v9798_v50 = vpop.f32.mrb[59].mxu1  ;;  %v8952_v47 = vcombine.low %v770_v36, %v774_v31  ;;  %v8961_v49 = vcombine.high %v778_v44, %v782_v46  ;;  %3504 = vmatpush1.bf16.msra.mxu1 %v8950_v45  ;;  %v830_v36 = vld [vmem:[#allocation10 + $0x268] sm:$0xff]  ;;  %v8998_v31 = vcombine.low %v817_v25, %v821_v26 }
 0x5a7   : > { %v785_v50 = vld [vmem:[#allocation10 + $0x100] sm:$0xff]  ;;  %3505 = vmatprep.subr.bf16.mxu1 %v8959_v48  ;;  %v9009_v38 = vcombine.high %v826_v23, %v830_v36  ;;  %v9008_v45 = vcombine.low %v826_v23, %v830_v36  ;;  %v866_v25 = vld [vmem:[#allocation10 + $0x388] sm:$0xff] }
 0x5a8   : > { %v878_v23 = vld [vmem:[#allocation10 + $0x3e8] sm:$0xff] }
 0x5d7   : > { %v2525_v51 = vpop.permute.xlu1 %2524 }
 0x5d8   : > { %v2543_v59 = vsel %vm1672_vm1, %v2515_v56, %v2525_v51  ;;  %v789_v51 = vld [vmem:[#allocation10 + $0x120] sm:$0xff] }
 0x5d9   : > { %v8967_v56 = vcombine.high %v785_v50, %v789_v51 }
 0x600   : > { %v2528_v53 = vpop.permute.xlu1 %2527 }
 0x601   : > { %v2546_v0 = vsel %vm2544_vm5, %v2543_v59, %v2528_v53  ;;  %v790_v53 = vld [vmem:[#allocation10 + $0x128] sm:$0xff]  ;;  %v797_v59 = vld [vmem:[#allocation10 + $0x160] sm:$0xff] }
 0x608   : > { %v2531_v57 = vpop.permute.xlu1 %2530 }
 0x609   : > { %v2549_v2 = vsel %vm2547_vm6, %v2546_v0, %v2531_v57  ;;  %v8966_v0 = vcombine.low %v785_v50, %v789_v51 }
 0x610   : > { %v2534_v52 = vpop.permute.xlu0 %2533 }
 0x611   : > { %v2553_v58 = vsel %vm1672_vm1, %v2519_v55, %v2534_v52  ;;  %v786_v52 = vld [vmem:[#allocation10 + $0x108] sm:$0xff]  ;;  %v8960_v55 = vcombine.low %v778_v44, %v782_v46 }
 0x612   : > { %v8969_v57 = vcombine.high %v786_v52, %v790_v53  ;;  %v838_v44 = vld [vmem:[#allocation10 + $0x2a8] sm:$0xff] }
 0x614   : > { %v2537_v54 = vpop.permute.xlu0 %2536 }
 0x615   : > { %v2555_v60 = vsel %vm2544_vm5, %v2553_v58, %v2537_v54  ;;  %v8958_v54 = vcombine.low %v777_v42, %v781_v43  ;;  %v793_v58 = vld [vmem:[#allocation10 + $0x140] sm:$0xff]  ;;  %v834_v43 = vld [vmem:[#allocation10 + $0x288] sm:$0xff] }
 0x616   : > { %v837_v42 = vld [vmem:[#allocation10 + $0x2a0] sm:$0xff]  ;;  %v9017_v48 = vcombine.high %v834_v43, %v838_v44  ;;  %v9016_v50 = vcombine.low %v834_v43, %v838_v44  ;;  %v760_v43 = vld [vmem:[#allocation10 + $0x38] sm:$0xff] }
 0x617   : > { %3506 = vmatpush1.bf16.msra.mxu1 %v8958_v54 }
 0x618   : > { %v2540_v61 = vpop.permute.xlu0 %2539  ;;  %3507 = vmatprep.subr.bf16.mxu1 %v8967_v56 }
 0x619   : > { %v2557_v1 = vsel %vm2547_vm6, %v2555_v60, %v2540_v61  ;;  %v794_v60 = vld [vmem:[#allocation10 + $0x148] sm:$0xff] }
 0x61a   : > { %2762 = vmatprep.mubr.bf16.mxu0 %v2557_v1  ;;  %v798_v61 = vld [vmem:[#allocation10 + $0x168] sm:$0xff]  ;;  %v8968_v1 = vcombine.low %v786_v52, %v790_v53 }
 0x61b   : > { %2763 = vmatmul.mubr.bf16.vlgmr.msra.gmra.mrb[16].mxu0 %v2549_v2  ;;  %v8975_v2 = vcombine.high %v793_v58, %v797_v59  ;;  %v8977_v40 = vcombine.high %v794_v60, %v798_v61  ;;  %3508 = vmatpush1.bf16.msra.mxu1 %v8966_v0  ;;  %v846_v0 = vld [vmem:[#allocation10 + $0x2e8] sm:$0xff] }
 0x61c   : > { %3541 = vmatpush1.bf16.msra.mxu0 %v8936_v28  ;;  %v822_v28 = vld [vmem:[#allocation10 + $0x228] sm:$0xff] }
 0x61d   : > { %3542 = vmatprep.subr.bf16.mxu0 %v8945_v35  ;;  %3509 = vmatprep.subr.bf16.mxu1 %v8975_v2  ;;  %v9001_v33 = vcombine.high %v818_v27, %v822_v28  ;;  %v829_v35 = vld [vmem:[#allocation10 + $0x260] sm:$0xff]  ;;  %v9000_v37 = vcombine.low %v818_v27, %v822_v28  ;;  %v870_v27 = vld [vmem:[#allocation10 + $0x3a8] sm:$0xff] }
 0x61e   : > { %v9006_v46 = vcombine.low %v825_v34, %v829_v35 }
 0x620   : > { %3543 = vmatpush1.bf16.msra.mxu0 %v8944_v39  ;;  %v9007_v39 = vcombine.high %v825_v34, %v829_v35  ;;  %v874_v34 = vld [vmem:[#allocation10 + $0x3c8] sm:$0xff] }
 0x621   : > { %3544 = vmatprep.subr.bf16.mxu0 %v8953_v41  ;;  %v833_v41 = vld [vmem:[#allocation10 + $0x280] sm:$0xff] }
 0x624   : > { %3545 = vmatpush1.bf16.msra.mxu0 %v8952_v47  ;;  %v9015_v47 = vcombine.high %v833_v41, %v837_v42 }
 0x625   : > { %3546 = vmatprep.subr.bf16.mxu0 %v8961_v49  ;;  %v9014_v49 = vcombine.low %v833_v41, %v837_v42  ;;  %v756_v41 = vld [vmem:[#allocation10 + $0x18] sm:$0xff] }
 0x628   : > { %3547 = vmatpush1.bf16.msra.mxu0 %v8960_v55 }
 0x629   : > { %3548 = vmatprep.subr.bf16.mxu0 %v8969_v57 }
 0x62c   : > { %3549 = vmatpush1.bf16.msra.mxu0 %v8968_v1 }
 0x62d   : > { %3550 = vmatprep.subr.bf16.mxu0 %v8977_v40  ;;  %v853_v40 = vld [vmem:[#allocation10 + $0x320] sm:$0xff] }
 0x6ee   : > { %v2764_v7 = vpop.f32.mrb[16].mxu0 }
 0x6ef   : > { %v2765_v10 = vadd.f32 %v2764_v7, %v2563_v5  ;;  %v2766_v12 = vpop.f32.mrb[17].mxu0  ;;  %v801_v5 = vld [vmem:[#allocation10 + $0x180] sm:$0xff]  ;;  %v802_v7 = vld [vmem:[#allocation10 + $0x188] sm:$0xff] }
 0x6f0   : > { %v2767_v63 = vadd.f32 %v2766_v12, %v2567_v6  ;;  %v2768_v13 = vpop.f32.mrb[18].mxu0  ;;  %v805_v6 = vld [vmem:[#allocation10 + $0x1a0] sm:$0xff]  ;;  %v8974_v12 = vcombine.low %v793_v58, %v797_v59 }
 0x6f1   : > { %v11767_v62 = vadd.f32 %v10866_v14, %v2765_v10  ;;  %v2769_v15 = vpop.f32.mrb[19].mxu0  ;;  %v806_v10 = vld [vmem:[#allocation10 + $0x1a8] sm:$0xff]  ;;  %v8983_v13 = vcombine.high %v801_v5, %v805_v6  ;;  %v8982_v20 = vcombine.low %v801_v5, %v805_v6  ;;  %v841_v58 = vld [vmem:[#allocation10 + $0x2c0] sm:$0xff] }
 0x6f2   : > { %v11770_v17 = vadd.f32 %v10867_v16, %v2767_v63  ;;  %v8976_v63 = vcombine.low %v794_v60, %v798_v61  ;;  %v8985_v14 = vcombine.high %v802_v7, %v806_v10  ;;  %v809_v15 = vld [vmem:[#allocation10 + $0x1c0] sm:$0xff]  ;;  %3510 = vmatpush1.bf16.msra.mxu1 %v8974_v12  ;;  %v8984_v21 = vcombine.low %v802_v7, %v806_v10  ;;  %v842_v60 = vld [vmem:[#allocation10 + $0x2c8] sm:$0xff] }
 0x6f3   : > { %v813_v16 = vld [vmem:[#allocation10 + $0x1e0] sm:$0xff]  ;;  %3511 = vmatprep.subr.bf16.mxu1 %v8983_v13  ;;  %v9024_v2 = vcombine.low %v842_v60, %v846_v0  ;;  %v850_v5 = vld [vmem:[#allocation10 + $0x308] sm:$0xff] }
 0x6f4   : > { %v2773_v18 = vadd.f32 %v11770_v17, %v11767_v62  ;;  %3551 = vmatpush1.bf16.msra.mxu0 %v8976_v63  ;;  %v8991_v22 = vcombine.high %v809_v15, %v813_v16  ;;  %v8990_v29 = vcombine.low %v809_v15, %v813_v16  ;;  %v845_v59 = vld [vmem:[#allocation10 + $0x2e0] sm:$0xff]  ;;  %v854_v7 = vld [vmem:[#allocation10 + $0x328] sm:$0xff] }
 0x6f5   : > { %3552 = vmatprep.subr.bf16.mxu0 %v8985_v14  ;;  %v9023_v61 = vcombine.high %v841_v58, %v845_v59  ;;  %v9022_v1 = vcombine.low %v841_v58, %v845_v59  ;;  %v9032_v12 = vcombine.low %v850_v5, %v854_v7  ;;  %v9033_v63 = vcombine.high %v850_v5, %v854_v7  ;;  %v857_v13 = vld [vmem:[#allocation10 + $0x340] sm:$0xff]  ;;  %v858_v15 = vld [vmem:[#allocation10 + $0x348] sm:$0xff]  ;;  %v768_v5 = vld [vmem:[#allocation10 + $0x78] sm:$0xff] }
 0x6f6   : > { %2774 = vadd.xlane.f32.xlu0 %v2773_v18  ;;  %v810_v18 = vld [vmem:[#allocation10 + $0x1c8] sm:$0xff]  ;;  %3512 = vmatpush1.bf16.msra.mxu1 %v8982_v20  ;;  %v861_v14 = vld [vmem:[#allocation10 + $0x360] sm:$0xff] }
 0x6f7   : > { %v8993_v24 = vcombine.high %v810_v18, %v814_v19  ;;  %3513 = vmatprep.subr.bf16.mxu1 %v8991_v22  ;;  %v8992_v30 = vcombine.low %v810_v18, %v814_v19  ;;  %v9039_v16 = vcombine.high %v857_v13, %v861_v14  ;;  %v862_v18 = vld [vmem:[#allocation10 + $0x368] sm:$0xff]  ;;  %v9038_v19 = vcombine.low %v857_v13, %v861_v14  ;;  %v865_v22 = vld [vmem:[#allocation10 + $0x380] sm:$0xff]  ;;  %v776_v13 = vld [vmem:[#allocation10 + $0xb8] sm:$0xff] }
 0x6f8   : > { %3553 = vmatpush1.bf16.msra.mxu0 %v8984_v21  ;;  %v9040_v20 = vcombine.low %v858_v15, %v862_v18  ;;  %v9041_v21 = vcombine.high %v858_v15, %v862_v18 }
 0x6f9   : > { %3554 = vmatprep.subr.bf16.mxu0 %v8993_v24  ;;  %v869_v24 = vld [vmem:[#allocation10 + $0x3a0] sm:$0xff] }
 0x6fa   : > { %3514 = vmatpush1.bf16.msra.mxu1 %v8990_v29  ;;  %v9047_v26 = vcombine.high %v865_v22, %v869_v24  ;;  %v9046_v28 = vcombine.low %v865_v22, %v869_v24  ;;  %v9048_v29 = vcombine.low %v866_v25, %v870_v27  ;;  %v784_v22 = vld [vmem:[#allocation10 + $0xf8] sm:$0xff] }
 0x6fb   : > { %3515 = vmatprep.subr.bf16.mxu1 %v8999_v32  ;;  %v873_v32 = vld [vmem:[#allocation10 + $0x3c0] sm:$0xff] }
 0x6fc   : > { %3555 = vmatpush1.bf16.msra.mxu0 %v8992_v30  ;;  %v9049_v30 = vcombine.high %v866_v25, %v870_v27 }
 0x6fd   : > { %3556 = vmatprep.subr.bf16.mxu0 %v9001_v33  ;;  %v877_v33 = vld [vmem:[#allocation10 + $0x3e0] sm:$0xff] }
 0x6fe   : > { %3516 = vmatpush1.bf16.msra.mxu1 %v8998_v31  ;;  %v9055_v35 = vcombine.high %v873_v32, %v877_v33  ;;  %v9054_v36 = vcombine.low %v873_v32, %v877_v33  ;;  %v9057_v31 = vcombine.high %v874_v34, %v878_v23  ;;  %v792_v32 = vld [vmem:[#allocation10 + $0x138] sm:$0xff] }
 0x6ff   : > { %3517 = vmatprep.subr.bf16.mxu1 %v9007_v39  ;;  %v755_v39 = vld [vmem:[#allocation10 + $0x10] sm:$0xff] }
 0x700   : > { %3557 = vmatpush1.bf16.msra.mxu0 %v9000_v37  ;;  %v9056_v37 = vcombine.low %v874_v34, %v878_v23 }
 0x701   : > { %3558 = vmatprep.subr.bf16.mxu0 %v9009_v38  ;;  %v759_v38 = vld [vmem:[#allocation10 + $0x30] sm:$0xff] }
 0x702   : > { %3518 = vmatpush1.bf16.msra.mxu1 %v9006_v46  ;;  %v8939_v42 = vcombine.high %v755_v39, %v759_v38  ;;  %v8938_v44 = vcombine.low %v755_v39, %v759_v38  ;;  %v8940_v46 = vcombine.low %v756_v41, %v760_v43  ;;  %v800_v39 = vld [vmem:[#allocation10 + $0x178] sm:$0xff] }
 0x703   : > { %3519 = vmatprep.subr.bf16.mxu1 %v9015_v47 }
 0x704   : > { %3559 = vmatpush1.bf16.msra.mxu0 %v9008_v45  ;;  %v8941_v45 = vcombine.high %v756_v41, %v760_v43 }
 0x705   : > { %3560 = vmatprep.subr.bf16.mxu0 %v9017_v48 }
 0x706   : > { %3520 = vmatpush1.bf16.msra.mxu1 %v9014_v49 }
 0x707   : > { %3521 = vmatprep.subr.bf16.mxu1 %v9023_v61 }
 0x708   : > { %3561 = vmatpush1.bf16.msra.mxu0 %v9016_v50  ;;  %v751_v50 = vld [vmem:[%s12211_s5] sm:$0x3] }
 0x70a   : > { %3522 = vmatpush1.bf16.msra.mxu1 %v9022_v1 }
 0x783   : > { %v2775_v51 = vpop.xlane.xlu0 %2774 }
 0x784   : > { %v2777_v52 = vmul.f32 0.00390625, %v2775_v51  ;;  %v752_v51 = vld [vmem:[%s12263_s26] sm:$0x3] }
 0x785   : > { %v2811_v59 = vrot.slane %v752_v51, %v11762_v3 }
 0x786   : > { %v11775_v53 = vsub.f32 %v11767_v62, %v2777_v52  ;;  %v11778_v54 = vsub.f32 %v11770_v17, %v2777_v52  ;;  %v9025_v62 = vcombine.high %v842_v60, %v846_v0  ;;  %v849_v17 = vld [vmem:[#allocation10 + $0x300] sm:$0xff]  ;;  %v2798_v52 = vrot.slane %v751_v50, %v11762_v3 }
 0x787   : > { %v9031_v6 = vcombine.high %v849_v17, %v853_v40  ;;  %v9030_v10 = vcombine.low %v849_v17, %v853_v40  ;;  %v2807_v60 = vrot.slane %v752_v51, %v11620_v9  ;;  %v767_v17 = vld [vmem:[#allocation10 + $0x70] sm:$0xff]  ;;  %v764_v40 = vld [vmem:[#allocation10 + $0x58] sm:$0xff] }
 0x788   : > { %v2780_v55 = vmul.f32 %v11775_v53, %v11775_v53  ;;  %v2781_v56 = vmul.f32 %v11778_v54, %v11778_v54  ;;  %3562 = vmatprep.subr.bf16.mxu0 %v9025_v62  ;;  %v763_v62 = vld [vmem:[#allocation10 + $0x50] sm:$0xff]  ;;  %v8948_v15 = vcombine.low %v764_v40, %v768_v5 }
 0x789   : > { %3563 = vmatpush1.bf16.msra.mxu0 %v9024_v2  ;;  %3523 = vmatprep.subr.bf16.mxu1 %v9031_v6  ;;  %v8947_v7 = vcombine.high %v763_v62, %v767_v17  ;;  %v8946_v14 = vcombine.low %v763_v62, %v767_v17  ;;  %v823_v62 = vld [vmem:[#allocation10 + $0x230] sm:$0xff]  ;;  %v820_v17 = vld [vmem:[#allocation10 + $0x218] sm:$0xff] }
 0x78a   : > { %v2782_v57 = vadd.f32 %v2781_v56, %v2780_v55  ;;  %3564 = vmatprep.subr.bf16.mxu0 %v9033_v63  ;;  %3524 = vmatpush1.bf16.msra.mxu1 %v9030_v10  ;;  %v2794_v55 = vrot.slane %v751_v50, %v11620_v9  ;;  %v8949_v10 = vcombine.high %v764_v40, %v768_v5  ;;  %v772_v63 = vld [vmem:[#allocation10 + $0x98] sm:$0xff] }
 0x78b   : > { %3525 = vmatprep.subr.bf16.mxu1 %v9039_v16  ;;  %v8957_v18 = vcombine.high %v772_v63, %v776_v13  ;;  %v8956_v25 = vcombine.low %v772_v63, %v776_v13  ;;  %v824_v40 = vld [vmem:[#allocation10 + $0x238] sm:$0xff] }
 0x78c   : > { %2783 = vadd.xlane.f32.xlu1 %v2782_v57  ;;  %v828_v63 = vld [vmem:[#allocation10 + $0x258] sm:$0xff] }
 0x78d   : > { %3565 = vmatpush1.bf16.msra.mxu0 %v9032_v12  ;;  %v775_v12 = vld [vmem:[#allocation10 + $0xb0] sm:$0xff]  ;;  %v832_v13 = vld [vmem:[#allocation10 + $0x278] sm:$0xff] }
 0x78e   : > { %3566 = vmatprep.subr.bf16.mxu0 %v9041_v21  ;;  %3526 = vmatpush1.bf16.msra.mxu1 %v9038_v19  ;;  %v779_v19 = vld [vmem:[#allocation10 + $0xd0] sm:$0xff]  ;;  %v780_v21 = vld [vmem:[#allocation10 + $0xd8] sm:$0xff] }
 0x78f   : > { %3527 = vmatprep.subr.bf16.mxu1 %v9047_v26  ;;  %v8965_v27 = vcombine.high %v780_v21, %v784_v22  ;;  %v8964_v34 = vcombine.low %v780_v21, %v784_v22  ;;  %v836_v21 = vld [vmem:[#allocation10 + $0x298] sm:$0xff] }
 0x790   : > { %v840_v22 = vld [vmem:[#allocation10 + $0x2b8] sm:$0xff] }
 0x791   : > { %3567 = vmatpush1.bf16.msra.mxu0 %v9040_v20  ;;  %v783_v20 = vld [vmem:[#allocation10 + $0xf0] sm:$0xff] }
 0x792   : > { %3568 = vmatprep.subr.bf16.mxu0 %v9049_v30  ;;  %3528 = vmatpush1.bf16.msra.mxu1 %v9046_v28  ;;  %v8963_v26 = vcombine.high %v779_v19, %v783_v20  ;;  %v787_v28 = vld [vmem:[#allocation10 + $0x110] sm:$0xff]  ;;  %v788_v30 = vld [vmem:[#allocation10 + $0x118] sm:$0xff]  ;;  %v8962_v33 = vcombine.low %v779_v19, %v783_v20 }
 0x793   : > { %3529 = vmatprep.subr.bf16.mxu1 %v9055_v35  ;;  %v8973_v23 = vcombine.high %v788_v30, %v792_v32  ;;  %v8972_v41 = vcombine.low %v788_v30, %v792_v32  ;;  %v835_v19 = vld [vmem:[#allocation10 + $0x290] sm:$0xff]  ;;  %v844_v30 = vld [vmem:[#allocation10 + $0x2d8] sm:$0xff] }
 0x794   : > { %v839_v20 = vld [vmem:[#allocation10 + $0x2b0] sm:$0xff]  ;;  %v848_v32 = vld [vmem:[#allocation10 + $0x2f8] sm:$0xff] }
 0x795   : > { %3569 = vmatpush1.bf16.msra.mxu0 %v9048_v29  ;;  %v791_v29 = vld [vmem:[#allocation10 + $0x130] sm:$0xff] }
 0x796   : > { %3570 = vmatprep.subr.bf16.mxu0 %v9057_v31  ;;  %3530 = vmatpush1.bf16.msra.mxu1 %v9054_v36  ;;  %v8971_v35 = vcombine.high %v787_v28, %v791_v29  ;;  %v795_v36 = vld [vmem:[#allocation10 + $0x150] sm:$0xff]  ;;  %v8970_v38 = vcombine.low %v787_v28, %v791_v29 }
 0x797   : > { %3581 = vmatprep.subr.bf16.mxu1 %v8939_v42  ;;  %v799_v31 = vld [vmem:[#allocation10 + $0x170] sm:$0xff] }
 0x798   : > { %v8979_v42 = vcombine.high %v795_v36, %v799_v31  ;;  %v843_v28 = vld [vmem:[#allocation10 + $0x2d0] sm:$0xff] }
 0x799   : > { %3571 = vmatpush1.bf16.msra.mxu0 %v9056_v37  ;;  %v796_v37 = vld [vmem:[#allocation10 + $0x158] sm:$0xff]  ;;  %v847_v29 = vld [vmem:[#allocation10 + $0x2f0] sm:$0xff] }
 0x79a   : > { %3622 = vmatprep.subr.bf16.mxu0 %v8941_v45  ;;  %v8981_v43 = vcombine.high %v796_v37, %v800_v39  ;;  %v804_v45 = vld [vmem:[#allocation10 + $0x198] sm:$0xff] }
 0x819   : > { %v2784_v47 = vpop.xlane.xlu1 %2783 }
 0x81a   : > { %v2785_v48 = vmul.f32 0.00390625, %v2784_v47  ;;  %v808_v47 = vld [vmem:[#allocation10 + $0x1b8] sm:$0xff] }
 0x81b   : > { %v8989_v51 = vcombine.high %v804_v45, %v808_v47 }
 0x81c   : > { %v2786_v49 = vadd.f32 1e-05, %v2785_v48  ;;  %v8978_v48 = vcombine.low %v795_v36, %v799_v31  ;;  %v851_v36 = vld [vmem:[#allocation10 + $0x310] sm:$0xff] }
 0x81d   : > { %v855_v31 = vld [vmem:[#allocation10 + $0x330] sm:$0xff] }
 0x81e   : > { %10826 = vrsqrt.f32 %v2786_v49  ;;  %v8980_v49 = vcombine.low %v796_v37, %v800_v39  ;;  %v852_v37 = vld [vmem:[#allocation10 + $0x318] sm:$0xff] }
 0x81f   : > { %v856_v39 = vld [vmem:[#allocation10 + $0x338] sm:$0xff] }
 0x828   : > { %v10827_v56 = vpop.eup %10826 }
 0x829   : > { %v2788_v57 = vmul.f32 %v10827_v56, %v11775_v53  ;;  %v2789_v58 = vmul.f32 %v10827_v56, %v11778_v54  ;;  %v771_v54 = vld [vmem:[#allocation10 + $0x90] sm:$0xff]  ;;  %v812_v56 = vld [vmem:[#allocation10 + $0x1d8] sm:$0xff] }
 0x82a   : > { %v8955_v16 = vcombine.high %v771_v54, %v775_v12  ;;  %v8954_v24 = vcombine.low %v771_v54, %v775_v12  ;;  %v831_v12 = vld [vmem:[#allocation10 + $0x270] sm:$0xff] }
 0x82b   : > { %v2802_v61 = vmul.f32 %v2798_v52, %v2789_v58  ;;  %v2801_v0 = vmul.f32 %v2794_v55, %v2788_v57  ;;  %v811_v52 = vld [vmem:[#allocation10 + $0x1d0] sm:$0xff]  ;;  %v816_v57 = vld [vmem:[#allocation10 + $0x1f8] sm:$0xff] }
 0x82c   : > { %v815_v55 = vld [vmem:[#allocation10 + $0x1f0] sm:$0xff] }
 0x82d   : > { %v11796_v1 = vadd.f32 %v2811_v59, %v2802_v61  ;;  %v11798_v2 = vadd.f32 %v2807_v60, %v2801_v0  ;;  %v8988_v59 = vcombine.low %v804_v45, %v808_v47  ;;  %v8995_v60 = vcombine.high %v811_v52, %v815_v55  ;;  %v819_v0 = vld [vmem:[#allocation10 + $0x210] sm:$0xff]  ;;  %v860_v45 = vld [vmem:[#allocation10 + $0x358] sm:$0xff] }
 0x82e   : > { %v8997_v61 = vcombine.high %v812_v56, %v816_v57  ;;  %v8994_v5 = vcombine.low %v811_v52, %v815_v55  ;;  %v9003_v54 = vcombine.high %v819_v0, %v823_v62  ;;  %v864_v47 = vld [vmem:[#allocation10 + $0x378] sm:$0xff]  ;;  %v867_v52 = vld [vmem:[#allocation10 + $0x390] sm:$0xff] }
 0x82f   : > { %v2817_v6 = vpack.c.bf16 %v11796_v1, %v11796_v1  ;;  %v11804_v53 = vpack.c.bf16 %v11798_v2, %v11798_v2  ;;  %v871_v55 = vld [vmem:[#allocation10 + $0x3b0] sm:$0xff] }
 0x831   : > { %3531 = vmatprep.mubr.bf16.mxu1 %v2817_v6  ;;  %3572 = vmatprep.mubr.bf16.mxu0 %v2817_v6 }
 0x832   : > { %3532 = vmatmul.mubr.bf16.vlgmr.msra.gmra.mrb[60].mxu1 %v11804_v53  ;;  %3573 = vmatmul.mubr.bf16.vlgmr.msra.gmra.mrb[20].mxu0 %v11804_v53 }
 0x833   : > { %3582 = vmatpush1.bf16.msra.mxu1 %v8938_v44  ;;  %3623 = vmatpush1.bf16.msra.mxu0 %v8940_v46  ;;  %v803_v44 = vld [vmem:[#allocation10 + $0x190] sm:$0xff] }
 0x834   : > { %3613 = vmatprep.mubr.bf16.mxu1 %v2817_v6  ;;  %3654 = vmatprep.mubr.bf16.mxu0 %v2817_v6  ;;  %v807_v46 = vld [vmem:[#allocation10 + $0x1b0] sm:$0xff]  ;;  %v8996_v6 = vcombine.low %v812_v56, %v816_v57  ;;  %v868_v56 = vld [vmem:[#allocation10 + $0x398] sm:$0xff] }
 0x835   : > { %3583 = vmatprep.subr.bf16.mxu1 %v8947_v7  ;;  %3624 = vmatprep.subr.bf16.mxu0 %v8949_v10  ;;  %v8987_v50 = vcombine.high %v803_v44, %v807_v46  ;;  %v8986_v58 = vcombine.low %v803_v44, %v807_v46  ;;  %v9005_v7 = vcombine.high %v820_v17, %v824_v40  ;;  %v827_v10 = vld [vmem:[#allocation10 + $0x250] sm:$0xff]  ;;  %v872_v57 = vld [vmem:[#allocation10 + $0x3b8] sm:$0xff] }
 0x836   : > { %v859_v44 = vld [vmem:[#allocation10 + $0x350] sm:$0xff] }
 0x837   : > { %3584 = vmatpush1.bf16.msra.mxu1 %v8946_v14  ;;  %3625 = vmatpush1.bf16.msra.mxu0 %v8948_v15  ;;  %v9002_v14 = vcombine.low %v819_v0, %v823_v62  ;;  %v9004_v15 = vcombine.low %v820_v17, %v824_v40  ;;  %v863_v46 = vld [vmem:[#allocation10 + $0x370] sm:$0xff]  ;;  %v876_v17 = vld [vmem:[#allocation10 + $0x3d8] sm:$0xff] }
 0x838   : > { %3585 = vmatprep.subr.bf16.mxu1 %v8955_v16  ;;  %3626 = vmatprep.subr.bf16.mxu0 %v8957_v18  ;;  %v9011_v16 = vcombine.high %v827_v10, %v831_v12  ;;  %v9013_v18 = vcombine.high %v828_v63, %v832_v13  ;;  %v875_v0 = vld [vmem:[#allocation10 + $0x3d0] sm:$0xff]  ;;  %v880_v40 = vld [vmem:[#allocation10 + $0x3f8] sm:$0xff] }
 0x839   : > { %v879_v62 = vld [vmem:[#allocation10 + $0x3f0] sm:$0xff] }
 0x83b   : > { %3586 = vmatpush1.bf16.msra.mxu1 %v8954_v24  ;;  %3627 = vmatpush1.bf16.msra.mxu0 %v8956_v25  ;;  %v9010_v24 = vcombine.low %v827_v10, %v831_v12  ;;  %v9012_v25 = vcombine.low %v828_v63, %v832_v13  ;;  %v9058_v10 = vcombine.low %v875_v0, %v879_v62  ;;  %v10204_v63 = vld [vmem:[#allocation11 + $0x4] ss:$8 sps:$4 sm:$0xff]  }
 0x83c   : > { %3587 = vmatprep.subr.bf16.mxu1 %v8963_v26  ;;  %3628 = vmatprep.subr.bf16.mxu0 %v8965_v27  ;;  %v9019_v26 = vcombine.high %v835_v19, %v839_v20  ;;  %v9021_v27 = vcombine.high %v836_v21, %v840_v22  ;;  %v9060_v12 = vcombine.low %v876_v17, %v880_v40  ;;  %v10207_v13 = vld [vmem:[#allocation11 + $0x104] ss:$8 sps:$4 sm:$0xff]  }
 0x83f   : > { %3588 = vmatpush1.bf16.msra.mxu1 %v8962_v33  ;;  %3629 = vmatpush1.bf16.msra.mxu0 %v8964_v34  ;;  %v9018_v33 = vcombine.low %v835_v19, %v839_v20  ;;  %v9020_v34 = vcombine.low %v836_v21, %v840_v22  ;;  %v10208_v19 = vld [vmem:[#allocation11 + $0x10] ss:$8 sps:$4 sm:$0xff]   ;;  %v10216_v21 = vld [vmem:[#allocation11 + $0x24] ss:$8 sps:$4 sm:$0xff]  }
 0x840   : > { %3589 = vmatprep.subr.bf16.mxu1 %v8971_v35  ;;  %3630 = vmatprep.subr.bf16.mxu0 %v8973_v23  ;;  %v9027_v35 = vcombine.high %v843_v28, %v847_v29  ;;  %v9029_v23 = vcombine.high %v844_v30, %v848_v32  ;;  %v10211_v20 = vld [vmem:[#allocation11 + $0x110] ss:$8 sps:$4 sm:$0xff]   ;;  %v10219_v22 = vld [vmem:[#allocation11 + $0x124] ss:$8 sps:$4 sm:$0xff]  }
 0x843   : > { %3590 = vmatpush1.bf16.msra.mxu1 %v8970_v38  ;;  %3631 = vmatpush1.bf16.msra.mxu0 %v8972_v41  ;;  %v9026_v38 = vcombine.low %v843_v28, %v847_v29  ;;  %v9028_v41 = vcombine.low %v844_v30, %v848_v32  ;;  %v10220_v28 = vld [vmem:[#allocation11 + $0x30] ss:$8 sps:$4 sm:$0xff]   ;;  %v10228_v29 = vld [vmem:[#allocation11 + $0x44] ss:$8 sps:$4 sm:$0xff]   ;;  %v10226_v32 = vld [vmem:[#allocation11 + $0x40] ss:$8 sps:$4 sm:$0xff]  }
 0x844   : > { %3591 = vmatprep.subr.bf16.mxu1 %v8979_v42  ;;  %3632 = vmatprep.subr.bf16.mxu0 %v8981_v43  ;;  %v9035_v42 = vcombine.high %v851_v36, %v855_v31  ;;  %v9037_v43 = vcombine.high %v852_v37, %v856_v39  ;;  %v10231_v30 = vld [vmem:[#allocation11 + $0x144] ss:$8 sps:$4 sm:$0xff]  }
 0x847   : > { %3592 = vmatpush1.bf16.msra.mxu1 %v8978_v48  ;;  %3633 = vmatpush1.bf16.msra.mxu0 %v8980_v49  ;;  %v9034_v48 = vcombine.low %v851_v36, %v855_v31  ;;  %v9036_v49 = vcombine.low %v852_v37, %v856_v39  ;;  %v10235_v36 = vld [vmem:[#allocation11 + $0x150] ss:$8 sps:$4 sm:$0xff]   ;;  %v10240_v31 = vld [vmem:[#allocation11 + $0x64] ss:$8 sps:$4 sm:$0xff]   ;;  %v10238_v39 = vld [vmem:[#allocation11 + $0x60] ss:$8 sps:$4 sm:$0xff]  }
 0x848   : > { %3593 = vmatprep.subr.bf16.mxu1 %v8987_v50  ;;  %3634 = vmatprep.subr.bf16.mxu0 %v8989_v51  ;;  %v9043_v50 = vcombine.high %v859_v44, %v863_v46  ;;  %v9045_v51 = vcombine.high %v860_v45, %v864_v47  ;;  %v10243_v37 = vld [vmem:[#allocation11 + $0x164] ss:$8 sps:$4 sm:$0xff]  }
 0x84b   : > { %3594 = vmatpush1.bf16.msra.mxu1 %v8986_v58  ;;  %3635 = vmatpush1.bf16.msra.mxu0 %v8988_v59  ;;  %v9042_v58 = vcombine.low %v859_v44, %v863_v46  ;;  %v9044_v59 = vcombine.low %v860_v45, %v864_v47  ;;  %v10247_v44 = vld [vmem:[#allocation11 + $0x170] ss:$8 sps:$4 sm:$0xff]   ;;  %v10252_v46 = vld [vmem:[#allocation11 + $0x84] ss:$8 sps:$4 sm:$0xff]   ;;  %v10250_v47 = vld [vmem:[#allocation11 + $0x80] ss:$8 sps:$4 sm:$0xff]  }
 0x84c   : > { %3595 = vmatprep.subr.bf16.mxu1 %v8995_v60  ;;  %3636 = vmatprep.subr.bf16.mxu0 %v8997_v61  ;;  %v9051_v60 = vcombine.high %v867_v52, %v871_v55  ;;  %v9053_v61 = vcombine.high %v868_v56, %v872_v57  ;;  %v10255_v45 = vld [vmem:[#allocation11 + $0x184] ss:$8 sps:$4 sm:$0xff]  }
 0x84f   : > { %3596 = vmatpush1.bf16.msra.mxu1 %v8994_v5  ;;  %3637 = vmatpush1.bf16.msra.mxu0 %v8996_v6  ;;  %v9050_v5 = vcombine.low %v867_v52, %v871_v55  ;;  %v9052_v6 = vcombine.low %v868_v56, %v872_v57  ;;  %v10259_v52 = vld [vmem:[#allocation11 + $0x190] ss:$8 sps:$4 sm:$0xff]   ;;  %v10264_v55 = vld [vmem:[#allocation11 + $0xa4] ss:$8 sps:$4 sm:$0xff]   ;;  %v10262_v57 = vld [vmem:[#allocation11 + $0xa0] ss:$8 sps:$4 sm:$0xff]  }
 0x850   : > { %3597 = vmatprep.subr.bf16.mxu1 %v9003_v54  ;;  %3638 = vmatprep.subr.bf16.mxu0 %v9005_v7  ;;  %v9059_v54 = vcombine.high %v875_v0, %v879_v62  ;;  %v9061_v7 = vcombine.high %v876_v17, %v880_v40  ;;  %v10267_v56 = vld [vmem:[#allocation11 + $0x1a4] ss:$8 sps:$4 sm:$0xff]   ;;  %v10271_v0 = vld [vmem:[#allocation11 + $0x1b0] ss:$8 sps:$4 sm:$0xff]   ;;  %v10274_v40 = vld [vmem:[#allocation11 + $0xc0] ss:$8 sps:$4 sm:$0xff]  }
 0x851   : > { %v10276_v62 = vld [vmem:[#allocation11 + $0xc4] ss:$8 sps:$4 sm:$0xff]  }
 0x852   : > { %v10279_v17 = vld [vmem:[#allocation11 + $0x1c4] ss:$8 sps:$4 sm:$0xff]  }
 0x853   : > { %3598 = vmatpush1.bf16.msra.mxu1 %v9002_v14  ;;  %3639 = vmatpush1.bf16.msra.mxu0 %v9004_v15  ;;  %v10202_v14 = vld [vmem:[#allocation11] ss:$8 sps:$4 sm:$0xff]  }
 0x854   : > { %3599 = vmatprep.subr.bf16.mxu1 %v9011_v16  ;;  %3640 = vmatprep.subr.bf16.mxu0 %v9013_v18  ;;  %v10205_v15 = vld [vmem:[#allocation11 + $0x100] ss:$8 sps:$4 sm:$0xff]   ;;  %v10210_v16 = vld [vmem:[#allocation11 + $0x14] ss:$8 sps:$4 sm:$0xff]  }
 0x855   : > { %v10213_v18 = vld [vmem:[#allocation11 + $0x114] ss:$8 sps:$4 sm:$0xff]  }
 0x857   : > { %3600 = vmatpush1.bf16.msra.mxu1 %v9010_v24  ;;  %3641 = vmatpush1.bf16.msra.mxu0 %v9012_v25  ;;  %v10214_v24 = vld [vmem:[#allocation11 + $0x20] ss:$8 sps:$4 sm:$0xff]  }
 0x858   : > { %3601 = vmatprep.subr.bf16.mxu1 %v9019_v26  ;;  %3642 = vmatprep.subr.bf16.mxu0 %v9021_v27  ;;  %v10217_v25 = vld [vmem:[#allocation11 + $0x120] ss:$8 sps:$4 sm:$0xff]   ;;  %v10222_v26 = vld [vmem:[#allocation11 + $0x34] ss:$8 sps:$4 sm:$0xff]  }
 0x859   : > { %v10225_v27 = vld [vmem:[#allocation11 + $0x134] ss:$8 sps:$4 sm:$0xff]  }
 0x85b   : > { %3602 = vmatpush1.bf16.msra.mxu1 %v9018_v33  ;;  %3643 = vmatpush1.bf16.msra.mxu0 %v9020_v34  ;;  %v10229_v33 = vld [vmem:[#allocation11 + $0x140] ss:$8 sps:$4 sm:$0xff]   ;;  %v10234_v34 = vld [vmem:[#allocation11 + $0x54] ss:$8 sps:$4 sm:$0xff]  }
 0x85c   : > { %3603 = vmatprep.subr.bf16.mxu1 %v9027_v35  ;;  %3644 = vmatprep.subr.bf16.mxu0 %v9029_v23  ;;  %v10237_v35 = vld [vmem:[#allocation11 + $0x154] ss:$8 sps:$4 sm:$0xff]   ;;  %v10232_v23 = vld [vmem:[#allocation11 + $0x50] ss:$8 sps:$4 sm:$0xff]  }
 0x85f   : > { %3604 = vmatpush1.bf16.msra.mxu1 %v9026_v38  ;;  %3645 = vmatpush1.bf16.msra.mxu0 %v9028_v41  ;;  %v10241_v38 = vld [vmem:[#allocation11 + $0x160] ss:$8 sps:$4 sm:$0xff]   ;;  %v10246_v41 = vld [vmem:[#allocation11 + $0x74] ss:$8 sps:$4 sm:$0xff]  }
 0x860   : > { %3605 = vmatprep.subr.bf16.mxu1 %v9035_v42  ;;  %3646 = vmatprep.subr.bf16.mxu0 %v9037_v43  ;;  %v10249_v42 = vld [vmem:[#allocation11 + $0x174] ss:$8 sps:$4 sm:$0xff]   ;;  %v10244_v43 = vld [vmem:[#allocation11 + $0x70] ss:$8 sps:$4 sm:$0xff]  }
 0x863   : > { %3606 = vmatpush1.bf16.msra.mxu1 %v9034_v48  ;;  %3647 = vmatpush1.bf16.msra.mxu0 %v9036_v49  ;;  %v10253_v48 = vld [vmem:[#allocation11 + $0x180] ss:$8 sps:$4 sm:$0xff]   ;;  %v10258_v49 = vld [vmem:[#allocation11 + $0x94] ss:$8 sps:$4 sm:$0xff]  }
 0x864   : > { %3607 = vmatprep.subr.bf16.mxu1 %v9043_v50  ;;  %3648 = vmatprep.subr.bf16.mxu0 %v9045_v51  ;;  %v10261_v50 = vld [vmem:[#allocation11 + $0x194] ss:$8 sps:$4 sm:$0xff]   ;;  %v10256_v51 = vld [vmem:[#allocation11 + $0x90] ss:$8 sps:$4 sm:$0xff]  }
 0x867   : > { %3608 = vmatpush1.bf16.msra.mxu1 %v9042_v58  ;;  %3649 = vmatpush1.bf16.msra.mxu0 %v9044_v59  ;;  %v10265_v58 = vld [vmem:[#allocation11 + $0x1a0] ss:$8 sps:$4 sm:$0xff]   ;;  %v10270_v59 = vld [vmem:[#allocation11 + $0xb4] ss:$8 sps:$4 sm:$0xff]  }
 0x868   : > { %3609 = vmatprep.subr.bf16.mxu1 %v9051_v60  ;;  %3650 = vmatprep.subr.bf16.mxu0 %v9053_v61  ;;  %v10273_v60 = vld [vmem:[#allocation11 + $0x1b4] ss:$8 sps:$4 sm:$0xff]   ;;  %v10268_v61 = vld [vmem:[#allocation11 + $0xb0] ss:$8 sps:$4 sm:$0xff]  }
 0x86b   : > { %3610 = vmatpush1.bf16.msra.mxu1 %v9050_v5  ;;  %3651 = vmatpush1.bf16.msra.mxu0 %v9052_v6  ;;  %v10277_v5 = vld [vmem:[#allocation11 + $0x1c0] ss:$8 sps:$4 sm:$0xff]   ;;  %v10282_v6 = vld [vmem:[#allocation11 + $0xd4] ss:$8 sps:$4 sm:$0xff]  }
 0x86c   : > { %3611 = vmatprep.subr.bf16.mxu1 %v9059_v54  ;;  %3652 = vmatprep.subr.bf16.mxu0 %v9061_v7  ;;  %v10285_v54 = vld [vmem:[#allocation11 + $0x1d4] ss:$8 sps:$4 sm:$0xff]   ;;  %v10280_v7 = vld [vmem:[#allocation11 + $0xd0] ss:$8 sps:$4 sm:$0xff]  }
 0x86f   : > { %3612 = vmatpush1.bf16.msra.mxu1 %v9058_v10  ;;  %3653 = vmatpush1.bf16.msra.mxu0 %v9060_v12  ;;  %v10283_v10 = vld [vmem:[#allocation11 + $0x1d0] ss:$8 sps:$4 sm:$0xff]   ;;  %v10288_v12 = vld [vmem:[#allocation11 + $0xe4] ss:$8 sps:$4 sm:$0xff]  }
 0x870   : > { %4330 = vmatprep.subr.bf16.mxu1 %v10204_v63  ;;  %4371 = vmatprep.subr.bf16.mxu0 %v10207_v13  ;;  %v10291_v63 = vld [vmem:[#allocation11 + $0x1e4] ss:$8 sps:$4 sm:$0xff]   ;;  %v10286_v13 = vld [vmem:[#allocation11 + $0xe0] ss:$8 sps:$4 sm:$0xff]  }
 0x872   : > { %3614 = vmatmul.mubr.bf16.vlgmr.msra.gmra.mrb[64].mxu1 %v11804_v53  ;;  %3655 = vmatmul.mubr.bf16.vlgmr.msra.gmra.mrb[24].mxu0 %v11804_v53  ;;  %v10223_v53 = vld [vmem:[#allocation11 + $0x130] ss:$8 sps:$4 sm:$0xff]  }
 0x873   : > { %4331 = vmatpush1.bf16.msra.mxu1 %v10202_v14  ;;  %4372 = vmatpush1.bf16.msra.mxu0 %v10205_v15  ;;  %v10289_v14 = vld [vmem:[#allocation11 + $0x1e0] ss:$8 sps:$4 sm:$0xff]   ;;  %v10294_v15 = vld [vmem:[#allocation11 + $0xf4] ss:$8 sps:$4 sm:$0xff]  }
 0x874   : > { %4332 = vmatprep.subr.bf16.mxu1 %v10210_v16  ;;  %4373 = vmatprep.subr.bf16.mxu0 %v10213_v18  ;;  %v10297_v16 = vld [vmem:[#allocation11 + $0x1f4] ss:$8 sps:$4 sm:$0xff]   ;;  %v10292_v18 = vld [vmem:[#allocation11 + $0xf0] ss:$8 sps:$4 sm:$0xff]  }
 0x877   : > { %4333 = vmatpush1.bf16.msra.mxu1 %v10208_v19  ;;  %4374 = vmatpush1.bf16.msra.mxu0 %v10211_v20  ;;  %v10295_v19 = vld [vmem:[#allocation11 + $0x1f0] ss:$8 sps:$4 sm:$0xff]   ;;  %v10300_v20 = vld [vmem:[#allocation11 + $0x204] ss:$8 sps:$4 sm:$0xff]  }
 0x878   : > { %4334 = vmatprep.subr.bf16.mxu1 %v10216_v21  ;;  %4375 = vmatprep.subr.bf16.mxu0 %v10219_v22  ;;  %v10303_v21 = vld [vmem:[#allocation11 + $0x304] ss:$8 sps:$4 sm:$0xff]   ;;  %v2829_v22 = vsub.s32 2, %v11617_v8 }
 0x87b   : > { %4335 = vmatpush1.bf16.msra.mxu1 %v10214_v24  ;;  %4376 = vmatpush1.bf16.msra.mxu0 %v10217_v25  ;;  %v11814_v24 = vld [vmem:[%s12264_s0] sm:$0xff]  ;;  %v2833_v25 = vsub.s32 3, %v11617_v8 }
 0x87c   : > { %4336 = vmatprep.subr.bf16.mxu1 %v10222_v26  ;;  %4377 = vmatprep.subr.bf16.mxu0 %v10225_v27  ;;  %v2822_v26 = vrot.slane %v11814_v24, %v11620_v9  ;;  %v2830_v27 = vrot.slane %v11814_v24, %v2829_v22 }
 0x87f   : > { %4337 = vmatpush1.bf16.msra.mxu1 %v10220_v28  ;;  %4378 = vmatpush1.bf16.msra.mxu0 %v10223_v53  ;;  %v2826_v28 = vrot.slane %v11814_v24, %v11762_v3  ;;  %v2834_v53 = vrot.slane %v11814_v24, %v2833_v25 }
 0x880   : > { %4338 = vmatprep.subr.bf16.mxu1 %v10228_v29  ;;  %4379 = vmatprep.subr.bf16.mxu0 %v10231_v30 }
 0x883   : > { %4339 = vmatpush1.bf16.msra.mxu1 %v10226_v32  ;;  %4380 = vmatpush1.bf16.msra.mxu0 %v10229_v33 }
 0x884   : > { %4340 = vmatprep.subr.bf16.mxu1 %v10234_v34  ;;  %4381 = vmatprep.subr.bf16.mxu0 %v10237_v35 }
 0x887   : > { %4341 = vmatpush1.bf16.msra.mxu1 %v10232_v23  ;;  %4382 = vmatpush1.bf16.msra.mxu0 %v10235_v36 }
 0x888   : > { %4342 = vmatprep.subr.bf16.mxu1 %v10240_v31  ;;  %4383 = vmatprep.subr.bf16.mxu0 %v10243_v37 }
 0x88b   : > { %4343 = vmatpush1.bf16.msra.mxu1 %v10238_v39  ;;  %4384 = vmatpush1.bf16.msra.mxu0 %v10241_v38 }
 0x88c   : > { %4344 = vmatprep.subr.bf16.mxu1 %v10246_v41  ;;  %4385 = vmatprep.subr.bf16.mxu0 %v10249_v42 }
 0x88f   : > { %4345 = vmatpush1.bf16.msra.mxu1 %v10244_v43  ;;  %4386 = vmatpush1.bf16.msra.mxu0 %v10247_v44 }
 0x890   : > { %4346 = vmatprep.subr.bf16.mxu1 %v10252_v46  ;;  %4387 = vmatprep.subr.bf16.mxu0 %v10255_v45 }
 0x893   : > { %4347 = vmatpush1.bf16.msra.mxu1 %v10250_v47  ;;  %4388 = vmatpush1.bf16.msra.mxu0 %v10253_v48  ;;  %v10298_v47 = vld [vmem:[#allocation11 + $0x200] ss:$8 sps:$4 sm:$0xff]  }
 0x894   : > { %4348 = vmatprep.subr.bf16.mxu1 %v10258_v49  ;;  %4389 = vmatprep.subr.bf16.mxu0 %v10261_v50  ;;  %v10301_v48 = vld [vmem:[#allocation11 + $0x300] ss:$8 sps:$4 sm:$0xff]  }
 0x897   : > { %4349 = vmatpush1.bf16.msra.mxu1 %v10256_v51  ;;  %4390 = vmatpush1.bf16.msra.mxu0 %v10259_v52  ;;  %v10306_v51 = vld [vmem:[#allocation11 + $0x214] ss:$8 sps:$4 sm:$0xff]  }
 0x898   : > { %4350 = vmatprep.subr.bf16.mxu1 %v10264_v55  ;;  %4391 = vmatprep.subr.bf16.mxu0 %v10267_v56  ;;  %v10309_v52 = vld [vmem:[#allocation11 + $0x314] ss:$8 sps:$4 sm:$0xff]   ;;  %v10304_v55 = vld [vmem:[#allocation11 + $0x210] ss:$8 sps:$4 sm:$0xff]  }
 0x899   : > { %v10307_v56 = vld [vmem:[#allocation11 + $0x310] ss:$8 sps:$4 sm:$0xff]  }
 0x89b   : > { %4351 = vmatpush1.bf16.msra.mxu1 %v10262_v57  ;;  %4392 = vmatpush1.bf16.msra.mxu0 %v10265_v58  ;;  %v10312_v57 = vld [vmem:[#allocation11 + $0x224] ss:$8 sps:$4 sm:$0xff]  }
 0x89c   : > { %4352 = vmatprep.subr.bf16.mxu1 %v10270_v59  ;;  %4393 = vmatprep.subr.bf16.mxu0 %v10273_v60  ;;  %v10315_v58 = vld [vmem:[#allocation11 + $0x324] ss:$8 sps:$4 sm:$0xff]   ;;  %v10310_v59 = vld [vmem:[#allocation11 + $0x220] ss:$8 sps:$4 sm:$0xff]  }
 0x89d   : > { %v10313_v60 = vld [vmem:[#allocation11 + $0x320] ss:$8 sps:$4 sm:$0xff]  }
 0x89f   : > { %4353 = vmatpush1.bf16.msra.mxu1 %v10268_v61  ;;  %4394 = vmatpush1.bf16.msra.mxu0 %v10271_v0  ;;  %v10318_v61 = vld [vmem:[#allocation11 + $0x234] ss:$8 sps:$4 sm:$0xff]  }
 0x8a0   : > { %4354 = vmatprep.subr.bf16.mxu1 %v10276_v62  ;;  %4395 = vmatprep.subr.bf16.mxu0 %v10279_v17  ;;  %v10321_v0 = vld [vmem:[#allocation11 + $0x334] ss:$8 sps:$4 sm:$0xff]   ;;  %v10316_v62 = vld [vmem:[#allocation11 + $0x230] ss:$8 sps:$4 sm:$0xff]  }
 0x8a1   : > { %v10319_v17 = vld [vmem:[#allocation11 + $0x330] ss:$8 sps:$4 sm:$0xff]  }
 0x8a3   : > { %4355 = vmatpush1.bf16.msra.mxu1 %v10274_v40  ;;  %4396 = vmatpush1.bf16.msra.mxu0 %v10277_v5  ;;  %v10324_v40 = vld [vmem:[#allocation11 + $0x244] ss:$8 sps:$4 sm:$0xff]  }
 0x8a4   : > { %4356 = vmatprep.subr.bf16.mxu1 %v10282_v6  ;;  %4397 = vmatprep.subr.bf16.mxu0 %v10285_v54  ;;  %v10327_v5 = vld [vmem:[#allocation11 + $0x344] ss:$8 sps:$4 sm:$0xff]   ;;  %v10322_v6 = vld [vmem:[#allocation11 + $0x240] ss:$8 sps:$4 sm:$0xff]  }
 0x8a5   : > { %v10325_v54 = vld [vmem:[#allocation11 + $0x340] ss:$8 sps:$4 sm:$0xff]  }
 0x8a7   : > { %4357 = vmatpush1.bf16.msra.mxu1 %v10280_v7  ;;  %4398 = vmatpush1.bf16.msra.mxu0 %v10283_v10  ;;  %v10330_v7 = vld [vmem:[#allocation11 + $0x254] ss:$8 sps:$4 sm:$0xff]  }
 0x8a8   : > { %4358 = vmatprep.subr.bf16.mxu1 %v10288_v12  ;;  %4399 = vmatprep.subr.bf16.mxu0 %v10291_v63  ;;  %v10333_v10 = vld [vmem:[#allocation11 + $0x354] ss:$8 sps:$4 sm:$0xff]   ;;  %v10328_v12 = vld [vmem:[#allocation11 + $0x250] ss:$8 sps:$4 sm:$0xff]  }
 0x8a9   : > { %v10331_v63 = vld [vmem:[#allocation11 + $0x350] ss:$8 sps:$4 sm:$0xff]  }
 0x8ab   : > { %4359 = vmatpush1.bf16.msra.mxu1 %v10286_v13  ;;  %4400 = vmatpush1.bf16.msra.mxu0 %v10289_v14  ;;  %v10336_v13 = vld [vmem:[#allocation11 + $0x264] ss:$8 sps:$4 sm:$0xff]  }
 0x8ac   : > { %4360 = vmatprep.subr.bf16.mxu1 %v10294_v15  ;;  %4401 = vmatprep.subr.bf16.mxu0 %v10297_v16  ;;  %v10339_v14 = vld [vmem:[#allocation11 + $0x364] ss:$8 sps:$4 sm:$0xff]   ;;  %v10334_v15 = vld [vmem:[#allocation11 + $0x260] ss:$8 sps:$4 sm:$0xff]  }
 0x8ad   : > { %v10337_v16 = vld [vmem:[#allocation11 + $0x360] ss:$8 sps:$4 sm:$0xff]  }
 0x8af   : > { %4361 = vmatpush1.bf16.msra.mxu1 %v10292_v18  ;;  %4402 = vmatpush1.bf16.msra.mxu0 %v10295_v19  ;;  %v10342_v18 = vld [vmem:[#allocation11 + $0x274] ss:$8 sps:$4 sm:$0xff]  }
 0x8b0   : > { %4412 = vmatprep.subr.bf16.mxu1 %v10300_v20  ;;  %4453 = vmatprep.subr.bf16.mxu0 %v10303_v21  ;;  %v10345_v19 = vld [vmem:[#allocation11 + $0x374] ss:$8 sps:$4 sm:$0xff]   ;;  %v10340_v20 = vld [vmem:[#allocation11 + $0x270] ss:$8 sps:$4 sm:$0xff]  }
 0x8b1   : > { %v10343_v21 = vld [vmem:[#allocation11 + $0x370] ss:$8 sps:$4 sm:$0xff]  }
 0x905   : > { %v3533_v29 = vpop.f32.mrb[60].mxu1  ;;  %v3574_v30 = vpop.f32.mrb[20].mxu0 }
 0x906   : > { %v3534_v32 = vadd.f32 %v3533_v29, %v2822_v26  ;;  %v3575_v33 = vadd.f32 %v3574_v30, %v2830_v27  ;;  %v3535_v34 = vpop.f32.mrb[61].mxu1  ;;  %v3576_v35 = vpop.f32.mrb[21].mxu0  ;;  %v10348_v26 = vld [vmem:[#allocation11 + $0x284] ss:$8 sps:$4 sm:$0xff]   ;;  %v10354_v29 = vld [vmem:[#allocation11 + $0x294] ss:$8 sps:$4 sm:$0xff]  }
 0x907   : > { %v3536_v23 = vadd.f32 %v3535_v34, %v2826_v28  ;;  %v3577_v36 = vadd.f32 %v3576_v35, %v2834_v53  ;;  %v3537_v31 = vpop.f32.mrb[62].mxu1  ;;  %v3578_v37 = vpop.f32.mrb[22].mxu0  ;;  %v10351_v27 = vld [vmem:[#allocation11 + $0x384] ss:$8 sps:$4 sm:$0xff]   ;;  %v10346_v28 = vld [vmem:[#allocation11 + $0x280] ss:$8 sps:$4 sm:$0xff]  }
 0x908   : > { %v3663_v39 = vmax.f32 %v3534_v32, 0.0  ;;  %v3665_v38 = vmax.f32 %v3575_v33, 0.0  ;;  %v3538_v41 = vpop.f32.mrb[63].mxu1  ;;  %v3579_v42 = vpop.f32.mrb[23].mxu0  ;;  %v10349_v53 = vld [vmem:[#allocation11 + $0x380] ss:$8 sps:$4 sm:$0xff]  }
 0x909   : > { %v3664_v43 = vmax.f32 %v3536_v23, 0.0  ;;  %v3666_v44 = vmax.f32 %v3577_v36, 0.0  ;;  %v10357_v30 = vld [vmem:[#allocation11 + $0x394] ss:$8 sps:$4 sm:$0xff]   ;;  %v10352_v32 = vld [vmem:[#allocation11 + $0x290] ss:$8 sps:$4 sm:$0xff]  }
 0x90a   : > { %v3671_v49 = vpack.c.bf16 %v3663_v39, %v3663_v39  ;;  %v3673_v50 = vpack.c.bf16 %v3665_v38, %v3665_v38  ;;  %v10355_v33 = vld [vmem:[#allocation11 + $0x390] ss:$8 sps:$4 sm:$0xff]   ;;  %v10360_v34 = vld [vmem:[#allocation11 + $0x2a4] ss:$8 sps:$4 sm:$0xff]   ;;  %v10358_v23 = vld [vmem:[#allocation11 + $0x2a0] ss:$8 sps:$4 sm:$0xff]  }
 0x90b   : > { %v3672_v46 = vpack.c.bf16 %v3664_v43, %v3664_v43  ;;  %v3674_v45 = vpack.c.bf16 %v3666_v44, %v3666_v44  ;;  %v10363_v35 = vld [vmem:[#allocation11 + $0x3a4] ss:$8 sps:$4 sm:$0xff]   ;;  %v10361_v36 = vld [vmem:[#allocation11 + $0x3a0] ss:$8 sps:$4 sm:$0xff]   ;;  %v10366_v31 = vld [vmem:[#allocation11 + $0x2b4] ss:$8 sps:$4 sm:$0xff]  }
 0x90c   : > { %v10369_v37 = vld [vmem:[#allocation11 + $0x3b4] ss:$8 sps:$4 sm:$0xff]   ;;  %v10364_v39 = vld [vmem:[#allocation11 + $0x2b0] ss:$8 sps:$4 sm:$0xff]   ;;  %v10372_v41 = vld [vmem:[#allocation11 + $0x2c4] ss:$8 sps:$4 sm:$0xff]  }
 0x90d   : > { %4362 = vmatprep.mubr.bf16.mxu1 %v3672_v46  ;;  %4403 = vmatprep.mubr.bf16.mxu0 %v3674_v45  ;;  %v10367_v38 = vld [vmem:[#allocation11 + $0x3b0] ss:$8 sps:$4 sm:$0xff]   ;;  %v10375_v42 = vld [vmem:[#allocation11 + $0x3c4] ss:$8 sps:$4 sm:$0xff]   ;;  %v10370_v43 = vld [vmem:[#allocation11 + $0x2c0] ss:$8 sps:$4 sm:$0xff]  }
 0x90e   : > { %4363 = vmatmul.mubr.bf16.vlgmr.msra.gmra.mrb[68].mxu1 %v3671_v49  ;;  %4404 = vmatmul.mubr.bf16.vlgmr.msra.gmra.mrb[28].mxu0 %v3673_v50  ;;  %v10373_v44 = vld [vmem:[#allocation11 + $0x3c0] ss:$8 sps:$4 sm:$0xff]   ;;  %v10378_v46 = vld [vmem:[#allocation11 + $0x2d4] ss:$8 sps:$4 sm:$0xff]   ;;  %v10376_v49 = vld [vmem:[#allocation11 + $0x2d0] ss:$8 sps:$4 sm:$0xff]  }
 0x90f   : > { %4413 = vmatpush1.bf16.msra.mxu1 %v10298_v47  ;;  %4454 = vmatpush1.bf16.msra.mxu0 %v10301_v48  ;;  %v10381_v45 = vld [vmem:[#allocation11 + $0x3d4] ss:$8 sps:$4 sm:$0xff]   ;;  %v2837_v47 = vsub.s32 4, %v11617_v8  ;;  %v2845_v48 = vsub.s32 6, %v11617_v8  ;;  %v10379_v50 = vld [vmem:[#allocation11 + $0x3d0] ss:$8 sps:$4 sm:$0xff]  }
 0x910   : > { %4414 = vmatprep.subr.bf16.mxu1 %v10306_v51  ;;  %4455 = vmatprep.subr.bf16.mxu0 %v10309_v52  ;;  %v2841_v51 = vsub.s32 5, %v11617_v8  ;;  %v2849_v52 = vsub.s32 7, %v11617_v8  ;;  %v10772_v8 = vld [vmem:[#allocation11 + $0x6f0] ss:$8 sps:$4 sm:$0xff]  }
 0x913   : > { %4415 = vmatpush1.bf16.msra.mxu1 %v10304_v55  ;;  %4456 = vmatpush1.bf16.msra.mxu0 %v10307_v56  ;;  %v10384_v55 = vld [vmem:[#allocation11 + $0x2e4] ss:$8 sps:$4 sm:$0xff]  }
 0x914   : > { %4416 = vmatprep.subr.bf16.mxu1 %v10312_v57  ;;  %4457 = vmatprep.subr.bf16.mxu0 %v10315_v58  ;;  %v10387_v56 = vld [vmem:[#allocation11 + $0x3e4] ss:$8 sps:$4 sm:$0xff]   ;;  %v2838_v57 = vrot.slane %v11814_v24, %v2837_v47  ;;  %v2846_v58 = vrot.slane %v11814_v24, %v2845_v48 }
 0x917   : > { %4417 = vmatpush1.bf16.msra.mxu1 %v10310_v59  ;;  %4458 = vmatpush1.bf16.msra.mxu0 %v10313_v60  ;;  %v2842_v59 = vrot.slane %v11814_v24, %v2841_v51  ;;  %v2850_v60 = vrot.slane %v11814_v24, %v2849_v52  ;;  %v10391_v24 = vld [vmem:[#allocation11 + $0x3f0] ss:$8 sps:$4 sm:$0xff]  }
 0x918   : > { %4418 = vmatprep.subr.bf16.mxu1 %v10318_v61  ;;  %4459 = vmatprep.subr.bf16.mxu0 %v10321_v0  ;;  %v10382_v61 = vld [vmem:[#allocation11 + $0x2e0] ss:$8 sps:$4 sm:$0xff]  }
 0x919   : > { %v10385_v0 = vld [vmem:[#allocation11 + $0x3e0] ss:$8 sps:$4 sm:$0xff]  }
 0x91b   : > { %4419 = vmatpush1.bf16.msra.mxu1 %v10316_v62  ;;  %4460 = vmatpush1.bf16.msra.mxu0 %v10319_v17  ;;  %v10390_v62 = vld [vmem:[#allocation11 + $0x2f4] ss:$8 sps:$4 sm:$0xff]  }
 0x91c   : > { %4420 = vmatprep.subr.bf16.mxu1 %v10324_v40  ;;  %4461 = vmatprep.subr.bf16.mxu0 %v10327_v5  ;;  %v10393_v17 = vld [vmem:[#allocation11 + $0x3f4] ss:$8 sps:$4 sm:$0xff]  }
 0x91f   : > { %4421 = vmatpush1.bf16.msra.mxu1 %v10322_v6  ;;  %4462 = vmatpush1.bf16.msra.mxu0 %v10325_v54 }
 0x920   : > { %4422 = vmatprep.subr.bf16.mxu1 %v10330_v7  ;;  %4463 = vmatprep.subr.bf16.mxu0 %v10333_v10 }
 0x923   : > { %4423 = vmatpush1.bf16.msra.mxu1 %v10328_v12  ;;  %4464 = vmatpush1.bf16.msra.mxu0 %v10331_v63 }
 0x924   : > { %4424 = vmatprep.subr.bf16.mxu1 %v10336_v13  ;;  %4465 = vmatprep.subr.bf16.mxu0 %v10339_v14 }
 0x927   : > { %4425 = vmatpush1.bf16.msra.mxu1 %v10334_v15  ;;  %4466 = vmatpush1.bf16.msra.mxu0 %v10337_v16  ;;  %v10388_v15 = vld [vmem:[#allocation11 + $0x2f0] ss:$8 sps:$4 sm:$0xff]  }
 0x928   : > { %4426 = vmatprep.subr.bf16.mxu1 %v10342_v18  ;;  %4467 = vmatprep.subr.bf16.mxu0 %v10345_v19 }
 0x92b   : > { %4427 = vmatpush1.bf16.msra.mxu1 %v10340_v20  ;;  %4468 = vmatpush1.bf16.msra.mxu0 %v10343_v21 }
 0x92c   : > { %4428 = vmatprep.subr.bf16.mxu1 %v10348_v26  ;;  %4469 = vmatprep.subr.bf16.mxu0 %v10351_v27 }
 0x92f   : > { %4429 = vmatpush1.bf16.msra.mxu1 %v10346_v28  ;;  %4470 = vmatpush1.bf16.msra.mxu0 %v10349_v53 }
 0x930   : > { %4430 = vmatprep.subr.bf16.mxu1 %v10354_v29  ;;  %4471 = vmatprep.subr.bf16.mxu0 %v10357_v30  ;;  %v1010_v30 = vld [vmem:[%s12265_s2] sm:$0x3] }
 0x933   : > { %4431 = vmatpush1.bf16.msra.mxu1 %v10352_v32  ;;  %4472 = vmatpush1.bf16.msra.mxu0 %v10355_v33  ;;  %v3683_v32 = vrot.slane %v1010_v30, %v11620_v9  ;;  %v3687_v33 = vrot.slane %v1010_v30, %v11762_v3  ;;  %v10427_v30 = vld [vmem:[#allocation7 + $0x3f8] ss:$24 sps:$4 sm:$0xff]  }
 0x934   : > { %4432 = vmatprep.subr.bf16.mxu1 %v10360_v34  ;;  %4473 = vmatprep.subr.bf16.mxu0 %v10363_v35 }
 0x937   : > { %4433 = vmatpush1.bf16.msra.mxu1 %v10358_v23  ;;  %4474 = vmatpush1.bf16.msra.mxu0 %v10361_v36 }
 0x938   : > { %4434 = vmatprep.subr.bf16.mxu1 %v10366_v31  ;;  %4475 = vmatprep.subr.bf16.mxu0 %v10369_v37 }
 0x93b   : > { %4435 = vmatpush1.bf16.msra.mxu1 %v10364_v39  ;;  %4476 = vmatpush1.bf16.msra.mxu0 %v10367_v38 }
 0x93c   : > { %4436 = vmatprep.subr.bf16.mxu1 %v10372_v41  ;;  %4477 = vmatprep.subr.bf16.mxu0 %v10375_v42 }
 0x93f   : > { %4437 = vmatpush1.bf16.msra.mxu1 %v10370_v43  ;;  %4478 = vmatpush1.bf16.msra.mxu0 %v10373_v44 }
 0x940   : > { %4438 = vmatprep.subr.bf16.mxu1 %v10378_v46  ;;  %4479 = vmatprep.subr.bf16.mxu0 %v10381_v45 }
 0x943   : > { %4439 = vmatpush1.bf16.msra.mxu1 %v10376_v49  ;;  %4480 = vmatpush1.bf16.msra.mxu0 %v10379_v50 }
 0x944   : > { %4440 = vmatprep.subr.bf16.mxu1 %v10384_v55  ;;  %4481 = vmatprep.subr.bf16.mxu0 %v10387_v56 }
 0x945   : > { %v3615_v40 = vpop.f32.mrb[64].mxu1  ;;  %v3656_v5 = vpop.f32.mrb[24].mxu0 }
 0x946   : > { %v3616_v6 = vadd.f32 %v3615_v40, %v2838_v57  ;;  %v3657_v54 = vadd.f32 %v3656_v5, %v2846_v58  ;;  %v3617_v7 = vpop.f32.mrb[65].mxu1  ;;  %v3658_v10 = vpop.f32.mrb[25].mxu0  ;;  %v10394_v5 = vld [vmem:[#allocation7 + $0x300] ss:$24 sps:$4 sm:$0xff]  }
 0x947   : > { %v3618_v12 = vadd.f32 %v3617_v7, %v2842_v59  ;;  %v3659_v63 = vadd.f32 %v3658_v10, %v2850_v60  ;;  %v3619_v13 = vpop.f32.mrb[66].mxu1  ;;  %v3660_v14 = vpop.f32.mrb[26].mxu0  ;;  %4441 = vmatpush1.bf16.msra.mxu1 %v10382_v61  ;;  %4482 = vmatpush1.bf16.msra.mxu0 %v10385_v0  ;;  %v10399_v7 = vld [vmem:[#allocation7 + $0x30c] ss:$24 sps:$4 sm:$0xff]  }
 0x948   : > { %v3667_v16 = vmax.f32 %v3616_v6, 0.0  ;;  %v3669_v18 = vmax.f32 %v3657_v54, 0.0  ;;  %v3620_v19 = vpop.f32.mrb[67].mxu1  ;;  %v3661_v20 = vpop.f32.mrb[27].mxu0  ;;  %4442 = vmatprep.subr.bf16.mxu1 %v10390_v62  ;;  %4483 = vmatprep.subr.bf16.mxu0 %v10393_v17  ;;  %v10396_v6 = vld [vmem:[#allocation7 + $0x304] ss:$24 sps:$4 sm:$0xff]  }
 0x949   : > { %v3668_v21 = vmax.f32 %v3618_v12, 0.0  ;;  %v3670_v26 = vmax.f32 %v3659_v63, 0.0  ;;  %v10397_v54 = vld [vmem:[#allocation7 + $0x308] ss:$24 sps:$4 sm:$0xff]   ;;  %v10402_v10 = vld [vmem:[#allocation7 + $0x334] ss:$24 sps:$4 sm:$0xff]  }
 0x94a   : > { %v3675_v53 = vpack.c.bf16 %v3667_v16, %v3667_v16  ;;  %v3677_v29 = vpack.c.bf16 %v3669_v18, %v3669_v18  ;;  %v10405_v12 = vld [vmem:[#allocation7 + $0x33c] ss:$24 sps:$4 sm:$0xff]   ;;  %v10400_v63 = vld [vmem:[#allocation7 + $0x330] ss:$24 sps:$4 sm:$0xff]   ;;  %v10406_v14 = vld [vmem:[#allocation7 + $0x360] ss:$24 sps:$4 sm:$0xff]  }
 0x94b   : > { %v3676_v27 = vpack.c.bf16 %v3668_v21, %v3668_v21  ;;  %v3678_v28 = vpack.c.bf16 %v3670_v26, %v3670_v26  ;;  %4443 = vmatpush1.bf16.msra.mxu1 %v10388_v15  ;;  %4484 = vmatpush1.bf16.msra.mxu0 %v10391_v24  ;;  %v10408_v13 = vld [vmem:[#allocation7 + $0x364] ss:$24 sps:$4 sm:$0xff]   ;;  %v10409_v15 = vld [vmem:[#allocation7 + $0x368] ss:$24 sps:$4 sm:$0xff]   ;;  %v10414_v24 = vld [vmem:[#allocation7 + $0x394] ss:$24 sps:$4 sm:$0xff]  }
 0x94c   : > { %5422 = vmatprep.subr.bf16.mxu1 %v10396_v6  ;;  %5463 = vmatprep.subr.bf16.mxu0 %v10399_v7  ;;  %v10417_v16 = vld [vmem:[#allocation7 + $0x39c] ss:$24 sps:$4 sm:$0xff]   ;;  %v10412_v18 = vld [vmem:[#allocation7 + $0x390] ss:$24 sps:$4 sm:$0xff]   ;;  %v10423_v21 = vld [vmem:[#allocation7 + $0x3cc] ss:$24 sps:$4 sm:$0xff]  }
 0x94d   : > { %4444 = vmatprep.mubr.bf16.mxu1 %v3676_v27  ;;  %4485 = vmatprep.mubr.bf16.mxu0 %v3678_v28  ;;  %v10415_v19 = vld [vmem:[#allocation7 + $0x398] ss:$24 sps:$4 sm:$0xff]   ;;  %v10420_v20 = vld [vmem:[#allocation7 + $0x3c4] ss:$24 sps:$4 sm:$0xff]   ;;  %v10421_v27 = vld [vmem:[#allocation7 + $0x3c8] ss:$24 sps:$4 sm:$0xff]  }
 0x94e   : > { %4445 = vmatmul.mubr.bf16.vlgmr.msra.gmra.mrb[72].mxu1 %v3675_v53  ;;  %4486 = vmatmul.mubr.bf16.vlgmr.msra.gmra.mrb[32].mxu0 %v3677_v29  ;;  %v10418_v26 = vld [vmem:[#allocation7 + $0x3c0] ss:$24 sps:$4 sm:$0xff]   ;;  %v10426_v28 = vld [vmem:[#allocation7 + $0x3f4] ss:$24 sps:$4 sm:$0xff]   ;;  %v10424_v29 = vld [vmem:[#allocation7 + $0x3f0] ss:$24 sps:$4 sm:$0xff]  }
 0x94f   : > { %5423 = vmatpush1.bf16.msra.mxu1 %v10394_v5  ;;  %5464 = vmatpush1.bf16.msra.mxu0 %v10397_v54  ;;  %v10429_v53 = vld [vmem:[#allocation7 + $0x3fc] ss:$24 sps:$4 sm:$0xff]   ;;  %v10460_v6 = vld [vmem:[#allocation7 + $0x510] ss:$24 sps:$4 sm:$0xff]  }
 0x950   : > { %5424 = vmatprep.subr.bf16.mxu1 %v10402_v10  ;;  %5465 = vmatprep.subr.bf16.mxu0 %v10405_v12  ;;  %v10462_v5 = vld [vmem:[#allocation7 + $0x514] ss:$24 sps:$4 sm:$0xff]   ;;  %v10463_v7 = vld [vmem:[#allocation7 + $0x518] ss:$24 sps:$4 sm:$0xff]   ;;  %v10468_v10 = vld [vmem:[#allocation7 + $0x544] ss:$24 sps:$4 sm:$0xff]  }
 0x951   : > { %v10465_v54 = vld [vmem:[#allocation7 + $0x51c] ss:$24 sps:$4 sm:$0xff]   ;;  %v10471_v12 = vld [vmem:[#allocation7 + $0x54c] ss:$24 sps:$4 sm:$0xff]  }
 0x953   : > { %5425 = vmatpush1.bf16.msra.mxu1 %v10400_v63  ;;  %v10474_v63 = vld [vmem:[#allocation7 + $0x574] ss:$24 sps:$4 sm:$0xff]  }
 0x954   : > { %5426 = vmatprep.subr.bf16.mxu1 %v10408_v13  ;;  %v10477_v13 = vld [vmem:[#allocation7 + $0x57c] ss:$24 sps:$4 sm:$0xff]  }
 0x957   : > { %5427 = vmatpush1.bf16.msra.mxu1 %v10406_v14  ;;  %v10480_v14 = vld [vmem:[#allocation7 + $0x5a4] ss:$24 sps:$4 sm:$0xff]  }
 0x958   : > { %5428 = vmatprep.subr.bf16.mxu1 %v10414_v24  ;;  %v10483_v24 = vld [vmem:[#allocation7 + $0x5ac] ss:$24 sps:$4 sm:$0xff]  }
 0x95b   : > { %5429 = vmatpush1.bf16.msra.mxu1 %v10412_v18  ;;  %v10486_v18 = vld [vmem:[#allocation7 + $0x5d4] ss:$24 sps:$4 sm:$0xff]  }
 0x95c   : > { %5430 = vmatprep.subr.bf16.mxu1 %v10420_v20  ;;  %v10489_v20 = vld [vmem:[#allocation7 + $0x5dc] ss:$24 sps:$4 sm:$0xff]  }
 0x95f   : > { %5431 = vmatpush1.bf16.msra.mxu1 %v10418_v26  ;;  %v10492_v26 = vld [vmem:[#allocation7 + $0x314] ss:$24 sps:$4 sm:$0xff]  }
 0x960   : > { %5432 = vmatprep.subr.bf16.mxu1 %v10426_v28 }
 0x963   : > { %5433 = vmatpush1.bf16.msra.mxu1 %v10424_v29  ;;  %v1011_v29 = vld [vmem:[%s12266_s6] sm:$0x3] }
 0x9e1   : > { %v4364_v34 = vpop.f32.mrb[68].mxu1  ;;  %v4405_v35 = vpop.f32.mrb[28].mxu0 }
 0x9e2   : > { %v4365_v23 = vadd.f32 %v4364_v34, %v3683_v32  ;;  %v4366_v36 = vpop.f32.mrb[69].mxu1  ;;  %v4407_v31 = vpop.f32.mrb[29].mxu0  ;;  %v10432_v32 = vld [vmem:[#allocation7 + $0x424] ss:$24 sps:$4 sm:$0xff]   ;;  %v10430_v34 = vld [vmem:[#allocation7 + $0x420] ss:$24 sps:$4 sm:$0xff]  }
 0x9e3   : > { %v4367_v37 = vadd.f32 %v4366_v36, %v3687_v33  ;;  %v4368_v39 = vpop.f32.mrb[70].mxu1  ;;  %v4409_v38 = vpop.f32.mrb[30].mxu0  ;;  %v10435_v33 = vld [vmem:[#allocation7 + $0x42c] ss:$24 sps:$4 sm:$0xff]   ;;  %5434 = vmatprep.subr.bf16.mxu1 %v10432_v32  ;;  %v10441_v36 = vld [vmem:[#allocation7 + $0x45c] ss:$24 sps:$4 sm:$0xff]   ;;  %v4516_v32 = vrot.slane %v1011_v29, %v11620_v9 }
 0x9e4   : > { %v4406_v41 = vadd.f32 %v4405_v35, %v4365_v23  ;;  %v4369_v42 = vpop.f32.mrb[71].mxu1  ;;  %v4410_v43 = vpop.f32.mrb[31].mxu0  ;;  %v10433_v35 = vld [vmem:[#allocation7 + $0x428] ss:$24 sps:$4 sm:$0xff]   ;;  %v10438_v23 = vld [vmem:[#allocation7 + $0x454] ss:$24 sps:$4 sm:$0xff]   ;;  %5435 = vmatpush1.bf16.msra.mxu1 %v10430_v34 }
 0x9e5   : > { %v4408_v44 = vadd.f32 %v4407_v31, %v4367_v37  ;;  %v10436_v31 = vld [vmem:[#allocation7 + $0x450] ss:$24 sps:$4 sm:$0xff]   ;;  %5436 = vmatprep.subr.bf16.mxu1 %v10438_v23  ;;  %v10444_v39 = vld [vmem:[#allocation7 + $0x484] ss:$24 sps:$4 sm:$0xff]   ;;  %v10450_v43 = vld [vmem:[#allocation7 + $0x4b4] ss:$24 sps:$4 sm:$0xff]  }
 0x9e6   : > { %v10439_v37 = vld [vmem:[#allocation7 + $0x458] ss:$24 sps:$4 sm:$0xff]   ;;  %v10447_v38 = vld [vmem:[#allocation7 + $0x48c] ss:$24 sps:$4 sm:$0xff]   ;;  %v10445_v42 = vld [vmem:[#allocation7 + $0x488] ss:$24 sps:$4 sm:$0xff]  }
 0x9e8   : > { %5437 = vmatpush1.bf16.msra.mxu1 %v10436_v31 }
 0x9e9   : > { %5438 = vmatprep.subr.bf16.mxu1 %v10444_v39 }
 0xa21   : > { %v4446_v46 = vpop.f32.mrb[72].mxu1  ;;  %v4487_v45 = vpop.f32.mrb[32].mxu0 }
 0xa22   : > { %v4447_v49 = vadd.f32 %v4446_v46, %v4406_v41  ;;  %v4448_v50 = vpop.f32.mrb[73].mxu1  ;;  %v4489_v55 = vpop.f32.mrb[33].mxu0  ;;  %v10442_v41 = vld [vmem:[#allocation7 + $0x480] ss:$24 sps:$4 sm:$0xff]   ;;  %v10448_v46 = vld [vmem:[#allocation7 + $0x4b0] ss:$24 sps:$4 sm:$0xff]  }
 0xa23   : > { %v4449_v56 = vadd.f32 %v4448_v50, %v4408_v44  ;;  %v4450_v57 = vpop.f32.mrb[74].mxu1  ;;  %v4491_v58 = vpop.f32.mrb[34].mxu0  ;;  %v10453_v44 = vld [vmem:[#allocation7 + $0x4bc] ss:$24 sps:$4 sm:$0xff]   ;;  %5439 = vmatpush1.bf16.msra.mxu1 %v10442_v41  ;;  %v10454_v50 = vld [vmem:[#allocation7 + $0x4e0] ss:$24 sps:$4 sm:$0xff]  }
 0xa24   : > { %v4488_v59 = vadd.f32 %v4487_v45, %v4447_v49  ;;  %v4451_v60 = vpop.f32.mrb[75].mxu1  ;;  %v4492_v61 = vpop.f32.mrb[35].mxu0  ;;  %5440 = vmatprep.subr.bf16.mxu1 %v10450_v43  ;;  %v10451_v45 = vld [vmem:[#allocation7 + $0x4b8] ss:$24 sps:$4 sm:$0xff]   ;;  %v10456_v49 = vld [vmem:[#allocation7 + $0x4e4] ss:$24 sps:$4 sm:$0xff]  }
 0xa25   : > { %v4490_v0 = vadd.f32 %v4489_v55, %v4449_v56  ;;  %v10490_v43 = vld [vmem:[#allocation7 + $0x310] ss:$24 sps:$4 sm:$0xff]  }
 0xa26   : > { %v11849_v62 = vadd.f32 %v4488_v59, %v11798_v2  ;;  %v10403_v2 = vld [vmem:[#allocation7 + $0x338] ss:$24 sps:$4 sm:$0xff]  }
 0xa27   : > { %v11852_v17 = vadd.f32 %v4490_v0, %v11796_v1  ;;  %v10411_v1 = vld [vmem:[#allocation7 + $0x36c] ss:$24 sps:$4 sm:$0xff]   ;;  %5466 = vmatpush1.bf16.msra.mxu0 %v10403_v2  ;;  %5441 = vmatpush1.bf16.msra.mxu1 %v10448_v46  ;;  %v10472_v2 = vld [vmem:[#allocation7 + $0x570] ss:$24 sps:$4 sm:$0xff]  }
 0xa28   : > { %5467 = vmatprep.subr.bf16.mxu0 %v10411_v1  ;;  %5442 = vmatprep.subr.bf16.mxu1 %v10456_v49  ;;  %v10459_v0 = vld [vmem:[#allocation7 + $0x4ec] ss:$24 sps:$4 sm:$0xff]   ;;  %v10475_v1 = vld [vmem:[#allocation7 + $0x578] ss:$24 sps:$4 sm:$0xff]  }
 0xa29   : > { %v4496_v40 = vadd.f32 %v11852_v17, %v11849_v62  ;;  %v10495_v46 = vld [vmem:[#allocation7 + $0x344] ss:$24 sps:$4 sm:$0xff]   ;;  %v10498_v49 = vld [vmem:[#allocation7 + $0x374] ss:$24 sps:$4 sm:$0xff]  }
 0xa2b   : > { %4497 = vadd.xlane.f32.xlu0 %v4496_v40  ;;  %5468 = vmatpush1.bf16.msra.mxu0 %v10409_v15  ;;  %v10457_v40 = vld [vmem:[#allocation7 + $0x4e8] ss:$24 sps:$4 sm:$0xff]  }
 0xa2c   : > { %5469 = vmatprep.subr.bf16.mxu0 %v10417_v16  ;;  %5443 = vmatpush1.bf16.msra.mxu1 %v10454_v50  ;;  %v10478_v15 = vld [vmem:[#allocation7 + $0x5a0] ss:$24 sps:$4 sm:$0xff]   ;;  %v10496_v50 = vld [vmem:[#allocation7 + $0x370] ss:$24 sps:$4 sm:$0xff]  }
 0xa2d   : > { %5444 = vmatprep.subr.bf16.mxu1 %v10462_v5  ;;  %v10481_v16 = vld [vmem:[#allocation7 + $0x5a8] ss:$24 sps:$4 sm:$0xff]  }
 0xa2e   : > { %v10511_v5 = vld [vmem:[#allocation7 + $0x460] ss:$24 sps:$4 sm:$0xff]  }
 0xa2f   : > { %5470 = vmatpush1.bf16.msra.mxu0 %v10415_v19  ;;  %v10484_v19 = vld [vmem:[#allocation7 + $0x5d0] ss:$24 sps:$4 sm:$0xff]  }
 0xa30   : > { %5471 = vmatprep.subr.bf16.mxu0 %v10423_v21  ;;  %5445 = vmatpush1.bf16.msra.mxu1 %v10460_v6  ;;  %v10487_v21 = vld [vmem:[#allocation7 + $0x5d8] ss:$24 sps:$4 sm:$0xff]   ;;  %v10516_v6 = vld [vmem:[#allocation7 + $0x494] ss:$24 sps:$4 sm:$0xff]  }
 0xa31   : > { %5446 = vmatprep.subr.bf16.mxu1 %v10468_v10  ;;  %v10517_v10 = vld [vmem:[#allocation7 + $0x4c0] ss:$24 sps:$4 sm:$0xff]  }
 0xa33   : > { %5472 = vmatpush1.bf16.msra.mxu0 %v10421_v27 }
 0xa34   : > { %5473 = vmatprep.subr.bf16.mxu0 %v10429_v53 }
 0xa37   : > { %5474 = vmatpush1.bf16.msra.mxu0 %v10427_v30  ;;  %v1012_v30 = vld [vmem:[%s12267_s27] sm:$0x3] }
 0xa38   : > { %5475 = vmatprep.subr.bf16.mxu0 %v10435_v33  ;;  %v4520_v33 = vrot.slane %v1011_v29, %v11762_v3  ;;  %v4533_v31 = vrot.slane %v1012_v30, %v11762_v3 }
 0xa3b   : > { %5476 = vmatpush1.bf16.msra.mxu0 %v10433_v35 }
 0xa3c   : > { %5477 = vmatprep.subr.bf16.mxu0 %v10441_v36  ;;  %v4529_v36 = vrot.slane %v1012_v30, %v11620_v9 }
 0xa3f   : > { %5478 = vmatpush1.bf16.msra.mxu0 %v10439_v37 }
 0xa40   : > { %5479 = vmatprep.subr.bf16.mxu0 %v10447_v38 }
 0xa43   : > { %5480 = vmatpush1.bf16.msra.mxu0 %v10445_v42 }
 0xa44   : > { %5481 = vmatprep.subr.bf16.mxu0 %v10453_v44 }
 0xa47   : > { %5482 = vmatpush1.bf16.msra.mxu0 %v10451_v45  ;;  %v10493_v45 = vld [vmem:[#allocation7 + $0x340] ss:$24 sps:$4 sm:$0xff]  }
 0xa48   : > { %5483 = vmatprep.subr.bf16.mxu0 %v10459_v0  ;;  %v10508_v0 = vld [vmem:[#allocation7 + $0x430] ss:$24 sps:$4 sm:$0xff]  }
 0xa4b   : > { %5484 = vmatpush1.bf16.msra.mxu0 %v10457_v40  ;;  %v10513_v40 = vld [vmem:[#allocation7 + $0x464] ss:$24 sps:$4 sm:$0xff]  }
 0xa4c   : > { %5485 = vmatprep.subr.bf16.mxu0 %v10465_v54  ;;  %v10514_v54 = vld [vmem:[#allocation7 + $0x490] ss:$24 sps:$4 sm:$0xff]  }
 0xa4f   : > { %5486 = vmatpush1.bf16.msra.mxu0 %v10463_v7  ;;  %v10519_v7 = vld [vmem:[#allocation7 + $0x4c4] ss:$24 sps:$4 sm:$0xff]  }
 0xa50   : > { %5487 = vmatprep.subr.bf16.mxu0 %v10471_v12  ;;  %v10520_v12 = vld [vmem:[#allocation7 + $0x4f0] ss:$24 sps:$4 sm:$0xff]  }
 0xab8   : > { %v4498_v55 = vpop.xlane.xlu0 %4497 }
 0xab9   : > { %v4499_v56 = vmul.f32 0.00390625, %v4498_v55  ;;  %v10501_v55 = vld [vmem:[#allocation7 + $0x3a4] ss:$24 sps:$4 sm:$0xff]  }
 0xabb   : > { %v4500_v57 = vsub.f32 %v11849_v62, %v4499_v56  ;;  %v4501_v58 = vsub.f32 %v11852_v17, %v4499_v56  ;;  %v10466_v62 = vld [vmem:[#allocation7 + $0x540] ss:$24 sps:$4 sm:$0xff]  }
 0xabc   : > { %v10469_v17 = vld [vmem:[#allocation7 + $0x548] ss:$24 sps:$4 sm:$0xff]   ;;  %5447 = vmatpush1.bf16.msra.mxu1 %v10466_v62  ;;  %v10522_v62 = vld [vmem:[#allocation7 + $0x4f4] ss:$24 sps:$4 sm:$0xff]  }
 0xabd   : > { %v4502_v59 = vmul.f32 %v4500_v57, %v4500_v57  ;;  %v4503_v60 = vmul.f32 %v4501_v58, %v4501_v58  ;;  %5488 = vmatpush1.bf16.msra.mxu0 %v10469_v17  ;;  %5448 = vmatprep.subr.bf16.mxu1 %v10474_v63  ;;  %v10499_v56 = vld [vmem:[#allocation7 + $0x3a0] ss:$24 sps:$4 sm:$0xff]   ;;  %v10525_v17 = vld [vmem:[#allocation7 + $0x524] ss:$24 sps:$4 sm:$0xff]  }
 0xabe   : > { %5489 = vmatprep.subr.bf16.mxu0 %v10477_v13  ;;  %v10523_v63 = vld [vmem:[#allocation7 + $0x520] ss:$24 sps:$4 sm:$0xff]   ;;  %v10526_v13 = vld [vmem:[#allocation7 + $0x550] ss:$24 sps:$4 sm:$0xff]  }
 0xabf   : > { %v4504_v61 = vadd.f32 %v4503_v60, %v4502_v59  ;;  %v10507_v59 = vld [vmem:[#allocation7 + $0x404] ss:$24 sps:$4 sm:$0xff]   ;;  %v10505_v60 = vld [vmem:[#allocation7 + $0x400] ss:$24 sps:$4 sm:$0xff]  }
 0xac0   : > { %5449 = vmatpush1.bf16.msra.mxu1 %v10472_v2  ;;  %v10528_v2 = vld [vmem:[#allocation7 + $0x554] ss:$24 sps:$4 sm:$0xff]  }
 0xac1   : > { %4505 = vadd.xlane.f32.xlu0 %v4504_v61  ;;  %5490 = vmatpush1.bf16.msra.mxu0 %v10475_v1  ;;  %v10510_v61 = vld [vmem:[#allocation7 + $0x434] ss:$24 sps:$4 sm:$0xff]   ;;  %v10531_v1 = vld [vmem:[#allocation7 + $0x584] ss:$24 sps:$4 sm:$0xff]  }
 0xac2   : > { %5450 = vmatprep.subr.bf16.mxu1 %v10480_v14  ;;  %5491 = vmatprep.subr.bf16.mxu0 %v10483_v24  ;;  %v10529_v14 = vld [vmem:[#allocation7 + $0x580] ss:$24 sps:$4 sm:$0xff]   ;;  %v10532_v24 = vld [vmem:[#allocation7 + $0x5b0] ss:$24 sps:$4 sm:$0xff]  }
 0xac4   : > { %5451 = vmatpush1.bf16.msra.mxu1 %v10478_v15  ;;  %v10534_v15 = vld [vmem:[#allocation7 + $0x5b4] ss:$24 sps:$4 sm:$0xff]  }
 0xac5   : > { %5492 = vmatpush1.bf16.msra.mxu0 %v10481_v16  ;;  %5452 = vmatprep.subr.bf16.mxu1 %v10486_v18  ;;  %v10537_v16 = vld [vmem:[#allocation7 + $0x5e4] ss:$24 sps:$4 sm:$0xff]   ;;  %v10535_v18 = vld [vmem:[#allocation7 + $0x5e0] ss:$24 sps:$4 sm:$0xff]  }
 0xac6   : > { %5493 = vmatprep.subr.bf16.mxu0 %v10489_v20 }
 0xac8   : > { %5453 = vmatpush1.bf16.msra.mxu1 %v10484_v19 }
 0xac9   : > { %5494 = vmatpush1.bf16.msra.mxu0 %v10487_v21  ;;  %5504 = vmatprep.subr.bf16.mxu1 %v10492_v26 }
 0xaca   : > { %9799 = vmatprep.subr.bf16.mxu0 %v11167_v4 }
 0xb4e   : > { %v4506_v27 = vpop.xlane.xlu0 %4505 }
 0xb4f   : > { %v4507_v28 = vmul.f32 0.00390625, %v4506_v27 }
 0xb51   : > { %v4508_v53 = vadd.f32 1e-05, %v4507_v28 }
 0xb53   : > { %10828 = vrsqrt.f32 %v4508_v53 }
 0xb5d   : > { %v10829_v34 = vpop.eup %10828 }
 0xb5e   : > { %v4510_v35 = vmul.f32 %v10829_v34, %v4500_v57  ;;  %v4511_v23 = vmul.f32 %v10829_v34, %v4501_v58  ;;  %v10504_v57 = vld [vmem:[#allocation7 + $0x3d4] ss:$24 sps:$4 sm:$0xff]   ;;  %v10502_v58 = vld [vmem:[#allocation7 + $0x3d0] ss:$24 sps:$4 sm:$0xff]  }
 0xb60   : > { %v4524_v37 = vmul.f32 %v4520_v33, %v4511_v23  ;;  %v4523_v39 = vmul.f32 %v4516_v32, %v4510_v35 }
 0xb62   : > { %v11869_v38 = vadd.f32 %v4533_v31, %v4524_v37  ;;  %v11871_v41 = vadd.f32 %v4529_v36, %v4523_v39 }
 0xb64   : > { %v4941_v42 = vpack.c.bf16 %v11869_v38, %v11869_v38  ;;  %v11877_v44 = vpack.c.bf16 %v11871_v41, %v11871_v41 }
 0xb66   : > { %5454 = vmatprep.mubr.bf16.mxu1 %v4941_v42  ;;  %5495 = vmatprep.mubr.bf16.mxu0 %v4941_v42 }
 0xb67   : > { %5455 = vmatmul.mubr.bf16.vlgmr.msra.gmra.mrb[76].mxu1 %v11877_v44  ;;  %5496 = vmatmul.mubr.bf16.vlgmr.msra.gmra.mrb[36].mxu0 %v11877_v44 }
 0xb68   : > { %5505 = vmatpush1.bf16.msra.mxu1 %v10490_v43  ;;  %5536 = vmatprep.mubr.bf16.mxu1 %v4941_v42 }
 0xb69   : > { %5506 = vmatprep.subr.bf16.mxu1 %v10495_v46  ;;  %9801 = vmatprep.mubr.msk.bf16.mxu0 %vm11168_vm0, %v11167_v4 }
 0xb6c   : > { %5507 = vmatpush1.bf16.msra.mxu1 %v10493_v45 }
 0xb6d   : > { %5508 = vmatprep.subr.bf16.mxu1 %v10498_v49 }
 0xb70   : > { %5509 = vmatpush1.bf16.msra.mxu1 %v10496_v50 }
 0xb71   : > { %5510 = vmatprep.subr.bf16.mxu1 %v10501_v55 }
 0xb74   : > { %5511 = vmatpush1.bf16.msra.mxu1 %v10499_v56 }
 0xb75   : > { %5512 = vmatprep.subr.bf16.mxu1 %v10504_v57 }
 0xb78   : > { %5513 = vmatpush1.bf16.msra.mxu1 %v10502_v58 }
 0xb79   : > { %5514 = vmatprep.subr.bf16.mxu1 %v10507_v59 }
 0xb7c   : > { %5515 = vmatpush1.bf16.msra.mxu1 %v10505_v60 }
 0xb7d   : > { %5516 = vmatprep.subr.bf16.mxu1 %v10510_v61 }
 0xb80   : > { %5517 = vmatpush1.bf16.msra.mxu1 %v10508_v0 }
 0xb81   : > { %5518 = vmatprep.subr.bf16.mxu1 %v10513_v40 }
 0xb84   : > { %5519 = vmatpush1.bf16.msra.mxu1 %v10511_v5 }
 0xb85   : > { %5520 = vmatprep.subr.bf16.mxu1 %v10516_v6 }
 0xb88   : > { %5521 = vmatpush1.bf16.msra.mxu1 %v10514_v54 }
 0xb89   : > { %5522 = vmatprep.subr.bf16.mxu1 %v10519_v7 }
 0xb8c   : > { %5523 = vmatpush1.bf16.msra.mxu1 %v10517_v10 }
 0xb8d   : > { %5524 = vmatprep.subr.bf16.mxu1 %v10522_v62 }
 0xb90   : > { %5525 = vmatpush1.bf16.msra.mxu1 %v10520_v12 }
 0xb91   : > { %5526 = vmatprep.subr.bf16.mxu1 %v10525_v17 }
 0xb94   : > { %5527 = vmatpush1.bf16.msra.mxu1 %v10523_v63 }
 0xb95   : > { %5528 = vmatprep.subr.bf16.mxu1 %v10528_v2 }
 0xb98   : > { %5529 = vmatpush1.bf16.msra.mxu1 %v10526_v13 }
 0xb99   : > { %5530 = vmatprep.subr.bf16.mxu1 %v10531_v1 }
 0xb9c   : > { %5531 = vmatpush1.bf16.msra.mxu1 %v10529_v14 }
 0xb9d   : > { %5532 = vmatprep.subr.bf16.mxu1 %v10534_v15 }
 0xba0   : > { %5533 = vmatpush1.bf16.msra.mxu1 %v10532_v24 }
 0xba1   : > { %5534 = vmatprep.subr.bf16.mxu1 %v10537_v16 }
 0xba4   : > { %5535 = vmatpush1.bf16.msra.mxu1 %v10535_v18 }
 0xba5   : > { %9805 = vmatprep.subr.bf16.mxu1 %v11167_v4 }
 0xba7   : > { %5537 = vmatmul.mubr.bf16.vlgmr.msra.gmra.mrb[80].mxu1 %v11877_v44 }
 0xba8   : > { %9807 = vmatprep.mubr.msk.bf16.mxu1 %vm11168_vm0, %v11167_v4 }
 0xc3a   : > { %v5456_v19 = vpop.f32.mrb[76].mxu1  ;;  %v5497_v20 = vpop.f32.mrb[36].mxu0 }
 0xc3b   : > { %v5547_v21 = vpack.c.bf16 %v5497_v20, %v5497_v20  ;;  %v5458_v26 = vpop.f32.mrb[77].mxu1  ;;  %v5499_v27 = vpop.f32.mrb[37].mxu0  ;;  %v5545_v33 = vpack.c.bf16 %v5456_v19, %v5456_v19 }
 0xc3c   : > { %v5460_v28 = vpop.f32.mrb[78].mxu1  ;;  %v5501_v53 = vpop.f32.mrb[38].mxu0  ;;  %v5548_v34 = vpack.c.bf16 %v5499_v27, %v5499_v27  ;;  %v5546_v35 = vpack.c.bf16 %v5458_v26, %v5458_v26 }
 0xc3d   : > { %5568 = vrot.lane.b32.xlu0 %v5547_v21, %s11169_s12  ;;  %5566 = vrot.lane.b32.xlu1 %v5547_v21, %s11170_s23  ;;  %v5461_v29 = vpop.f32.mrb[79].mxu1  ;;  %v5502_v30 = vpop.f32.mrb[39].mxu0  ;;  %v5597_v32 = vsel %vm1672_vm1, %v5547_v21, 0 }
 0xc3e   : > { %9800 = vmatpush3.bf16.xpose.msra.mxu0 %v5597_v32  ;;  %v5781_v55 = vsel %vm1672_vm1, %v5548_v34, 0 }
 0xc3f   : > { %9811 = vmatprep.subr.bf16.mxu0 %v11167_v4 }
 0xc41   : > { %5554 = vrot.lane.b32.xlu0 %v5545_v33, %s11169_s12  ;;  %5552 = vrot.lane.b32.xlu1 %v5545_v33, %s11170_s23 }
 0xc45   : > { %5573 = vrot.lane.b32.xlu0 %v5548_v34, %s11170_s23  ;;  %5570 = vrot.lane.b32.xlu1 %v5547_v21, %s11171_s30 }
 0xc46   : > { %9802 = vmatmul.mubr.msk.bf16.vlgmr.msra.gmra.mrb[40].mxu0 %vm1672_vm1, %v5545_v33 }
 0xc47   : > { %9813 = vmatprep.mubr.msk.bf16.mxu0 %vm11168_vm0, %v11167_v4 }
 0xc49   : > { %5556 = vrot.lane.b32.xlu1 %v5545_v33, %s11171_s30  ;;  %5559 = vrot.lane.b32.xlu0 %v5546_v35, %s11170_s23 }
 0xc4d   : > { %5575 = vrot.lane.b32.xlu1 %v5548_v34, %s11169_s12  ;;  %5561 = vrot.lane.b32.xlu0 %v5546_v35, %s11169_s12 }
 0xc51   : > { %5577 = vrot.lane.b32.xlu1 %v5548_v34, %s11171_s30 }
 0xc55   : > { %5563 = vrot.lane.b32.xlu1 %v5546_v35, %s11171_s30 }
 0xc7a   : > { %v5538_v23 = vpop.f32.mrb[80].mxu1 }
 0xc7b   : > { %v11904_v36 = vpop.f32.mrb[81].mxu1  ;;  %v11930_v0 = vpack.c.bf16 %v5538_v23, %v5538_v23 }
 0xc7c   : > { %v5542_v31 = vpop.f32.mrb[82].mxu1 }
 0xc7d   : > { %v5543_v37 = vpop.f32.mrb[83].mxu1  ;;  %v6069_v54 = vsel %vm2149_vm4, %v11930_v0, 0 }
 0xcaf   : > { %v5569_v39 = vpop.permute.xlu0 %5568  ;;  %v5567_v42 = vpop.permute.xlu1 %5566 }
 0xcb0   : > { %v5689_v43 = vsel %vm1672_vm1, %v5569_v39, 0  ;;  %v5643_v44 = vsel %vm1672_vm1, %v5567_v42, 0 }
 0xcb1   : > { %9806 = vmatpush3.bf16.xpose.msra.mxu1 %v5643_v44  ;;  %9812 = vmatpush3.bf16.xpose.msra.mxu0 %v5689_v43 }
 0xcb2   : > { %9817 = vmatprep.subr.bf16.mxu1 %v11167_v4  ;;  %9823 = vmatprep.subr.bf16.mxu0 %v11167_v4 }
 0xcb3   : > { %v5553_v46 = vpop.permute.xlu1 %5552  ;;  %v5555_v45 = vpop.permute.xlu0 %5554 }
 0xcb7   : > { %v5571_v49 = vpop.permute.xlu1 %5570  ;;  %v5574_v56 = vpop.permute.xlu0 %5573 }
 0xcb8   : > { %v5735_v50 = vsel %vm1672_vm1, %v5571_v49, 0  ;;  %9808 = vmatmul.mubr.msk.bf16.vlgmr.msra.gmra.mrb[84].mxu1 %vm1672_vm1, %v5553_v46  ;;  %9814 = vmatmul.mubr.msk.bf16.vlgmr.msra.gmra.mrb[44].mxu0 %vm1672_vm1, %v5555_v45  ;;  %v5827_v59 = vsel %vm1672_vm1, %v5574_v56, 0 }
 0xcb9   : > { %9818 = vmatpush3.bf16.xpose.msra.mxu1 %v5735_v50  ;;  %9824 = vmatpush3.bf16.xpose.msra.mxu0 %v5781_v55 }
 0xcba   : > { %9819 = vmatprep.mubr.msk.bf16.mxu1 %vm11168_vm0, %v11167_v4  ;;  %9825 = vmatprep.mubr.msk.bf16.mxu0 %vm11168_vm0, %v11167_v4 }
 0xcbb   : > { %v5557_v57 = vpop.permute.xlu1 %5556  ;;  %9829 = vmatprep.subr.bf16.mxu1 %v11167_v4  ;;  %9835 = vmatprep.subr.bf16.mxu0 %v11167_v4  ;;  %v5560_v61 = vpop.permute.xlu0 %5559 }
 0xcbf   : > { %v5576_v58 = vpop.permute.xlu1 %5575  ;;  %v5562_v5 = vpop.permute.xlu0 %5561 }
 0xcc0   : > { %v5873_v60 = vsel %vm1672_vm1, %v5576_v58, 0  ;;  %9820 = vmatmul.mubr.msk.bf16.vlgmr.msra.gmra.mrb[88].mxu1 %vm1672_vm1, %v5557_v57  ;;  %9826 = vmatmul.mubr.msk.bf16.vlgmr.msra.gmra.mrb[48].mxu0 %vm1672_vm1, %v5546_v35 }
 0xcc1   : > { %9830 = vmatpush3.bf16.xpose.msra.mxu1 %v5827_v59  ;;  %9836 = vmatpush3.bf16.xpose.msra.mxu0 %v5873_v60 }
 0xcc2   : > { %9831 = vmatprep.mubr.msk.bf16.mxu1 %vm11168_vm0, %v11167_v4  ;;  %9837 = vmatprep.mubr.msk.bf16.mxu0 %vm11168_vm0, %v11167_v4 }
 0xcc3   : > { %9841 = vmatprep.subr.bf16.mxu1 %v11167_v4  ;;  %9847 = vmatprep.subr.bf16.mxu0 %v11167_v4  ;;  %v5578_v40 = vpop.permute.xlu1 %5577 }
 0xcc4   : > { %v5919_v6 = vsel %vm1672_vm1, %v5578_v40, 0 }
 0xcc7   : > { %v5564_v7 = vpop.permute.xlu1 %5563 }
 0xcc8   : > { %9832 = vmatmul.mubr.msk.bf16.vlgmr.msra.gmra.mrb[92].mxu1 %vm1672_vm1, %v5560_v61  ;;  %9838 = vmatmul.mubr.msk.bf16.vlgmr.msra.gmra.mrb[52].mxu0 %vm1672_vm1, %v5562_v5 }
 0xcc9   : > { %9842 = vmatpush3.bf16.xpose.msra.mxu1 %v5919_v6  ;;  %9848 = vmatpush3.bf16.msra.mxu0 %v6069_v54 }
 0xcca   : > { %9843 = vmatprep.mubr.msk.bf16.mxu1 %vm11168_vm0, %v11167_v4  ;;  %9853 = vmatprep.subr.bf16.mxu1 %v11167_v4 }
 0xccb   : > { %9849 = vmatprep.mubr.msk.bf16.mxu0 %vm11168_vm0, %v11167_v4  ;;  %9859 = vmatprep.subr.bf16.mxu0 %v11167_v4 }
 0xcd0   : > { %9844 = vmatmul.mubr.msk.bf16.vlgmr.msra.gmra.mrb[96].mxu1 %vm1672_vm1, %v5564_v7 }
 0xcd1   : > { %9855 = vmatprep.mubr.msk.bf16.mxu1 %vm11168_vm0, %v11167_v4 }
 0xd19   : > { %v5633_v10 = vpop.f32.mrb[40].mxu0 }
 0xd1a   : > { %v5634_v62 = vadd.f32 %v5633_v10, %v11624_v11  ;;  %v9803_v12 = vpop.f32.mrb[41].mxu0 }
 0xd1b   : > { %v5636_v17 = vpop.f32.mrb[42].mxu0 }
 0xd1c   : > { %v11947_v63 = vmul.f32 0.0625, %v5634_v62  ;;  %v9804_v2 = vpop.f32.mrb[43].mxu0 }
 0xd1e   : > { %v5969_v13 = vsel %vm2049_vm3, %v11947_v63, -inf }
 0xd1f   : > { %5970 = vmax.xlane.f32.xlu0 %v5969_v13 }
 0xd8b   : > { %v5679_v1 = vpop.f32.mrb[84].mxu1  ;;  %v5725_v14 = vpop.f32.mrb[44].mxu0 }
 0xd8c   : > { %v5680_v15 = vadd.f32 %v5679_v1, %v11624_v11  ;;  %v5726_v24 = vadd.f32 %v5725_v14, %v11624_v11  ;;  %v9809_v16 = vpop.f32.mrb[85].mxu1  ;;  %v9815_v18 = vpop.f32.mrb[45].mxu0 }
 0xd8d   : > { %v5682_v19 = vpop.f32.mrb[86].mxu1  ;;  %v5728_v20 = vpop.f32.mrb[46].mxu0 }
 0xd8e   : > { %v5962_v21 = vmul.f32 0.0625, %v5680_v15  ;;  %v5963_v26 = vmul.f32 0.0625, %v5726_v24  ;;  %v9810_v27 = vpop.f32.mrb[87].mxu1  ;;  %v9816_v28 = vpop.f32.mrb[47].mxu0 }
 0xd90   : > { %v5975_v53 = vsel %vm2049_vm3, %v5963_v26, -inf  ;;  %v5972_v29 = vsel %vm2049_vm3, %v5962_v21, -inf }
 0xd91   : > { %5976 = vmax.xlane.f32.xlu0 %v5975_v53  ;;  %5973 = vmax.xlane.f32.xlu1 %v5972_v29 }
 0xd93   : > { %v5771_v30 = vpop.f32.mrb[88].mxu1  ;;  %v5817_v32 = vpop.f32.mrb[48].mxu0 }
 0xd94   : > { %v5772_v33 = vadd.f32 %v5771_v30, %v11624_v11  ;;  %v5818_v34 = vadd.f32 %v5817_v32, %v11624_v11  ;;  %v9821_v35 = vpop.f32.mrb[89].mxu1  ;;  %v9827_v23 = vpop.f32.mrb[49].mxu0 }
 0xd95   : > { %v5774_v31 = vpop.f32.mrb[90].mxu1  ;;  %v5820_v37 = vpop.f32.mrb[50].mxu0 }
 0xd96   : > { %v5964_v39 = vmul.f32 0.0625, %v5772_v33  ;;  %v11957_v42 = vmul.f32 0.0625, %v5818_v34  ;;  %v9822_v43 = vpop.f32.mrb[91].mxu1  ;;  %v9828_v44 = vpop.f32.mrb[51].mxu0 }
 0xd97   : > { %v5550_v43 = vpack.c.bf16 %v11904_v36, %v11904_v36 }
 0xd98   : > { %v5981_v46 = vsel %vm2049_vm3, %v11957_v42, -inf  ;;  %v5978_v45 = vsel %vm2049_vm3, %v5964_v39, -inf }
 0xd99   : > { %5982 = vmax.xlane.f32.xlu1 %v5981_v46  ;;  %5979 = vmax.xlane.f32.xlu0 %v5978_v45 }
 0xd9b   : > { %v5863_v49 = vpop.f32.mrb[92].mxu1  ;;  %v5909_v50 = vpop.f32.mrb[52].mxu0 }
 0xd9c   : > { %v5864_v55 = vadd.f32 %v5863_v49, %v11624_v11  ;;  %v5910_v56 = vadd.f32 %v5909_v50, %v11624_v11  ;;  %v9833_v57 = vpop.f32.mrb[93].mxu1  ;;  %v9839_v58 = vpop.f32.mrb[53].mxu0 }
 0xd9d   : > { %v5866_v59 = vpop.f32.mrb[94].mxu1  ;;  %v5912_v60 = vpop.f32.mrb[54].mxu0 }
 0xd9e   : > { %v11964_v61 = vmul.f32 0.0625, %v5864_v55  ;;  %v5967_v40 = vmul.f32 0.0625, %v5910_v56  ;;  %v9834_v5 = vpop.f32.mrb[95].mxu1  ;;  %v9840_v6 = vpop.f32.mrb[55].mxu0 }
 0xda0   : > { %v5987_v54 = vsel %vm2049_vm3, %v5967_v40, -inf  ;;  %v5984_v7 = vsel %vm2049_vm3, %v11964_v61, -inf }
 0xda1   : > { %5988 = vmax.xlane.f32.xlu1 %v5987_v54  ;;  %5985 = vmax.xlane.f32.xlu0 %v5984_v7 }
 0xda3   : > { %v5955_v10 = vpop.f32.mrb[96].mxu1 }
 0xda4   : > { %v5956_v62 = vadd.f32 %v5955_v10, %v11624_v11  ;;  %v9845_v12 = vpop.f32.mrb[97].mxu1 }
 0xda5   : > { %v5958_v17 = vpop.f32.mrb[98].mxu1 }
 0xda6   : > { %v5968_v2 = vmul.f32 0.0625, %v5956_v62  ;;  %v9846_v13 = vpop.f32.mrb[99].mxu1 }
 0xda8   : > { %v5990_v1 = vsel %vm2049_vm3, %v5968_v2, -inf }
 0xda9   : > { %5991 = vmax.xlane.f32.xlu0 %v5990_v1 }
 0xdac   : > { %v5971_v14 = vpop.xlane.xlu0 %5970 }
 0xdad   : > { %v5993_v15 = vsub.f32 %v11947_v63, %v5971_v14 }
 0xdaf   : > { %v6001_v24 = vmul.f32 1.442695, %v5993_v15 }
 0xdb1   : > { %10830 = vpow2.f32 %v6001_v24 }
 0xdb2   : > { %5580 = vrot.lane.b32.xlu1 %v11930_v0, %s11170_s23 }
 0xdbb   : > { %v10831_v16 = vpop.eup %10830 }
 0xdbc   : > { %v6017_v18 = vsel %vm2049_vm3, %v10831_v16, 0.0 }
 0xdd6   : > { %6018 = vadd.xlane.f32.xlu1 %v6017_v18 }
 0xe1e   : > { %v5977_v11 = vpop.xlane.xlu0 %5976  ;;  %v5974_v19 = vpop.xlane.xlu1 %5973 }
 0xe1f   : > { %v5995_v20 = vsub.f32 %v5963_v26, %v5977_v11  ;;  %v5994_v27 = vsub.f32 %v5962_v21, %v5974_v19 }
 0xe21   : > { %v6005_v28 = vmul.f32 1.442695, %v5995_v20  ;;  %v6003_v53 = vmul.f32 1.442695, %v5994_v27  ;;  %v6253_v27 = vsel %vm2149_vm4, %v5550_v43, 0 }
 0xe23   : > { %10832 = vpow2.f32 %v6005_v28 }
 0xe24   : > { %10834 = vpow2.f32 %v6003_v53 }
 0xe26   : > { %v5980_v29 = vpop.xlane.xlu0 %5979  ;;  %v5983_v33 = vpop.xlane.xlu1 %5982 }
 0xe27   : > { %v5996_v30 = vsub.f32 %v5964_v39, %v5980_v29  ;;  %v5997_v44 = vsub.f32 %v11957_v42, %v5983_v33 }
 0xe29   : > { %v6007_v32 = vmul.f32 1.442695, %v5996_v30  ;;  %v6009_v45 = vmul.f32 1.442695, %v5997_v44 }
 0xe2b   : > { %10836 = vpow2.f32 %v6007_v32 }
 0xe2c   : > { %10838 = vpow2.f32 %v6009_v45 }
 0xe2d   : > { %v10833_v63 = vpop.eup %10832 }
 0xe2e   : > { %v10835_v34 = vpop.eup %10834  ;;  %v5989_v35 = vpop.xlane.xlu1 %5988  ;;  %v6023_v23 = vsel %vm2049_vm3, %v10833_v63, 0.0 }
 0xe2f   : > { %6024 = vadd.xlane.f32.xlu1 %v6023_v23  ;;  %v6020_v31 = vsel %vm2049_vm3, %v10835_v34, 0.0  ;;  %v5986_v46 = vpop.xlane.xlu0 %5985  ;;  %v5999_v49 = vsub.f32 %v5967_v40, %v5989_v35 }
 0xe30   : > { %6021 = vadd.xlane.f32.xlu0 %v6020_v31  ;;  %v5998_v50 = vsub.f32 %v11964_v61, %v5986_v46 }
 0xe31   : > { %v6013_v56 = vmul.f32 1.442695, %v5999_v49 }
 0xe32   : > { %v5581_v26 = vpop.permute.xlu1 %5580  ;;  %v6011_v57 = vmul.f32 1.442695, %v5998_v50 }
 0xe33   : > { %v6115_v21 = vsel %vm2149_vm4, %v5581_v26, 0  ;;  %10840 = vpow2.f32 %v6013_v56 }
 0xe34   : > { %9854 = vmatpush3.bf16.msra.mxu1 %v6115_v21  ;;  %10842 = vpow2.f32 %v6011_v57 }
 0xe35   : > { %9865 = vmatprep.subr.bf16.mxu1 %v11167_v4  ;;  %v11979_v37 = vpop.eup %10836 }
 0xe36   : > { %v6026_v39 = vsel %vm2049_vm3, %v11979_v37, 0.0  ;;  %v5992_v55 = vpop.xlane.xlu0 %5991  ;;  %v11992_v60 = vpop.eup %10838 }
 0xe37   : > { %6027 = vadd.xlane.f32.xlu0 %v6026_v39  ;;  %v6000_v58 = vsub.f32 %v5968_v2, %v5992_v55 }
 0xe39   : > { %v6015_v36 = vmul.f32 1.442695, %v6000_v58 }
 0xe3b   : > { %10844 = vpow2.f32 %v6015_v36 }
 0xe3d   : > { %v11996_v42 = vpop.eup %10840 }
 0xe3e   : > { %v11998_v61 = vpop.eup %10842  ;;  %v6035_v40 = vsel %vm2049_vm3, %v11996_v42, 0.0 }
 0xe3f   : > { %v6032_v5 = vsel %vm2049_vm3, %v11998_v61, 0.0 }
 0xe40   : > { %5584 = vrot.lane.b32.xlu1 %v11930_v0, %s11171_s30 }
 0xe44   : > { %5587 = vrot.lane.b32.xlu1 %v5550_v43, %s11170_s23 }
 0xe45   : > { %v12004_v6 = vpop.eup %10844 }
 0xe46   : > { %v6038_v10 = vsel %vm2049_vm3, %v12004_v6, 0.0 }
 0xe4d   : > { %5582 = vrot.lane.b32.xlu0 %v11930_v0, %s11169_s12  ;;  %v6029_v0 = vsel %vm2049_vm3, %v11992_v60, 0.0 }
 0xe63   : > { %v6019_v59 = vpop.xlane.xlu1 %6018 }
 0xe64   : > { %10846 = vrcp.f32 %v6019_v59 }
 0xe68   : > { %6030 = vadd.xlane.f32.xlu1 %v6029_v0 }
 0xe6c   : > { %6036 = vadd.xlane.f32.xlu1 %v6035_v40  ;;  %6033 = vadd.xlane.f32.xlu0 %v6032_v5  ;;  %v10541_v40 = vld [vmem:[#allocation8 + $0x110] ss:$8 sps:$4 sm:$0xff]   ;;  %v10543_v5 = vld [vmem:[#allocation8 + $0x114] ss:$8 sps:$4 sm:$0xff]  }
 0xe6e   : > { %v10847_v54 = vpop.eup %10846 }
 0xe6f   : > { %v6049_v7 = vmul.f32 %v10847_v54, %v10831_v16  ;;  %v10546_v54 = vld [vmem:[#allocation8 + $0x124] ss:$8 sps:$4 sm:$0xff]  }
 0xe70   : > { %6039 = vadd.xlane.f32.xlu0 %v6038_v10 }
 0xe71   : > { %v6057_v62 = vpack.c.bf16 %v6049_v7, %v6049_v7 }
 0xe73   : > { %9850 = vmatmul.mubr.msk.bf16.vlgmr.msra.gmra.mrb[56].mxu0 %vm2049_vm3, %v6057_v62  ;;  %v10544_v62 = vld [vmem:[#allocation8 + $0x120] ss:$8 sps:$4 sm:$0xff]  }
 0xe74   : > { %9861 = vmatprep.mubr.msk.bf16.mxu0 %vm11168_vm0, %v11167_v4 }
 0xe7d   : > { %5591 = vrot.lane.b32.xlu1 %v5550_v43, %s11171_s30 }
 0xe86   : > { %5589 = vrot.lane.b32.xlu0 %v5550_v43, %s11169_s12 }
 0xebc   : > { %v6025_v12 = vpop.xlane.xlu1 %6024 }
 0xebd   : > { %10848 = vrcp.f32 %v6025_v12  ;;  %v6022_v17 = vpop.xlane.xlu0 %6021 }
 0xebe   : > { %10850 = vrcp.f32 %v6022_v17 }
 0xec0   : > { %v5585_v16 = vpop.permute.xlu1 %5584 }
 0xec1   : > { %v6207_v20 = vsel %vm2149_vm4, %v5585_v16, 0  ;;  %v10552_v16 = vld [vmem:[#allocation8 + $0x144] ss:$8 sps:$4 sm:$0xff]  }
 0xec4   : > { %v6028_v2 = vpop.xlane.xlu0 %6027  ;;  %v5588_v29 = vpop.permute.xlu1 %5587 }
 0xec5   : > { %10852 = vrcp.f32 %v6028_v2  ;;  %v6299_v32 = vsel %vm2149_vm4, %v5588_v29, 0  ;;  %v10549_v2 = vld [vmem:[#allocation8 + $0x134] ss:$8 sps:$4 sm:$0xff]   ;;  %v10553_v29 = vld [vmem:[#allocation8 + $0x150] ss:$8 sps:$4 sm:$0xff]  }
 0xec7   : > { %v10849_v13 = vpop.eup %10848 }
 0xec8   : > { %v10851_v1 = vpop.eup %10850  ;;  %v6051_v14 = vmul.f32 %v10849_v13, %v10833_v63  ;;  %v5583_v24 = vpop.permute.xlu0 %5582 }
 0xec9   : > { %v6050_v15 = vmul.f32 %v10851_v1, %v10835_v34  ;;  %v6161_v18 = vsel %vm2149_vm4, %v5583_v24, 0  ;;  %v10547_v24 = vld [vmem:[#allocation8 + $0x130] ss:$8 sps:$4 sm:$0xff]  }
 0xeca   : > { %v6059_v11 = vpack.c.bf16 %v6051_v14, %v6051_v14  ;;  %9860 = vmatpush3.bf16.msra.mxu0 %v6161_v18 }
 0xecb   : > { %v6058_v19 = vpack.c.bf16 %v6050_v15, %v6050_v15  ;;  %9871 = vmatprep.subr.bf16.mxu0 %v11167_v4 }
 0xecd   : > { %9856 = vmatmul.mubr.msk.bf16.vlgmr.msra.gmra.mrb[100].mxu1 %vm2049_vm3, %v6058_v19  ;;  %9862 = vmatmul.mubr.msk.bf16.vlgmr.msra.gmra.mrb[60].mxu0 %vm2049_vm3, %v6059_v11 }
 0xece   : > { %9866 = vmatpush3.bf16.msra.mxu1 %v6207_v20  ;;  %9872 = vmatpush3.bf16.msra.mxu0 %v6253_v27  ;;  %v10550_v20 = vld [vmem:[#allocation8 + $0x140] ss:$8 sps:$4 sm:$0xff]  }
 0xecf   : > { %9867 = vmatprep.mubr.msk.bf16.mxu1 %vm11168_vm0, %v11167_v4  ;;  %v10853_v28 = vpop.eup %10852  ;;  %9877 = vmatprep.subr.bf16.mxu1 %v11167_v4 }
 0xed0   : > { %9873 = vmatprep.mubr.msk.bf16.mxu0 %vm11168_vm0, %v11167_v4  ;;  %v6052_v53 = vmul.f32 %v10853_v28, %v11979_v37  ;;  %9883 = vmatprep.subr.bf16.mxu0 %v11167_v4  ;;  %v10555_v28 = vld [vmem:[#allocation8 + $0x154] ss:$8 sps:$4 sm:$0xff]  }
 0xed2   : > { %v6060_v30 = vpack.c.bf16 %v6052_v53, %v6052_v53 }
 0xed5   : > { %9868 = vmatmul.mubr.msk.bf16.vlgmr.msra.gmra.mrb[104].mxu1 %vm2049_vm3, %v6060_v30  ;;  %v10558_v30 = vld [vmem:[#allocation8 + $0x164] ss:$8 sps:$4 sm:$0xff]  }
 0xed6   : > { %9878 = vmatpush3.bf16.msra.mxu1 %v6299_v32  ;;  %9879 = vmatprep.mubr.msk.bf16.mxu1 %vm11168_vm0, %v11167_v4  ;;  %v10556_v32 = vld [vmem:[#allocation8 + $0x160] ss:$8 sps:$4 sm:$0xff]  }
 0xed7   : > { %9889 = vmatprep.subr.bf16.mxu1 %v11167_v4 }
 0xef5   : > { %v6031_v33 = vpop.xlane.xlu1 %6030 }
 0xef6   : > { %10854 = vrcp.f32 %v6031_v33  ;;  %v10561_v33 = vld [vmem:[#allocation8 + $0x174] ss:$8 sps:$4 sm:$0xff]  }
 0xef9   : > { %v6037_v63 = vpop.xlane.xlu1 %6036  ;;  %v6034_v34 = vpop.xlane.xlu0 %6033 }
 0xefa   : > { %10856 = vrcp.f32 %v6037_v63  ;;  %v10559_v63 = vld [vmem:[#allocation8 + $0x170] ss:$8 sps:$4 sm:$0xff]  }
 0xefb   : > { %10858 = vrcp.f32 %v6034_v34  ;;  %v10564_v34 = vld [vmem:[#allocation8 + $0x184] ss:$8 sps:$4 sm:$0xff]  }
 0xefd   : > { %v6040_v35 = vpop.xlane.xlu0 %6039  ;;  %v5592_v45 = vpop.permute.xlu1 %5591 }
 0xefe   : > { %10860 = vrcp.f32 %v6040_v35  ;;  %v6391_v55 = vsel %vm2149_vm4, %v5592_v45, 0  ;;  %v10562_v35 = vld [vmem:[#allocation8 + $0x180] ss:$8 sps:$4 sm:$0xff]   ;;  %v10577_v45 = vld [vmem:[#allocation8 + $0x1d0] ss:$8 sps:$4 sm:$0xff]  }
 0xf00   : > { %v10855_v23 = vpop.eup %10854 }
 0xf01   : > { %v6053_v31 = vmul.f32 %v10855_v23, %v11992_v60  ;;  %v5590_v26 = vpop.permute.xlu0 %5589  ;;  %v10567_v23 = vld [vmem:[#allocation8 + $0x194] ss:$8 sps:$4 sm:$0xff]  }
 0xf02   : > { %v6345_v43 = vsel %vm2149_vm4, %v5590_v26, 0  ;;  %v10570_v26 = vld [vmem:[#allocation8 + $0x1a4] ss:$8 sps:$4 sm:$0xff]  }
 0xf03   : > { %v6061_v21 = vpack.c.bf16 %v6053_v31, %v6053_v31  ;;  %v10565_v31 = vld [vmem:[#allocation8 + $0x190] ss:$8 sps:$4 sm:$0xff]  }
 0xf04   : > { %v10857_v37 = vpop.eup %10856 }
 0xf05   : > { %v10859_v39 = vpop.eup %10858  ;;  %9874 = vmatmul.mubr.msk.bf16.vlgmr.msra.gmra.mrb[64].mxu0 %vm2049_vm3, %v6061_v21  ;;  %v6055_v46 = vmul.f32 %v10857_v37, %v11996_v42  ;;  %v10538_v42 = vld [vmem:[#allocation8 + $0x100] ss:$8 sps:$4 sm:$0xff]   ;;  %v10573_v37 = vld [vmem:[#allocation8 + $0x1b4] ss:$8 sps:$4 sm:$0xff]  }
 0xf06   : > { %v6054_v44 = vmul.f32 %v10859_v39, %v11998_v61  ;;  %9884 = vmatpush3.bf16.msra.mxu0 %v6345_v43  ;;  %9885 = vmatprep.mubr.msk.bf16.mxu0 %vm11168_vm0, %v11167_v4  ;;  %v10540_v61 = vld [vmem:[#allocation8 + $0x104] ss:$8 sps:$4 sm:$0xff]   ;;  %v10568_v21 = vld [vmem:[#allocation8 + $0x1a0] ss:$8 sps:$4 sm:$0xff]   ;;  %v10571_v39 = vld [vmem:[#allocation8 + $0x1b0] ss:$8 sps:$4 sm:$0xff]  }
 0xf07   : > { %v6063_v56 = vpack.c.bf16 %v6055_v46, %v6055_v46  ;;  %6646 = vmatprep.subr.bf16.mxu0 %v10540_v61  ;;  %v10576_v43 = vld [vmem:[#allocation8 + $0x1c4] ss:$8 sps:$4 sm:$0xff]   ;;  %v10579_v46 = vld [vmem:[#allocation8 + $0x1d4] ss:$8 sps:$4 sm:$0xff]  }
 0xf08   : > { %v6062_v49 = vpack.c.bf16 %v6054_v44, %v6054_v44  ;;  %v10861_v50 = vpop.eup %10860  ;;  %v10574_v44 = vld [vmem:[#allocation8 + $0x1c0] ss:$8 sps:$4 sm:$0xff]  }
 0xf09   : > { %v6056_v57 = vmul.f32 %v10861_v50, %v12004_v6  ;;  %v10582_v50 = vld [vmem:[#allocation8 + $0x1e4] ss:$8 sps:$4 sm:$0xff]  }
 0xf0a   : > { %9880 = vmatmul.mubr.msk.bf16.vlgmr.msra.gmra.mrb[108].mxu1 %vm2049_vm3, %v6062_v49  ;;  %v10580_v49 = vld [vmem:[#allocation8 + $0x1e0] ss:$8 sps:$4 sm:$0xff]  }
 0xf0b   : > { %9890 = vmatpush3.bf16.msra.mxu1 %v6391_v55  ;;  %9891 = vmatprep.mubr.msk.bf16.mxu1 %vm11168_vm0, %v11167_v4  ;;  %v6064_v58 = vpack.c.bf16 %v6056_v57, %v6056_v57  ;;  %v10583_v55 = vld [vmem:[#allocation8 + $0x1f0] ss:$8 sps:$4 sm:$0xff]  }
 0xf0d   : > { %9886 = vmatmul.mubr.msk.bf16.vlgmr.msra.gmra.mrb[68].mxu0 %vm2049_vm3, %v6063_v56  ;;  %v10585_v56 = vld [vmem:[#allocation8 + $0x1f4] ss:$8 sps:$4 sm:$0xff]  }
 0xf0e   : > { %6647 = vmatpush1.bf16.msra.mxu0 %v10538_v42 }
 0xf0f   : > { %6648 = vmatprep.subr.bf16.mxu0 %v10543_v5 }
 0xf12   : > { %9892 = vmatmul.mubr.msk.bf16.vlgmr.msra.gmra.mrb[112].mxu1 %vm2049_vm3, %v6064_v58  ;;  %6649 = vmatpush1.bf16.msra.mxu0 %v10541_v40 }
 0xf13   : > { %6650 = vmatprep.subr.bf16.mxu0 %v10546_v54 }
 0xf16   : > { %6651 = vmatpush1.bf16.msra.mxu0 %v10544_v62 }
 0xf17   : > { %6652 = vmatprep.subr.bf16.mxu0 %v10549_v2 }
 0xf1a   : > { %6653 = vmatpush1.bf16.msra.mxu0 %v10547_v24 }
 0xf1b   : > { %6654 = vmatprep.subr.bf16.mxu0 %v10552_v16 }
 0xf1e   : > { %6655 = vmatpush1.bf16.msra.mxu0 %v10550_v20 }
 0xf1f   : > { %6656 = vmatprep.subr.bf16.mxu0 %v10555_v28 }
 0xf22   : > { %6657 = vmatpush1.bf16.msra.mxu0 %v10553_v29 }
 0xf23   : > { %6658 = vmatprep.subr.bf16.mxu0 %v10558_v30 }
 0xf26   : > { %6659 = vmatpush1.bf16.msra.mxu0 %v10556_v32 }
 0xf27   : > { %6660 = vmatprep.subr.bf16.mxu0 %v10561_v33 }
 0xf2a   : > { %6661 = vmatpush1.bf16.msra.mxu0 %v10559_v63 }
 0xf2b   : > { %6662 = vmatprep.subr.bf16.mxu0 %v10564_v34 }
 0xf2e   : > { %6663 = vmatpush1.bf16.msra.mxu0 %v10562_v35 }
 0xf2f   : > { %6664 = vmatprep.subr.bf16.mxu0 %v10567_v23 }
 0xf32   : > { %6665 = vmatpush1.bf16.msra.mxu0 %v10565_v31 }
 0xf33   : > { %6666 = vmatprep.subr.bf16.mxu0 %v10570_v26 }
 0xf36   : > { %6667 = vmatpush1.bf16.msra.mxu0 %v10568_v21 }
 0xf37   : > { %6668 = vmatprep.subr.bf16.mxu0 %v10573_v37 }
 0xf3a   : > { %6669 = vmatpush1.bf16.msra.mxu0 %v10571_v39 }
 0xf3b   : > { %6670 = vmatprep.subr.bf16.mxu0 %v10576_v43  ;;  %v4675_v43 = vld [vmem:[#allocation10 + $0x400] sm:$0xff] }
 0xf3e   : > { %6671 = vmatpush1.bf16.msra.mxu0 %v10574_v44  ;;  %v4679_v44 = vld [vmem:[#allocation10 + $0x420] sm:$0xff] }
 0xf3f   : > { %6672 = vmatprep.subr.bf16.mxu0 %v10579_v46  ;;  %v4676_v46 = vld [vmem:[#allocation10 + $0x408] sm:$0xff] }
 0xf42   : > { %6673 = vmatpush1.bf16.msra.mxu0 %v10577_v45  ;;  %v9341_v45 = vcombine.low %v4675_v43, %v4679_v44 }
 0xf43   : > { %6674 = vmatprep.subr.bf16.mxu0 %v10582_v50  ;;  %v4680_v50 = vld [vmem:[#allocation10 + $0x428] sm:$0xff] }
 0xf46   : > { %v12045_v36 = vpop.f32.mrb[56].mxu0  ;;  %6675 = vmatpush1.bf16.msra.mxu0 %v10580_v49  ;;  %v9342_v49 = vcombine.high %v4675_v43, %v4679_v44  ;;  %v4731_v44 = vld [vmem:[#allocation10 + $0x5c0] sm:$0xff] }
 0xf47   : > { %v9851_v59 = vpop.f32.mrb[57].mxu0  ;;  %6676 = vmatprep.subr.bf16.mxu0 %v10585_v56  ;;  %v4687_v56 = vld [vmem:[#allocation10 + $0x460] sm:$0xff] }
 0xf48   : > { %v6108_v60 = vpop.f32.mrb[58].mxu0  ;;  %7414 = vmatprep.subr.bf16.mxu1 %v9342_v49  ;;  %v4736_v49 = vld [vmem:[#allocation10 + $0x5e8] sm:$0xff] }
 0xf49   : > { %v9852_v0 = vpop.f32.mrb[59].mxu0  ;;  %7415 = vmatpush1.bf16.msra.mxu1 %v9341_v45  ;;  %v4732_v45 = vld [vmem:[#allocation10 + $0x5c8] sm:$0xff] }
 0xf4a   : > { %6677 = vmatpush1.bf16.msra.mxu0 %v10583_v55  ;;  %v4683_v55 = vld [vmem:[#allocation10 + $0x440] sm:$0xff] }
 0xfa0   : > { %v6151_v4 = vpop.f32.mrb[100].mxu1  ;;  %v6197_v10 = vpop.f32.mrb[60].mxu0 }
 0xfa1   : > { %v6434_v6 = vpack.c.bf16 %v6151_v4, %v6151_v4  ;;  %v9857_v7 = vpop.f32.mrb[101].mxu1  ;;  %v9863_v17 = vpop.f32.mrb[61].mxu0  ;;  %v6435_v15 = vpack.c.bf16 %v6197_v10, %v6197_v10 }
 0xfa2   : > { %v6154_v12 = vpop.f32.mrb[102].mxu1  ;;  %v6200_v13 = vpop.f32.mrb[62].mxu0 }
 0xfa3   : > { %6442 = vrot.lane.b32.xlu1 %v6434_v6, %s11171_s30  ;;  %v9858_v1 = vpop.f32.mrb[103].mxu1  ;;  %v9864_v14 = vpop.f32.mrb[63].mxu0 }
 0xfa7   : > { %6445 = vrot.lane.b32.xlu1 %v6435_v15, %s11169_s12 }
 0xfa8   : > { %v6243_v18 = vpop.f32.mrb[104].mxu1 }
 0xfa9   : > { %v6436_v11 = vpack.c.bf16 %v6243_v18, %v6243_v18  ;;  %v9869_v19 = vpop.f32.mrb[105].mxu1  ;;  %v6433_v18 = vpack.c.bf16 %v12045_v36, %v12045_v36  ;;  %v9190_v36 = vld [vmem:[%s12210_s4 + $0x2] sm:$0x3] }
 0xfaa   : > { %v6246_v27 = vpop.f32.mrb[106].mxu1  ;;  %v6479_v32 = vrot.slane %v9190_v36, %v11620_v9  ;;  %v6483_v33 = vrot.slane %v9190_v36, %v11762_v3 }
 0xfab   : > { %6448 = vrot.lane.b32.xlu1 %v6436_v11, %s11170_s23  ;;  %v9870_v53 = vpop.f32.mrb[107].mxu1 }
 0xfd8   : > { %v6289_v57 = vpop.f32.mrb[64].mxu0 }
 0xfd9   : > { %v9875_v58 = vpop.f32.mrb[65].mxu0  ;;  %v6437_v16 = vpack.c.bf16 %v6289_v57, %v6289_v57  ;;  %v9343_v57 = vcombine.low %v4676_v46, %v4680_v50 }
 0xfda   : > { %v6292_v59 = vpop.f32.mrb[66].mxu0  ;;  %v9344_v58 = vcombine.high %v4676_v46, %v4680_v50  ;;  %v4735_v46 = vld [vmem:[#allocation10 + $0x5e0] sm:$0xff] }
 0xfdb   : > { %v9876_v60 = vpop.f32.mrb[67].mxu0  ;;  %v4684_v59 = vld [vmem:[#allocation10 + $0x448] sm:$0xff] }
 0xfdc   : > { %v4688_v60 = vld [vmem:[#allocation10 + $0x468] sm:$0xff]  ;;  %7455 = vmatprep.subr.bf16.mxu0 %v9344_v58  ;;  %v4739_v58 = vld [vmem:[#allocation10 + $0x600] sm:$0xff] }
 0xfdd   : > { %v6335_v0 = vpop.f32.mrb[108].mxu1 }
 0xfde   : > { %v6438_v42 = vpack.c.bf16 %v6335_v0, %v6335_v0  ;;  %v9881_v61 = vpop.f32.mrb[109].mxu1  ;;  %v4691_v0 = vld [vmem:[#allocation10 + $0x480] sm:$0xff] }
 0xfdf   : > { %v6338_v40 = vpop.f32.mrb[110].mxu1  ;;  %v4692_v61 = vld [vmem:[#allocation10 + $0x488] sm:$0xff] }
 0xfe0   : > { %6451 = vrot.lane.b32.xlu0 %v6438_v42, %s11171_s30  ;;  %v9882_v5 = vpop.f32.mrb[111].mxu1  ;;  %v6381_v54 = vpop.f32.mrb[68].mxu0  ;;  %v4695_v42 = vld [vmem:[#allocation10 + $0x4a0] sm:$0xff]  ;;  %v4696_v40 = vld [vmem:[#allocation10 + $0x4a8] sm:$0xff]  ;;  %s12269_s30 = sld [smem:[#allocation30_spill]] }
 0xfe1   : > { %v6439_v4 = vpack.c.bf16 %v6381_v54, %v6381_v54  ;;  %v9887_v6 = vpop.f32.mrb[69].mxu0  ;;  %v9349_v5 = vcombine.low %v4683_v55, %v4687_v56  ;;  %v9351_v54 = vcombine.low %v4684_v59, %v4688_v60 }
 0xfe2   : > { %v6384_v7 = vpop.f32.mrb[70].mxu0  ;;  %v9360_v6 = vcombine.high %v4692_v61, %v4696_v40 }
 0xfe3   : > { %v9888_v10 = vpop.f32.mrb[71].mxu0  ;;  %v4699_v7 = vld [vmem:[#allocation10 + $0x4c0] sm:$0xff] }
 0xfe4   : > { %6454 = vrot.lane.b32.xlu0 %v6439_v4, %s11169_s12  ;;  %v9358_v4 = vcombine.high %v4691_v0, %v4695_v42  ;;  %v4703_v10 = vld [vmem:[#allocation10 + $0x4e0] sm:$0xff] }
 0xfe5   : > { %v6427_v62 = vpop.f32.mrb[112].mxu1 }
 0xfe6   : > { %v6440_v12 = vpack.c.bf16 %v6427_v62, %v6427_v62  ;;  %v9893_v17 = vpop.f32.mrb[113].mxu1  ;;  %v4700_v62 = vld [vmem:[#allocation10 + $0x4c8] sm:$0xff]  ;;  %s12162_s17 = scalar_lea.hbm %s12269_s30, %s9613_s29 }
 0xfe7   : > { %v6430_v2 = vpop.f32.mrb[114].mxu1  ;;  %v9357_v17 = vcombine.low %v4691_v0, %v4695_v42  ;;  %v9397_v0 = vcombine.low %v4731_v44, %v4735_v46 }
 0xfe8   : > { %6457 = vrot.lane.b32.xlu0 %v6440_v12, %s11170_s23  ;;  %v9894_v13 = vpop.f32.mrb[115].mxu1  ;;  %v4704_v12 = vld [vmem:[#allocation10 + $0x4e8] sm:$0xff]  ;;  %v9359_v2 = vcombine.low %v4692_v61, %v4696_v40  ;;  %v4747_v40 = vld [vmem:[#allocation10 + $0x640] sm:$0xff] }
 0xfe9   : > { %v9366_v13 = vcombine.high %v4699_v7, %v4703_v10 }
0x1015   : > { %v6443_v1 = vpop.permute.xlu1 %6442 }
0x1016   : > { %v6461_v20 = vsel %vm1672_vm1, %v6433_v18, %v6443_v1  ;;  %v9368_v1 = vcombine.high %v4700_v62, %v4704_v12  ;;  %v9365_v18 = vcombine.low %v4699_v7, %v4703_v10 }
0x1019   : > { %v6446_v15 = vpop.permute.xlu1 %6445 }
0x101a   : > { %v6463_v53 = vsel %vm2544_vm5, %v6461_v20, %v6446_v15  ;;  %v4711_v15 = vld [vmem:[#allocation10 + $0x520] sm:$0xff] }
0x101d   : > { %v6449_v11 = vpop.permute.xlu1 %6448 }
0x101e   : > { %v6465_v30 = vsel %vm2547_vm6, %v6463_v53, %v6449_v11  ;;  %v9367_v11 = vcombine.low %v4700_v62, %v4704_v12  ;;  %v4716_v53 = vld [vmem:[#allocation10 + $0x548] sm:$0xff]  ;;  %v4755_v12 = vld [vmem:[#allocation10 + $0x680] sm:$0xff] }
0x1052   : > { %v6452_v14 = vpop.permute.xlu0 %6451 }
0x1053   : > { %v6469_v19 = vsel %vm1672_vm1, %v6437_v16, %v6452_v14  ;;  %v4707_v14 = vld [vmem:[#allocation10 + $0x500] sm:$0xff]  ;;  %v4712_v16 = vld [vmem:[#allocation10 + $0x528] sm:$0xff] }
0x1056   : > { %v6455_v24 = vpop.permute.xlu0 %6454 }
0x1057   : > { %v6471_v27 = vsel %vm2544_vm5, %v6469_v19, %v6455_v24  ;;  %v4708_v24 = vld [vmem:[#allocation10 + $0x508] sm:$0xff]  ;;  %v9374_v19 = vcombine.high %v4707_v14, %v4711_v15 }
0x1058   : > { %v9376_v20 = vcombine.high %v4708_v24, %v4712_v16  ;;  %v9375_v36 = vcombine.low %v4708_v24, %v4712_v16 }
0x105a   : > { %v6458_v28 = vpop.permute.xlu0 %6457 }
0x105b   : > { %v6473_v29 = vsel %vm2547_vm6, %v6471_v27, %v6458_v28  ;;  %v4715_v27 = vld [vmem:[#allocation10 + $0x540] sm:$0xff] }
0x105c   : > { %6678 = vmatprep.mubr.bf16.mxu0 %v6473_v29  ;;  %v4719_v28 = vld [vmem:[#allocation10 + $0x560] sm:$0xff]  ;;  %v4720_v29 = vld [vmem:[#allocation10 + $0x568] sm:$0xff] }
0x105d   : > { %6679 = vmatmul.mubr.bf16.vlgmr.msra.gmra.mrb[72].mxu0 %v6465_v30  ;;  %v9373_v30 = vcombine.low %v4707_v14, %v4711_v15 }
0x105e   : > { %7456 = vmatpush1.bf16.msra.mxu0 %v9343_v57  ;;  %v9400_v57 = vcombine.high %v4732_v45, %v4736_v49 }
0x1130   : > { %v6680_v63 = vpop.f32.mrb[72].mxu0 }
0x1131   : > { %v6681_v34 = vadd.f32 %v6680_v63, %v6479_v32  ;;  %v6682_v35 = vpop.f32.mrb[73].mxu0  ;;  %v9382_v32 = vcombine.high %v4715_v27, %v4719_v28  ;;  %v4723_v63 = vld [vmem:[#allocation10 + $0x580] sm:$0xff] }
0x1132   : > { %v6683_v23 = vadd.f32 %v6682_v35, %v6483_v33  ;;  %v6684_v31 = vpop.f32.mrb[74].mxu0  ;;  %v9384_v33 = vcombine.high %v4716_v53, %v4720_v29  ;;  %v4724_v35 = vld [vmem:[#allocation10 + $0x588] sm:$0xff] }
0x1133   : > { %v12067_v26 = vadd.f32 %v6681_v34, %v11871_v41  ;;  %v6685_v21 = vpop.f32.mrb[75].mxu0  ;;  %v9350_v41 = vcombine.high %v4683_v55, %v4687_v56  ;;  %v4727_v34 = vld [vmem:[#allocation10 + $0x5a0] sm:$0xff]  ;;  %v9381_v31 = vcombine.low %v4715_v27, %v4719_v28  ;;  %v9398_v56 = vcombine.high %v4731_v44, %v4735_v46 }
0x1134   : > { %v12070_v37 = vadd.f32 %v6683_v23, %v11869_v38  ;;  %v9352_v38 = vcombine.high %v4684_v59, %v4688_v60  ;;  %v4728_v23 = vld [vmem:[#allocation10 + $0x5a8] sm:$0xff]  ;;  %v9383_v21 = vcombine.low %v4716_v53, %v4720_v29  ;;  %v9389_v50 = vcombine.low %v4723_v63, %v4727_v34 }
0x1135   : > { %7416 = vmatprep.subr.bf16.mxu1 %v9350_v41  ;;  %v9392_v43 = vcombine.high %v4724_v35, %v4728_v23  ;;  %v9391_v55 = vcombine.low %v4724_v35, %v4728_v23  ;;  %v4743_v41 = vld [vmem:[#allocation10 + $0x620] sm:$0xff]  ;;  %v4740_v59 = vld [vmem:[#allocation10 + $0x608] sm:$0xff] }
0x1136   : > { %v6689_v39 = vadd.f32 %v12070_v37, %v12067_v26  ;;  %7457 = vmatprep.subr.bf16.mxu0 %v9352_v38  ;;  %7417 = vmatpush1.bf16.msra.mxu1 %v9349_v5  ;;  %v4744_v60 = vld [vmem:[#allocation10 + $0x628] sm:$0xff]  ;;  %v9399_v38 = vcombine.low %v4732_v45, %v4736_v49  ;;  %v9406_v42 = vcombine.high %v4739_v58, %v4743_v41  ;;  %v4751_v5 = vld [vmem:[#allocation10 + $0x660] sm:$0xff] }
0x1137   : > { %7458 = vmatpush1.bf16.msra.mxu0 %v9351_v54  ;;  %7418 = vmatprep.subr.bf16.mxu1 %v9358_v4  ;;  %v9408_v61 = vcombine.high %v4740_v59, %v4744_v60  ;;  %v4748_v54 = vld [vmem:[#allocation10 + $0x648] sm:$0xff]  ;;  %v9407_v7 = vcombine.low %v4740_v59, %v4744_v60  ;;  %v9414_v10 = vcombine.high %v4747_v40, %v4751_v5  ;;  %v4775_v23 = vld [vmem:[#allocation10 + $0x720] sm:$0xff] }
0x1138   : > { %6690 = vadd.xlane.f32.xlu0 %v6689_v39  ;;  %7459 = vmatprep.subr.bf16.mxu0 %v9360_v6  ;;  %v9390_v39 = vcombine.high %v4723_v63, %v4727_v34  ;;  %v4752_v4 = vld [vmem:[#allocation10 + $0x668] sm:$0xff]  ;;  %v9405_v6 = vcombine.low %v4739_v58, %v4743_v41  ;;  %v4779_v45 = vld [vmem:[#allocation10 + $0x740] sm:$0xff] }
0x1139   : > { %v9416_v62 = vcombine.high %v4748_v54, %v4752_v4  ;;  %v9415_v14 = vcombine.low %v4748_v54, %v4752_v4  ;;  %v4768_v63 = vld [vmem:[#allocation10 + $0x6e8] sm:$0xff]  ;;  %v4783_v49 = vld [vmem:[#allocation10 + $0x760] sm:$0xff] }
0x113a   : > { %7419 = vmatpush1.bf16.msra.mxu1 %v9357_v17  ;;  %v4759_v17 = vld [vmem:[#allocation10 + $0x6a0] sm:$0xff] }
0x113b   : > { %7460 = vmatpush1.bf16.msra.mxu0 %v9359_v2  ;;  %7420 = vmatprep.subr.bf16.mxu1 %v9366_v13  ;;  %v4756_v2 = vld [vmem:[#allocation10 + $0x688] sm:$0xff]  ;;  %v9422_v15 = vcombine.high %v4755_v12, %v4759_v17  ;;  %v9421_v16 = vcombine.low %v4755_v12, %v4759_v17  ;;  %v4787_v59 = vld [vmem:[#allocation10 + $0x780] sm:$0xff] }
0x113c   : > { %7461 = vmatprep.subr.bf16.mxu0 %v9368_v1  ;;  %v4760_v13 = vld [vmem:[#allocation10 + $0x6a8] sm:$0xff]  ;;  %v9413_v1 = vcombine.low %v4747_v40, %v4751_v5  ;;  %v4791_v60 = vld [vmem:[#allocation10 + $0x7a0] sm:$0xff] }
0x113d   : > { %v9424_v24 = vcombine.high %v4756_v2, %v4760_v13  ;;  %v4795_v54 = vld [vmem:[#allocation10 + $0x7c0] sm:$0xff] }
0x113e   : > { %7421 = vmatpush1.bf16.msra.mxu1 %v9365_v18  ;;  %v9423_v18 = vcombine.low %v4756_v2, %v4760_v13  ;;  %v4799_v4 = vld [vmem:[#allocation10 + $0x7e0] sm:$0xff]  ;;  %v4677_v2 = vld [vmem:[#allocation10 + $0x410] sm:$0xff] }
0x113f   : > { %7462 = vmatpush1.bf16.msra.mxu0 %v9367_v11  ;;  %7422 = vmatprep.subr.bf16.mxu1 %v9374_v19  ;;  %v4681_v13 = vld [vmem:[#allocation10 + $0x430] sm:$0xff] }
0x1140   : > { %7463 = vmatprep.subr.bf16.mxu0 %v9376_v20 }
0x1142   : > { %7423 = vmatpush1.bf16.msra.mxu1 %v9373_v30  ;;  %v4763_v30 = vld [vmem:[#allocation10 + $0x6c0] sm:$0xff] }
0x1143   : > { %7464 = vmatpush1.bf16.msra.mxu0 %v9375_v36  ;;  %7424 = vmatprep.subr.bf16.mxu1 %v9382_v32  ;;  %v4767_v36 = vld [vmem:[#allocation10 + $0x6e0] sm:$0xff]  ;;  %v4764_v32 = vld [vmem:[#allocation10 + $0x6c8] sm:$0xff] }
0x1144   : > { %7465 = vmatprep.subr.bf16.mxu0 %v9384_v33  ;;  %v9430_v33 = vcombine.high %v4763_v30, %v4767_v36  ;;  %v9429_v34 = vcombine.low %v4763_v30, %v4767_v36  ;;  %v9431_v35 = vcombine.low %v4764_v32, %v4768_v63 }
0x1146   : > { %7425 = vmatpush1.bf16.msra.mxu1 %v9381_v31  ;;  %v4772_v31 = vld [vmem:[#allocation10 + $0x708] sm:$0xff] }
0x1147   : > { %7466 = vmatpush1.bf16.msra.mxu0 %v9383_v21  ;;  %7426 = vmatprep.subr.bf16.mxu1 %v9390_v39  ;;  %v4776_v39 = vld [vmem:[#allocation10 + $0x728] sm:$0xff] }
0x1148   : > { %7467 = vmatprep.subr.bf16.mxu0 %v9392_v43  ;;  %v9439_v44 = vcombine.low %v4772_v31, %v4776_v39  ;;  %v9440_v46 = vcombine.high %v4772_v31, %v4776_v39  ;;  %v4689_v39 = vld [vmem:[#allocation10 + $0x470] sm:$0xff] }
0x114a   : > { %7427 = vmatpush1.bf16.msra.mxu1 %v9389_v50  ;;  %v4780_v50 = vld [vmem:[#allocation10 + $0x748] sm:$0xff] }
0x114b   : > { %7468 = vmatpush1.bf16.msra.mxu0 %v9391_v55  ;;  %7428 = vmatprep.subr.bf16.mxu1 %v9398_v56  ;;  %v9446_v55 = vcombine.high %v4779_v45, %v4783_v49  ;;  %v4784_v56 = vld [vmem:[#allocation10 + $0x768] sm:$0xff] }
0x114c   : > { %7469 = vmatprep.subr.bf16.mxu0 %v9400_v57  ;;  %v9445_v57 = vcombine.low %v4779_v45, %v4783_v49  ;;  %v9447_v58 = vcombine.low %v4780_v50, %v4784_v56  ;;  %v9448_v41 = vcombine.high %v4780_v50, %v4784_v56  ;;  %v4697_v50 = vld [vmem:[#allocation10 + $0x4b0] sm:$0xff]  ;;  %v4698_v56 = vld [vmem:[#allocation10 + $0x4b8] sm:$0xff] }
0x114e   : > { %7429 = vmatpush1.bf16.msra.mxu1 %v9397_v0  ;;  %v4788_v0 = vld [vmem:[#allocation10 + $0x788] sm:$0xff] }
0x114f   : > { %7470 = vmatpush1.bf16.msra.mxu0 %v9399_v38  ;;  %7430 = vmatprep.subr.bf16.mxu1 %v9406_v42  ;;  %v9454_v38 = vcombine.high %v4787_v59, %v4791_v60  ;;  %v4792_v42 = vld [vmem:[#allocation10 + $0x7a8] sm:$0xff] }
0x1150   : > { %7471 = vmatprep.subr.bf16.mxu0 %v9408_v61  ;;  %v9453_v61 = vcombine.low %v4787_v59, %v4791_v60  ;;  %v9455_v40 = vcombine.low %v4788_v0, %v4792_v42  ;;  %v9456_v5 = vcombine.high %v4788_v0, %v4792_v42  ;;  %v4701_v60 = vld [vmem:[#allocation10 + $0x4d0] sm:$0xff]  ;;  %v4706_v42 = vld [vmem:[#allocation10 + $0x4f8] sm:$0xff] }
0x1151   : > { %v4705_v0 = vld [vmem:[#allocation10 + $0x4f0] sm:$0xff] }
0x1152   : > { %7431 = vmatpush1.bf16.msra.mxu1 %v9405_v6  ;;  %v4796_v6 = vld [vmem:[#allocation10 + $0x7c8] sm:$0xff] }
0x1153   : > { %7472 = vmatpush1.bf16.msra.mxu0 %v9407_v7  ;;  %7432 = vmatprep.subr.bf16.mxu1 %v9414_v10  ;;  %v9462_v7 = vcombine.high %v4795_v54, %v4799_v4  ;;  %v4800_v10 = vld [vmem:[#allocation10 + $0x7e8] sm:$0xff] }
0x1154   : > { %7473 = vmatprep.subr.bf16.mxu0 %v9416_v62  ;;  %v9461_v62 = vcombine.low %v4795_v54, %v4799_v4  ;;  %v9464_v12 = vcombine.high %v4796_v6, %v4800_v10  ;;  %v9463_v17 = vcombine.low %v4796_v6, %v4800_v10  ;;  %v4709_v4 = vld [vmem:[#allocation10 + $0x510] sm:$0xff]  ;;  %v4714_v10 = vld [vmem:[#allocation10 + $0x538] sm:$0xff] }
0x1155   : > { %v4713_v6 = vld [vmem:[#allocation10 + $0x530] sm:$0xff] }
0x1156   : > { %7433 = vmatpush1.bf16.msra.mxu1 %v9413_v1  ;;  %v4678_v1 = vld [vmem:[#allocation10 + $0x418] sm:$0xff] }
0x1157   : > { %7474 = vmatpush1.bf16.msra.mxu0 %v9415_v14  ;;  %7434 = vmatprep.subr.bf16.mxu1 %v9422_v15  ;;  %v9346_v14 = vcombine.high %v4677_v2, %v4681_v13  ;;  %v4682_v15 = vld [vmem:[#allocation10 + $0x438] sm:$0xff] }
0x1158   : > { %7475 = vmatprep.subr.bf16.mxu0 %v9424_v24  ;;  %v9345_v24 = vcombine.low %v4677_v2, %v4681_v13  ;;  %v4717_v13 = vld [vmem:[#allocation10 + $0x550] sm:$0xff] }
0x115a   : > { %7435 = vmatpush1.bf16.msra.mxu1 %v9421_v16  ;;  %v9347_v16 = vcombine.low %v4678_v1, %v4682_v15 }
0x115b   : > { %7476 = vmatpush1.bf16.msra.mxu0 %v9423_v18  ;;  %7436 = vmatprep.subr.bf16.mxu1 %v9430_v33  ;;  %v9348_v18 = vcombine.high %v4678_v1, %v4682_v15  ;;  %v4721_v1 = vld [vmem:[#allocation10 + $0x570] sm:$0xff]  ;;  %v4722_v15 = vld [vmem:[#allocation10 + $0x578] sm:$0xff] }
0x115e   : > { %7437 = vmatpush1.bf16.msra.mxu1 %v9429_v34 }
0x11c5   : > { %v6691_v11 = vpop.xlane.xlu0 %6690 }
0x11c6   : > { %v6692_v19 = vmul.f32 0.00390625, %v6691_v11 }
0x11c8   : > { %v12075_v20 = vsub.f32 %v12067_v26, %v6692_v19  ;;  %v12078_v27 = vsub.f32 %v12070_v37, %v6692_v19  ;;  %v9432_v26 = vcombine.high %v4764_v32, %v4768_v63  ;;  %v4771_v37 = vld [vmem:[#allocation10 + $0x700] sm:$0xff] }
0x11c9   : > { %v9438_v21 = vcombine.high %v4771_v37, %v4775_v23  ;;  %v9437_v43 = vcombine.low %v4771_v37, %v4775_v23 }
0x11ca   : > { %v6695_v28 = vmul.f32 %v12075_v20, %v12075_v20  ;;  %v6696_v53 = vmul.f32 %v12078_v27, %v12078_v27  ;;  %7477 = vmatprep.subr.bf16.mxu0 %v9432_v26 }
0x11cb   : > { %7478 = vmatpush1.bf16.msra.mxu0 %v9431_v35  ;;  %7438 = vmatprep.subr.bf16.mxu1 %v9438_v21  ;;  %v4685_v21 = vld [vmem:[#allocation10 + $0x450] sm:$0xff] }
0x11cc   : > { %v6697_v29 = vadd.f32 %v6696_v53, %v6695_v28  ;;  %7479 = vmatprep.subr.bf16.mxu0 %v9440_v46  ;;  %7439 = vmatpush1.bf16.msra.mxu1 %v9437_v43  ;;  %v9191_v53 = vld [vmem:[%s12211_s5 + $0x2] sm:$0x3]  ;;  %v4686_v43 = vld [vmem:[#allocation10 + $0x458] sm:$0xff]  ;;  %v9354_v45 = vcombine.high %v4685_v21, %v4689_v39 }
0x11cd   : > { %7440 = vmatprep.subr.bf16.mxu1 %v9446_v55  ;;  %v6713_v30 = vrot.slane %v9191_v53, %v11762_v3  ;;  %v6709_v36 = vrot.slane %v9191_v53, %v11620_v9  ;;  %v4694_v55 = vld [vmem:[#allocation10 + $0x498] sm:$0xff] }
0x11ce   : > { %6698 = vadd.xlane.f32.xlu1 %v6697_v29  ;;  %v9192_v29 = vld [vmem:[%s12263_s26 + $0x2] sm:$0x3]  ;;  %v9364_v59 = vcombine.high %v4694_v55, %v4698_v56  ;;  %v4726_v53 = vld [vmem:[#allocation10 + $0x598] sm:$0xff] }
0x11cf   : > { %7480 = vmatpush1.bf16.msra.mxu0 %v9439_v44  ;;  %v6726_v34 = vrot.slane %v9192_v29, %v11762_v3  ;;  %v6722_v35 = vrot.slane %v9192_v29, %v11620_v9  ;;  %v4690_v44 = vld [vmem:[#allocation10 + $0x478] sm:$0xff] }
0x11d0   : > { %7481 = vmatprep.subr.bf16.mxu0 %v9448_v41  ;;  %7441 = vmatpush1.bf16.msra.mxu1 %v9445_v57  ;;  %v9356_v49 = vcombine.high %v4686_v43, %v4690_v44  ;;  %v9353_v57 = vcombine.low %v4685_v21, %v4689_v39  ;;  %v4730_v29 = vld [vmem:[#allocation10 + $0x5b8] sm:$0xff] }
0x11d1   : > { %7442 = vmatprep.subr.bf16.mxu1 %v9454_v38  ;;  %v4702_v38 = vld [vmem:[#allocation10 + $0x4d8] sm:$0xff]  ;;  %v9395_v21 = vcombine.low %v4726_v53, %v4730_v29 }
0x11d2   : > { %v9372_v54 = vcombine.high %v4702_v38, %v4706_v42 }
0x11d3   : > { %7482 = vmatpush1.bf16.msra.mxu0 %v9447_v58  ;;  %v9355_v58 = vcombine.low %v4686_v43, %v4690_v44  ;;  %v4741_v44 = vld [vmem:[#allocation10 + $0x610] sm:$0xff] }
0x11d4   : > { %7483 = vmatprep.subr.bf16.mxu0 %v9456_v5  ;;  %7443 = vmatpush1.bf16.msra.mxu1 %v9453_v61  ;;  %v9370_v5 = vcombine.high %v4701_v60, %v4705_v0 }
0x11d5   : > { %7444 = vmatprep.subr.bf16.mxu1 %v9462_v7  ;;  %v4710_v7 = vld [vmem:[#allocation10 + $0x518] sm:$0xff] }
0x11d6   : > { %v9380_v2 = vcombine.high %v4710_v7, %v4714_v10 }
0x11d7   : > { %7484 = vmatpush1.bf16.msra.mxu0 %v9455_v40  ;;  %v9363_v40 = vcombine.low %v4694_v55, %v4698_v56 }
0x11d8   : > { %7485 = vmatprep.subr.bf16.mxu0 %v9464_v12  ;;  %7445 = vmatpush1.bf16.msra.mxu1 %v9461_v62  ;;  %v9369_v62 = vcombine.low %v4701_v60, %v4705_v0  ;;  %v9371_v12 = vcombine.low %v4702_v38, %v4706_v42 }
0x11d9   : > { %7496 = vmatprep.subr.bf16.mxu1 %v9346_v14  ;;  %v4718_v14 = vld [vmem:[#allocation10 + $0x558] sm:$0xff] }
0x11db   : > { %7486 = vmatpush1.bf16.msra.mxu0 %v9463_v17  ;;  %v9378_v17 = vcombine.high %v4709_v4, %v4713_v6 }
0x11dc   : > { %7537 = vmatprep.subr.bf16.mxu0 %v9348_v18  ;;  %v9386_v18 = vcombine.high %v4717_v13, %v4721_v1 }
0x125b   : > { %v6699_v11 = vpop.xlane.xlu1 %6698 }
0x125c   : > { %v6700_v19 = vmul.f32 0.00390625, %v6699_v11  ;;  %v9388_v11 = vcombine.high %v4718_v14, %v4722_v15 }
0x125e   : > { %v6701_v28 = vadd.f32 1e-05, %v6700_v19  ;;  %v4725_v19 = vld [vmem:[#allocation10 + $0x590] sm:$0xff] }
0x1260   : > { %10862 = vrsqrt.f32 %v6701_v28  ;;  %v4729_v28 = vld [vmem:[#allocation10 + $0x5b0] sm:$0xff] }
0x126a   : > { %v10863_v32 = vpop.eup %10862 }
0x126b   : > { %v6703_v33 = vmul.f32 %v10863_v32, %v12075_v20  ;;  %v6704_v63 = vmul.f32 %v10863_v32, %v12078_v27  ;;  %v4693_v27 = vld [vmem:[#allocation10 + $0x490] sm:$0xff]  ;;  %v9394_v32 = vcombine.high %v4725_v19, %v4729_v28 }
0x126c   : > { %v9362_v41 = vcombine.high %v4693_v27, %v4697_v50  ;;  %v9361_v61 = vcombine.low %v4693_v27, %v4697_v50  ;;  %v4742_v27 = vld [vmem:[#allocation10 + $0x618] sm:$0xff] }
0x126d   : > { %v6717_v26 = vmul.f32 %v6713_v30, %v6704_v63  ;;  %v6716_v37 = vmul.f32 %v6709_v36, %v6703_v33  ;;  %v9385_v30 = vcombine.low %v4717_v13, %v4721_v1  ;;  %v9387_v36 = vcombine.low %v4718_v14, %v4722_v15  ;;  %v4733_v63 = vld [vmem:[#allocation10 + $0x5d0] sm:$0xff] }
0x126e   : > { %v9396_v33 = vcombine.high %v4726_v53, %v4730_v29 }
0x126f   : > { %v12096_v23 = vadd.f32 %v6726_v34, %v6717_v26  ;;  %v12098_v31 = vadd.f32 %v6722_v35, %v6716_v37  ;;  %v4737_v34 = vld [vmem:[#allocation10 + $0x5f0] sm:$0xff]  ;;  %v4734_v35 = vld [vmem:[#allocation10 + $0x5d8] sm:$0xff]  ;;  %v9393_v37 = vcombine.low %v4725_v19, %v4729_v28 }
0x1270   : > { %v4738_v26 = vld [vmem:[#allocation10 + $0x5f8] sm:$0xff]  ;;  %v9402_v39 = vcombine.high %v4733_v63, %v4737_v34 }
0x1271   : > { %v6732_v46 = vpack.c.bf16 %v12096_v23, %v12096_v23  ;;  %v12104_v20 = vpack.c.bf16 %v12098_v31, %v12098_v31  ;;  %v9404_v43 = vcombine.high %v4734_v35, %v4738_v26  ;;  %v9403_v50 = vcombine.low %v4734_v35, %v4738_v26 }
0x1273   : > { %7446 = vmatprep.mubr.bf16.mxu1 %v6732_v46  ;;  %7487 = vmatprep.mubr.bf16.mxu0 %v6732_v46 }
0x1274   : > { %7447 = vmatmul.mubr.bf16.vlgmr.msra.gmra.mrb[116].mxu1 %v12104_v20  ;;  %7488 = vmatmul.mubr.bf16.vlgmr.msra.gmra.mrb[76].mxu0 %v12104_v20 }
0x1275   : > { %7497 = vmatpush1.bf16.msra.mxu1 %v9345_v24  ;;  %7538 = vmatpush1.bf16.msra.mxu0 %v9347_v16  ;;  %v9377_v24 = vcombine.low %v4709_v4, %v4713_v6  ;;  %v9379_v16 = vcombine.low %v4710_v7, %v4714_v10 }
0x1276   : > { %7528 = vmatprep.mubr.bf16.mxu1 %v6732_v46  ;;  %7569 = vmatprep.mubr.bf16.mxu0 %v6732_v46  ;;  %v4745_v46 = vld [vmem:[#allocation10 + $0x630] sm:$0xff] }
0x1277   : > { %7498 = vmatprep.subr.bf16.mxu1 %v9354_v45  ;;  %7539 = vmatprep.subr.bf16.mxu0 %v9356_v49  ;;  %v4746_v45 = vld [vmem:[#allocation10 + $0x638] sm:$0xff]  ;;  %v9401_v49 = vcombine.low %v4733_v63, %v4737_v34  ;;  %v9410_v55 = vcombine.high %v4741_v44, %v4745_v46  ;;  %v9409_v60 = vcombine.low %v4741_v44, %v4745_v46 }
0x1278   : > { %v9412_v56 = vcombine.high %v4742_v27, %v4746_v45  ;;  %v9411_v0 = vcombine.low %v4742_v27, %v4746_v45 }
0x1279   : > { %7499 = vmatpush1.bf16.msra.mxu1 %v9353_v57  ;;  %7540 = vmatpush1.bf16.msra.mxu0 %v9355_v58  ;;  %v4749_v57 = vld [vmem:[#allocation10 + $0x650] sm:$0xff] }
0x127a   : > { %7500 = vmatprep.subr.bf16.mxu1 %v9362_v41  ;;  %7541 = vmatprep.subr.bf16.mxu0 %v9364_v59  ;;  %v4753_v58 = vld [vmem:[#allocation10 + $0x670] sm:$0xff]  ;;  %v4750_v41 = vld [vmem:[#allocation10 + $0x658] sm:$0xff] }
0x127b   : > { %v4754_v59 = vld [vmem:[#allocation10 + $0x678] sm:$0xff]  ;;  %v9418_v38 = vcombine.high %v4749_v57, %v4753_v58  ;;  %v9417_v4 = vcombine.low %v4749_v57, %v4753_v58 }
0x127c   : > { %v9420_v42 = vcombine.high %v4750_v41, %v4754_v59  ;;  %v9419_v6 = vcombine.low %v4750_v41, %v4754_v59 }
0x127d   : > { %7501 = vmatpush1.bf16.msra.mxu1 %v9361_v61  ;;  %7542 = vmatpush1.bf16.msra.mxu0 %v9363_v40  ;;  %v4757_v61 = vld [vmem:[#allocation10 + $0x690] sm:$0xff] }
0x127e   : > { %7502 = vmatprep.subr.bf16.mxu1 %v9370_v5  ;;  %7543 = vmatprep.subr.bf16.mxu0 %v9372_v54  ;;  %v4761_v40 = vld [vmem:[#allocation10 + $0x6b0] sm:$0xff]  ;;  %v4758_v5 = vld [vmem:[#allocation10 + $0x698] sm:$0xff] }
0x127f   : > { %v4762_v54 = vld [vmem:[#allocation10 + $0x6b8] sm:$0xff]  ;;  %v9426_v7 = vcombine.high %v4757_v61, %v4761_v40  ;;  %v9425_v13 = vcombine.low %v4757_v61, %v4761_v40  ;;  %v10586_v61 = vld [vmem:[#allocation11 + $0x400] ss:$8 sps:$4 sm:$0xff]  }
0x1280   : > { %v9428_v10 = vcombine.high %v4758_v5, %v4762_v54  ;;  %v9427_v1 = vcombine.low %v4758_v5, %v4762_v54  ;;  %v10589_v40 = vld [vmem:[#allocation11 + $0x500] ss:$8 sps:$4 sm:$0xff]   ;;  %v10594_v5 = vld [vmem:[#allocation11 + $0x414] ss:$8 sps:$4 sm:$0xff]  }
0x1281   : > { %7503 = vmatpush1.bf16.msra.mxu1 %v9369_v62  ;;  %7544 = vmatpush1.bf16.msra.mxu0 %v9371_v12  ;;  %v4765_v62 = vld [vmem:[#allocation10 + $0x6d0] sm:$0xff] }
0x1282   : > { %7504 = vmatprep.subr.bf16.mxu1 %v9378_v17  ;;  %7545 = vmatprep.subr.bf16.mxu0 %v9380_v2  ;;  %v4769_v12 = vld [vmem:[#allocation10 + $0x6f0] sm:$0xff]  ;;  %v4766_v17 = vld [vmem:[#allocation10 + $0x6d8] sm:$0xff] }
0x1283   : > { %v4770_v2 = vld [vmem:[#allocation10 + $0x6f8] sm:$0xff]  ;;  %v9434_v14 = vcombine.high %v4765_v62, %v4769_v12  ;;  %v9433_v19 = vcombine.low %v4765_v62, %v4769_v12  ;;  %v10598_v62 = vld [vmem:[#allocation11 + $0x420] ss:$8 sps:$4 sm:$0xff]  }
0x1284   : > { %v9436_v15 = vcombine.high %v4766_v17, %v4770_v2  ;;  %v9435_v28 = vcombine.low %v4766_v17, %v4770_v2  ;;  %v10597_v54 = vld [vmem:[#allocation11 + $0x514] ss:$8 sps:$4 sm:$0xff]   ;;  %v10601_v12 = vld [vmem:[#allocation11 + $0x520] ss:$8 sps:$4 sm:$0xff]  }
0x1285   : > { %7505 = vmatpush1.bf16.msra.mxu1 %v9377_v24  ;;  %7546 = vmatpush1.bf16.msra.mxu0 %v9379_v16  ;;  %v4773_v24 = vld [vmem:[#allocation10 + $0x710] sm:$0xff] }
0x1286   : > { %7506 = vmatprep.subr.bf16.mxu1 %v9386_v18  ;;  %7547 = vmatprep.subr.bf16.mxu0 %v9388_v11  ;;  %v4777_v16 = vld [vmem:[#allocation10 + $0x730] sm:$0xff]  ;;  %v4774_v18 = vld [vmem:[#allocation10 + $0x718] sm:$0xff] }
0x1287   : > { %v4778_v11 = vld [vmem:[#allocation10 + $0x738] sm:$0xff]  ;;  %v9442_v53 = vcombine.high %v4773_v24, %v4777_v16  ;;  %v9441_v63 = vcombine.low %v4773_v24, %v4777_v16  ;;  %v10613_v24 = vld [vmem:[#allocation11 + $0x540] ss:$8 sps:$4 sm:$0xff]  }
0x1288   : > { %v9444_v29 = vcombine.high %v4774_v18, %v4778_v11  ;;  %v9443_v34 = vcombine.low %v4774_v18, %v4778_v11  ;;  %v10606_v17 = vld [vmem:[#allocation11 + $0x434] ss:$8 sps:$4 sm:$0xff]   ;;  %v10616_v11 = vld [vmem:[#allocation11 + $0x450] ss:$8 sps:$4 sm:$0xff]  }
0x1289   : > { %7507 = vmatpush1.bf16.msra.mxu1 %v9385_v30  ;;  %7548 = vmatpush1.bf16.msra.mxu0 %v9387_v36  ;;  %v4781_v30 = vld [vmem:[#allocation10 + $0x750] sm:$0xff] }
0x128a   : > { %7508 = vmatprep.subr.bf16.mxu1 %v9394_v32  ;;  %7549 = vmatprep.subr.bf16.mxu0 %v9396_v33  ;;  %v4785_v36 = vld [vmem:[#allocation10 + $0x770] sm:$0xff]  ;;  %v4782_v32 = vld [vmem:[#allocation10 + $0x758] sm:$0xff] }
0x128b   : > { %v4786_v33 = vld [vmem:[#allocation10 + $0x778] sm:$0xff]  ;;  %v9450_v35 = vcombine.high %v4781_v30, %v4785_v36  ;;  %v9449_v44 = vcombine.low %v4781_v30, %v4785_v36  ;;  %v10625_v30 = vld [vmem:[#allocation11 + $0x560] ss:$8 sps:$4 sm:$0xff]  }
0x128c   : > { %v9452_v26 = vcombine.high %v4782_v32, %v4786_v33  ;;  %v9451_v46 = vcombine.low %v4782_v32, %v4786_v33  ;;  %v10609_v2 = vld [vmem:[#allocation11 + $0x534] ss:$8 sps:$4 sm:$0xff]   ;;  %v10628_v33 = vld [vmem:[#allocation11 + $0x470] ss:$8 sps:$4 sm:$0xff]  }
0x128d   : > { %7509 = vmatpush1.bf16.msra.mxu1 %v9393_v37  ;;  %7550 = vmatpush1.bf16.msra.mxu0 %v9395_v21  ;;  %v4789_v37 = vld [vmem:[#allocation10 + $0x790] sm:$0xff] }
0x128e   : > { %7510 = vmatprep.subr.bf16.mxu1 %v9402_v39  ;;  %7551 = vmatprep.subr.bf16.mxu0 %v9404_v43  ;;  %v4793_v21 = vld [vmem:[#allocation10 + $0x7b0] sm:$0xff]  ;;  %v4790_v39 = vld [vmem:[#allocation10 + $0x798] sm:$0xff] }
0x128f   : > { %v4794_v43 = vld [vmem:[#allocation10 + $0x7b8] sm:$0xff]  ;;  %v9458_v27 = vcombine.high %v4789_v37, %v4793_v21  ;;  %v9457_v57 = vcombine.low %v4789_v37, %v4793_v21  ;;  %v10637_v37 = vld [vmem:[#allocation11 + $0x580] ss:$8 sps:$4 sm:$0xff]  }
0x1290   : > { %v9460_v45 = vcombine.high %v4790_v39, %v4794_v43  ;;  %v9459_v58 = vcombine.low %v4790_v39, %v4794_v43  ;;  %v10618_v16 = vld [vmem:[#allocation11 + $0x454] ss:$8 sps:$4 sm:$0xff]   ;;  %v10640_v43 = vld [vmem:[#allocation11 + $0x490] ss:$8 sps:$4 sm:$0xff]  }
0x1291   : > { %7511 = vmatpush1.bf16.msra.mxu1 %v9401_v49  ;;  %7552 = vmatpush1.bf16.msra.mxu0 %v9403_v50  ;;  %v4797_v49 = vld [vmem:[#allocation10 + $0x7d0] sm:$0xff] }
0x1292   : > { %7512 = vmatprep.subr.bf16.mxu1 %v9410_v55  ;;  %7553 = vmatprep.subr.bf16.mxu0 %v9412_v56  ;;  %v4801_v50 = vld [vmem:[#allocation10 + $0x7f0] sm:$0xff]  ;;  %v4798_v55 = vld [vmem:[#allocation10 + $0x7d8] sm:$0xff] }
0x1293   : > { %v4802_v56 = vld [vmem:[#allocation10 + $0x7f8] sm:$0xff]  ;;  %v9466_v41 = vcombine.high %v4797_v49, %v4801_v50 }
0x1294   : > { %v9468_v59 = vcombine.high %v4798_v55, %v4802_v56  ;;  %v10621_v18 = vld [vmem:[#allocation11 + $0x554] ss:$8 sps:$4 sm:$0xff]  }
0x1295   : > { %7513 = vmatpush1.bf16.msra.mxu1 %v9409_v60  ;;  %7554 = vmatpush1.bf16.msra.mxu0 %v9411_v0  ;;  %v9465_v60 = vcombine.low %v4797_v49, %v4801_v50  ;;  %v9467_v0 = vcombine.low %v4798_v55, %v4802_v56  ;;  %v10630_v36 = vld [vmem:[#allocation11 + $0x474] ss:$8 sps:$4 sm:$0xff]   ;;  %v10649_v49 = vld [vmem:[#allocation11 + $0x5a0] ss:$8 sps:$4 sm:$0xff]   ;;  %v10652_v56 = vld [vmem:[#allocation11 + $0x4b0] ss:$8 sps:$4 sm:$0xff]  }
0x1296   : > { %7514 = vmatprep.subr.bf16.mxu1 %v9418_v38  ;;  %7555 = vmatprep.subr.bf16.mxu0 %v9420_v42  ;;  %v10588_v38 = vld [vmem:[#allocation11 + $0x404] ss:$8 sps:$4 sm:$0xff]   ;;  %v10633_v32 = vld [vmem:[#allocation11 + $0x574] ss:$8 sps:$4 sm:$0xff]  }
0x1297   : > { %v10591_v42 = vld [vmem:[#allocation11 + $0x504] ss:$8 sps:$4 sm:$0xff]   ;;  %v10642_v21 = vld [vmem:[#allocation11 + $0x494] ss:$8 sps:$4 sm:$0xff]  }
0x1298   : > { %v10645_v39 = vld [vmem:[#allocation11 + $0x594] ss:$8 sps:$4 sm:$0xff]  }
0x1299   : > { %7515 = vmatpush1.bf16.msra.mxu1 %v9417_v4  ;;  %7556 = vmatpush1.bf16.msra.mxu0 %v9419_v6  ;;  %v10592_v4 = vld [vmem:[#allocation11 + $0x410] ss:$8 sps:$4 sm:$0xff]   ;;  %v10654_v50 = vld [vmem:[#allocation11 + $0x4b4] ss:$8 sps:$4 sm:$0xff]  }
0x129a   : > { %7516 = vmatprep.subr.bf16.mxu1 %v9426_v7  ;;  %7557 = vmatprep.subr.bf16.mxu0 %v9428_v10  ;;  %v10595_v6 = vld [vmem:[#allocation11 + $0x510] ss:$8 sps:$4 sm:$0xff]   ;;  %v10600_v7 = vld [vmem:[#allocation11 + $0x424] ss:$8 sps:$4 sm:$0xff]   ;;  %v10657_v55 = vld [vmem:[#allocation11 + $0x5b4] ss:$8 sps:$4 sm:$0xff]  }
0x129b   : > { %v10603_v10 = vld [vmem:[#allocation11 + $0x524] ss:$8 sps:$4 sm:$0xff]  }
0x129d   : > { %7517 = vmatpush1.bf16.msra.mxu1 %v9425_v13  ;;  %7558 = vmatpush1.bf16.msra.mxu0 %v9427_v1  ;;  %v10604_v13 = vld [vmem:[#allocation11 + $0x430] ss:$8 sps:$4 sm:$0xff]   ;;  %v10612_v1 = vld [vmem:[#allocation11 + $0x444] ss:$8 sps:$4 sm:$0xff]  }
0x129e   : > { %7518 = vmatprep.subr.bf16.mxu1 %v9434_v14  ;;  %7559 = vmatprep.subr.bf16.mxu0 %v9436_v15  ;;  %v10615_v14 = vld [vmem:[#allocation11 + $0x544] ss:$8 sps:$4 sm:$0xff]   ;;  %v10610_v15 = vld [vmem:[#allocation11 + $0x440] ss:$8 sps:$4 sm:$0xff]  }
0x12a1   : > { %7519 = vmatpush1.bf16.msra.mxu1 %v9433_v19  ;;  %7560 = vmatpush1.bf16.msra.mxu0 %v9435_v28  ;;  %v10619_v19 = vld [vmem:[#allocation11 + $0x550] ss:$8 sps:$4 sm:$0xff]   ;;  %v10624_v28 = vld [vmem:[#allocation11 + $0x464] ss:$8 sps:$4 sm:$0xff]  }
0x12a2   : > { %7520 = vmatprep.subr.bf16.mxu1 %v9442_v53  ;;  %7561 = vmatprep.subr.bf16.mxu0 %v9444_v29  ;;  %v10627_v53 = vld [vmem:[#allocation11 + $0x564] ss:$8 sps:$4 sm:$0xff]   ;;  %v10622_v29 = vld [vmem:[#allocation11 + $0x460] ss:$8 sps:$4 sm:$0xff]  }
0x12a5   : > { %7521 = vmatpush1.bf16.msra.mxu1 %v9441_v63  ;;  %7562 = vmatpush1.bf16.msra.mxu0 %v9443_v34  ;;  %v10631_v63 = vld [vmem:[#allocation11 + $0x570] ss:$8 sps:$4 sm:$0xff]   ;;  %v10636_v34 = vld [vmem:[#allocation11 + $0x484] ss:$8 sps:$4 sm:$0xff]  }
0x12a6   : > { %7522 = vmatprep.subr.bf16.mxu1 %v9450_v35  ;;  %7563 = vmatprep.subr.bf16.mxu0 %v9452_v26  ;;  %v10639_v35 = vld [vmem:[#allocation11 + $0x584] ss:$8 sps:$4 sm:$0xff]   ;;  %v10634_v26 = vld [vmem:[#allocation11 + $0x480] ss:$8 sps:$4 sm:$0xff]  }
0x12a9   : > { %7523 = vmatpush1.bf16.msra.mxu1 %v9449_v44  ;;  %7564 = vmatpush1.bf16.msra.mxu0 %v9451_v46  ;;  %v10643_v44 = vld [vmem:[#allocation11 + $0x590] ss:$8 sps:$4 sm:$0xff]   ;;  %v10648_v46 = vld [vmem:[#allocation11 + $0x4a4] ss:$8 sps:$4 sm:$0xff]  }
0x12aa   : > { %7524 = vmatprep.subr.bf16.mxu1 %v9458_v27  ;;  %7565 = vmatprep.subr.bf16.mxu0 %v9460_v45  ;;  %v10651_v27 = vld [vmem:[#allocation11 + $0x5a4] ss:$8 sps:$4 sm:$0xff]   ;;  %v10646_v45 = vld [vmem:[#allocation11 + $0x4a0] ss:$8 sps:$4 sm:$0xff]  }
0x12ad   : > { %7525 = vmatpush1.bf16.msra.mxu1 %v9457_v57  ;;  %7566 = vmatpush1.bf16.msra.mxu0 %v9459_v58  ;;  %v10655_v57 = vld [vmem:[#allocation11 + $0x5b0] ss:$8 sps:$4 sm:$0xff]   ;;  %v10660_v58 = vld [vmem:[#allocation11 + $0x4c4] ss:$8 sps:$4 sm:$0xff]  }
0x12ae   : > { %7526 = vmatprep.subr.bf16.mxu1 %v9466_v41  ;;  %7567 = vmatprep.subr.bf16.mxu0 %v9468_v59  ;;  %v10663_v41 = vld [vmem:[#allocation11 + $0x5c4] ss:$8 sps:$4 sm:$0xff]   ;;  %v10658_v59 = vld [vmem:[#allocation11 + $0x4c0] ss:$8 sps:$4 sm:$0xff]  }
0x12b1   : > { %7527 = vmatpush1.bf16.msra.mxu1 %v9465_v60  ;;  %7568 = vmatpush1.bf16.msra.mxu0 %v9467_v0  ;;  %v10661_v60 = vld [vmem:[#allocation11 + $0x5c0] ss:$8 sps:$4 sm:$0xff]   ;;  %v10666_v0 = vld [vmem:[#allocation11 + $0x4d4] ss:$8 sps:$4 sm:$0xff]  }
0x12b2   : > { %8245 = vmatprep.subr.bf16.mxu1 %v10588_v38  ;;  %8286 = vmatprep.subr.bf16.mxu0 %v10591_v42  ;;  %v10669_v38 = vld [vmem:[#allocation11 + $0x5d4] ss:$8 sps:$4 sm:$0xff]   ;;  %v10664_v42 = vld [vmem:[#allocation11 + $0x4d0] ss:$8 sps:$4 sm:$0xff]  }
0x12b4   : > { %7529 = vmatmul.mubr.bf16.vlgmr.msra.gmra.mrb[120].mxu1 %v12104_v20  ;;  %7570 = vmatmul.mubr.bf16.vlgmr.msra.gmra.mrb[80].mxu0 %v12104_v20  ;;  %v10607_v20 = vld [vmem:[#allocation11 + $0x530] ss:$8 sps:$4 sm:$0xff]  }
0x12b5   : > { %8246 = vmatpush1.bf16.msra.mxu1 %v10586_v61  ;;  %8287 = vmatpush1.bf16.msra.mxu0 %v10589_v40  ;;  %v10667_v61 = vld [vmem:[#allocation11 + $0x5d0] ss:$8 sps:$4 sm:$0xff]   ;;  %v10672_v40 = vld [vmem:[#allocation11 + $0x4e4] ss:$8 sps:$4 sm:$0xff]  }
0x12b6   : > { %8247 = vmatprep.subr.bf16.mxu1 %v10594_v5  ;;  %8288 = vmatprep.subr.bf16.mxu0 %v10597_v54  ;;  %v10675_v5 = vld [vmem:[#allocation11 + $0x5e4] ss:$8 sps:$4 sm:$0xff]   ;;  %v10670_v54 = vld [vmem:[#allocation11 + $0x4e0] ss:$8 sps:$4 sm:$0xff]  }
0x12b9   : > { %8248 = vmatpush1.bf16.msra.mxu1 %v10592_v4  ;;  %8289 = vmatpush1.bf16.msra.mxu0 %v10595_v6  ;;  %v10673_v4 = vld [vmem:[#allocation11 + $0x5e0] ss:$8 sps:$4 sm:$0xff]   ;;  %v10678_v6 = vld [vmem:[#allocation11 + $0x4f4] ss:$8 sps:$4 sm:$0xff]  }
0x12ba   : > { %8249 = vmatprep.subr.bf16.mxu1 %v10600_v7  ;;  %8290 = vmatprep.subr.bf16.mxu0 %v10603_v10  ;;  %v10681_v7 = vld [vmem:[#allocation11 + $0x5f4] ss:$8 sps:$4 sm:$0xff]   ;;  %v10676_v10 = vld [vmem:[#allocation11 + $0x4f0] ss:$8 sps:$4 sm:$0xff]  }
0x12bd   : > { %8250 = vmatpush1.bf16.msra.mxu1 %v10598_v62  ;;  %8291 = vmatpush1.bf16.msra.mxu0 %v10601_v12  ;;  %v10679_v62 = vld [vmem:[#allocation11 + $0x5f0] ss:$8 sps:$4 sm:$0xff]   ;;  %v10684_v12 = vld [vmem:[#allocation11 + $0x604] ss:$8 sps:$4 sm:$0xff]  }
0x12be   : > { %8251 = vmatprep.subr.bf16.mxu1 %v10606_v17  ;;  %8292 = vmatprep.subr.bf16.mxu0 %v10609_v2  ;;  %v10687_v17 = vld [vmem:[#allocation11 + $0x704] ss:$8 sps:$4 sm:$0xff]  }
0x12bf   : > { %v12113_v2 = vld [vmem:[%s12264_s0 + $0x8] sm:$0xff] }
0x12c1   : > { %8252 = vmatpush1.bf16.msra.mxu1 %v10604_v13  ;;  %8293 = vmatpush1.bf16.msra.mxu0 %v10607_v20  ;;  %v6737_v13 = vrot.slane %v12113_v2, %v11620_v9  ;;  %v6745_v20 = vrot.slane %v12113_v2, %v2829_v22 }
0x12c2   : > { %8253 = vmatprep.subr.bf16.mxu1 %v10612_v1  ;;  %8294 = vmatprep.subr.bf16.mxu0 %v10615_v14  ;;  %v6741_v1 = vrot.slane %v12113_v2, %v11762_v3  ;;  %v6749_v14 = vrot.slane %v12113_v2, %v2833_v25  ;;  %v10685_v25 = vld [vmem:[#allocation11 + $0x700] ss:$8 sps:$4 sm:$0xff]  }
0x12c5   : > { %8254 = vmatpush1.bf16.msra.mxu1 %v10610_v15  ;;  %8295 = vmatpush1.bf16.msra.mxu0 %v10613_v24 }
0x12c6   : > { %8255 = vmatprep.subr.bf16.mxu1 %v10618_v16  ;;  %8296 = vmatprep.subr.bf16.mxu0 %v10621_v18 }
0x12c9   : > { %8256 = vmatpush1.bf16.msra.mxu1 %v10616_v11  ;;  %8297 = vmatpush1.bf16.msra.mxu0 %v10619_v19 }
0x12ca   : > { %8257 = vmatprep.subr.bf16.mxu1 %v10624_v28  ;;  %8298 = vmatprep.subr.bf16.mxu0 %v10627_v53 }
0x12cd   : > { %8258 = vmatpush1.bf16.msra.mxu1 %v10622_v29  ;;  %8299 = vmatpush1.bf16.msra.mxu0 %v10625_v30 }
0x12ce   : > { %8259 = vmatprep.subr.bf16.mxu1 %v10630_v36  ;;  %8300 = vmatprep.subr.bf16.mxu0 %v10633_v32 }
0x12d1   : > { %8260 = vmatpush1.bf16.msra.mxu1 %v10628_v33  ;;  %8301 = vmatpush1.bf16.msra.mxu0 %v10631_v63 }
0x12d2   : > { %8261 = vmatprep.subr.bf16.mxu1 %v10636_v34  ;;  %8302 = vmatprep.subr.bf16.mxu0 %v10639_v35 }
0x12d5   : > { %8262 = vmatpush1.bf16.msra.mxu1 %v10634_v26  ;;  %8303 = vmatpush1.bf16.msra.mxu0 %v10637_v37  ;;  %v10682_v37 = vld [vmem:[#allocation11 + $0x600] ss:$8 sps:$4 sm:$0xff]  }
0x12d6   : > { %8263 = vmatprep.subr.bf16.mxu1 %v10642_v21  ;;  %8304 = vmatprep.subr.bf16.mxu0 %v10645_v39 }
0x12d9   : > { %8264 = vmatpush1.bf16.msra.mxu1 %v10640_v43  ;;  %8305 = vmatpush1.bf16.msra.mxu0 %v10643_v44  ;;  %v10690_v43 = vld [vmem:[#allocation11 + $0x614] ss:$8 sps:$4 sm:$0xff]  }
0x12da   : > { %8265 = vmatprep.subr.bf16.mxu1 %v10648_v46  ;;  %8306 = vmatprep.subr.bf16.mxu0 %v10651_v27  ;;  %v10693_v44 = vld [vmem:[#allocation11 + $0x714] ss:$8 sps:$4 sm:$0xff]   ;;  %v10688_v46 = vld [vmem:[#allocation11 + $0x610] ss:$8 sps:$4 sm:$0xff]  }
0x12db   : > { %v10691_v27 = vld [vmem:[#allocation11 + $0x710] ss:$8 sps:$4 sm:$0xff]  }
0x12dd   : > { %8266 = vmatpush1.bf16.msra.mxu1 %v10646_v45  ;;  %8307 = vmatpush1.bf16.msra.mxu0 %v10649_v49  ;;  %v10696_v45 = vld [vmem:[#allocation11 + $0x624] ss:$8 sps:$4 sm:$0xff]  }
0x12de   : > { %8267 = vmatprep.subr.bf16.mxu1 %v10654_v50  ;;  %8308 = vmatprep.subr.bf16.mxu0 %v10657_v55  ;;  %v10699_v49 = vld [vmem:[#allocation11 + $0x724] ss:$8 sps:$4 sm:$0xff]   ;;  %v10694_v50 = vld [vmem:[#allocation11 + $0x620] ss:$8 sps:$4 sm:$0xff]  }
0x12df   : > { %v10697_v55 = vld [vmem:[#allocation11 + $0x720] ss:$8 sps:$4 sm:$0xff]  }
0x12e1   : > { %8268 = vmatpush1.bf16.msra.mxu1 %v10652_v56  ;;  %8309 = vmatpush1.bf16.msra.mxu0 %v10655_v57  ;;  %v10702_v56 = vld [vmem:[#allocation11 + $0x634] ss:$8 sps:$4 sm:$0xff]  }
0x12e2   : > { %8269 = vmatprep.subr.bf16.mxu1 %v10660_v58  ;;  %8310 = vmatprep.subr.bf16.mxu0 %v10663_v41  ;;  %v10705_v57 = vld [vmem:[#allocation11 + $0x734] ss:$8 sps:$4 sm:$0xff]   ;;  %v10700_v58 = vld [vmem:[#allocation11 + $0x630] ss:$8 sps:$4 sm:$0xff]  }
0x12e3   : > { %v10703_v41 = vld [vmem:[#allocation11 + $0x730] ss:$8 sps:$4 sm:$0xff]  }
0x12e5   : > { %8270 = vmatpush1.bf16.msra.mxu1 %v10658_v59  ;;  %8311 = vmatpush1.bf16.msra.mxu0 %v10661_v60  ;;  %v10708_v59 = vld [vmem:[#allocation11 + $0x644] ss:$8 sps:$4 sm:$0xff]  }
0x12e6   : > { %8271 = vmatprep.subr.bf16.mxu1 %v10666_v0  ;;  %8312 = vmatprep.subr.bf16.mxu0 %v10669_v38  ;;  %v10711_v60 = vld [vmem:[#allocation11 + $0x744] ss:$8 sps:$4 sm:$0xff]   ;;  %v10706_v0 = vld [vmem:[#allocation11 + $0x640] ss:$8 sps:$4 sm:$0xff]  }
0x12e7   : > { %v10709_v38 = vld [vmem:[#allocation11 + $0x740] ss:$8 sps:$4 sm:$0xff]  }
0x12e9   : > { %8272 = vmatpush1.bf16.msra.mxu1 %v10664_v42  ;;  %8313 = vmatpush1.bf16.msra.mxu0 %v10667_v61  ;;  %v10714_v42 = vld [vmem:[#allocation11 + $0x654] ss:$8 sps:$4 sm:$0xff]  }
0x12ea   : > { %8273 = vmatprep.subr.bf16.mxu1 %v10672_v40  ;;  %8314 = vmatprep.subr.bf16.mxu0 %v10675_v5  ;;  %v10717_v61 = vld [vmem:[#allocation11 + $0x754] ss:$8 sps:$4 sm:$0xff]   ;;  %v10712_v40 = vld [vmem:[#allocation11 + $0x650] ss:$8 sps:$4 sm:$0xff]  }
0x12eb   : > { %v10715_v5 = vld [vmem:[#allocation11 + $0x750] ss:$8 sps:$4 sm:$0xff]  }
0x12ed   : > { %8274 = vmatpush1.bf16.msra.mxu1 %v10670_v54  ;;  %8315 = vmatpush1.bf16.msra.mxu0 %v10673_v4  ;;  %v10720_v54 = vld [vmem:[#allocation11 + $0x664] ss:$8 sps:$4 sm:$0xff]  }
0x12ee   : > { %8275 = vmatprep.subr.bf16.mxu1 %v10678_v6  ;;  %8316 = vmatprep.subr.bf16.mxu0 %v10681_v7  ;;  %v10723_v4 = vld [vmem:[#allocation11 + $0x764] ss:$8 sps:$4 sm:$0xff]   ;;  %v10718_v6 = vld [vmem:[#allocation11 + $0x660] ss:$8 sps:$4 sm:$0xff]  }
0x12ef   : > { %v10721_v7 = vld [vmem:[#allocation11 + $0x760] ss:$8 sps:$4 sm:$0xff]  }
0x12f1   : > { %8276 = vmatpush1.bf16.msra.mxu1 %v10676_v10  ;;  %8317 = vmatpush1.bf16.msra.mxu0 %v10679_v62  ;;  %v10726_v10 = vld [vmem:[#allocation11 + $0x674] ss:$8 sps:$4 sm:$0xff]  }
0x12f2   : > { %8327 = vmatprep.subr.bf16.mxu1 %v10684_v12  ;;  %8368 = vmatprep.subr.bf16.mxu0 %v10687_v17  ;;  %v10729_v62 = vld [vmem:[#allocation11 + $0x774] ss:$8 sps:$4 sm:$0xff]   ;;  %v10724_v12 = vld [vmem:[#allocation11 + $0x670] ss:$8 sps:$4 sm:$0xff]  }
0x12f3   : > { %v10727_v17 = vld [vmem:[#allocation11 + $0x770] ss:$8 sps:$4 sm:$0xff]  }
0x1347   : > { %v7448_v15 = vpop.f32.mrb[116].mxu1  ;;  %v7489_v24 = vpop.f32.mrb[76].mxu0 }
0x1348   : > { %v7449_v16 = vadd.f32 %v7448_v15, %v6737_v13  ;;  %v7490_v18 = vadd.f32 %v7489_v24, %v6745_v20  ;;  %v7450_v11 = vpop.f32.mrb[117].mxu1  ;;  %v7491_v19 = vpop.f32.mrb[77].mxu0  ;;  %v10732_v13 = vld [vmem:[#allocation11 + $0x684] ss:$8 sps:$4 sm:$0xff]   ;;  %v10738_v15 = vld [vmem:[#allocation11 + $0x694] ss:$8 sps:$4 sm:$0xff]  }
0x1349   : > { %v7451_v28 = vadd.f32 %v7450_v11, %v6741_v1  ;;  %v7492_v53 = vadd.f32 %v7491_v19, %v6749_v14  ;;  %v7452_v29 = vpop.f32.mrb[118].mxu1  ;;  %v7493_v30 = vpop.f32.mrb[78].mxu0  ;;  %v10735_v20 = vld [vmem:[#allocation11 + $0x784] ss:$8 sps:$4 sm:$0xff]   ;;  %v10730_v1 = vld [vmem:[#allocation11 + $0x680] ss:$8 sps:$4 sm:$0xff]  }
0x134a   : > { %v7578_v36 = vmax.f32 %v7449_v16, 0.0  ;;  %v7580_v32 = vmax.f32 %v7490_v18, 0.0  ;;  %v7453_v22 = vpop.f32.mrb[119].mxu1  ;;  %v7494_v33 = vpop.f32.mrb[79].mxu0  ;;  %v10733_v14 = vld [vmem:[#allocation11 + $0x780] ss:$8 sps:$4 sm:$0xff]  }
0x134b   : > { %v7579_v63 = vmax.f32 %v7451_v28, 0.0  ;;  %v7581_v34 = vmax.f32 %v7492_v53, 0.0  ;;  %v10741_v24 = vld [vmem:[#allocation11 + $0x794] ss:$8 sps:$4 sm:$0xff]   ;;  %v10736_v16 = vld [vmem:[#allocation11 + $0x690] ss:$8 sps:$4 sm:$0xff]  }
0x134c   : > { %v7586_v21 = vpack.c.bf16 %v7578_v36, %v7578_v36  ;;  %v7588_v39 = vpack.c.bf16 %v7580_v32, %v7580_v32  ;;  %v10739_v18 = vld [vmem:[#allocation11 + $0x790] ss:$8 sps:$4 sm:$0xff]   ;;  %v10744_v11 = vld [vmem:[#allocation11 + $0x6a4] ss:$8 sps:$4 sm:$0xff]   ;;  %v10742_v28 = vld [vmem:[#allocation11 + $0x6a0] ss:$8 sps:$4 sm:$0xff]  }
0x134d   : > { %v7587_v35 = vpack.c.bf16 %v7579_v63, %v7579_v63  ;;  %v7589_v26 = vpack.c.bf16 %v7581_v34, %v7581_v34  ;;  %v10747_v19 = vld [vmem:[#allocation11 + $0x7a4] ss:$8 sps:$4 sm:$0xff]   ;;  %v10745_v53 = vld [vmem:[#allocation11 + $0x7a0] ss:$8 sps:$4 sm:$0xff]   ;;  %v10750_v29 = vld [vmem:[#allocation11 + $0x6b4] ss:$8 sps:$4 sm:$0xff]  }
0x134e   : > { %v10753_v30 = vld [vmem:[#allocation11 + $0x7b4] ss:$8 sps:$4 sm:$0xff]   ;;  %v10748_v36 = vld [vmem:[#allocation11 + $0x6b0] ss:$8 sps:$4 sm:$0xff]   ;;  %v10756_v22 = vld [vmem:[#allocation11 + $0x6c4] ss:$8 sps:$4 sm:$0xff]  }
0x134f   : > { %8277 = vmatprep.mubr.bf16.mxu1 %v7587_v35  ;;  %8318 = vmatprep.mubr.bf16.mxu0 %v7589_v26  ;;  %v10751_v32 = vld [vmem:[#allocation11 + $0x7b0] ss:$8 sps:$4 sm:$0xff]   ;;  %v10759_v33 = vld [vmem:[#allocation11 + $0x7c4] ss:$8 sps:$4 sm:$0xff]   ;;  %v10754_v63 = vld [vmem:[#allocation11 + $0x6c0] ss:$8 sps:$4 sm:$0xff]  }
0x1350   : > { %8278 = vmatmul.mubr.bf16.vlgmr.msra.gmra.mrb[124].mxu1 %v7586_v21  ;;  %8319 = vmatmul.mubr.bf16.vlgmr.msra.gmra.mrb[84].mxu0 %v7588_v39  ;;  %v10757_v34 = vld [vmem:[#allocation11 + $0x7c0] ss:$8 sps:$4 sm:$0xff]   ;;  %v10762_v35 = vld [vmem:[#allocation11 + $0x6d4] ss:$8 sps:$4 sm:$0xff]   ;;  %v10768_v21 = vld [vmem:[#allocation11 + $0x6e4] ss:$8 sps:$4 sm:$0xff]  }
0x1351   : > { %8328 = vmatpush1.bf16.msra.mxu1 %v10682_v37  ;;  %8369 = vmatpush1.bf16.msra.mxu0 %v10685_v25  ;;  %v10765_v26 = vld [vmem:[#allocation11 + $0x7d4] ss:$8 sps:$4 sm:$0xff]   ;;  %v10760_v37 = vld [vmem:[#allocation11 + $0x6d0] ss:$8 sps:$4 sm:$0xff]   ;;  %v10771_v39 = vld [vmem:[#allocation11 + $0x7e4] ss:$8 sps:$4 sm:$0xff]  }
0x1352   : > { %8329 = vmatprep.subr.bf16.mxu1 %v10690_v43  ;;  %8370 = vmatprep.subr.bf16.mxu0 %v10693_v44  ;;  %v10763_v25 = vld [vmem:[#allocation11 + $0x7d0] ss:$8 sps:$4 sm:$0xff]   ;;  %v6753_v43 = vrot.slane %v12113_v2, %v2837_v47  ;;  %v6761_v44 = vrot.slane %v12113_v2, %v2845_v48  ;;  %v10777_v47 = vld [vmem:[#allocation11 + $0x7f4] ss:$8 sps:$4 sm:$0xff]  }
0x1355   : > { %8330 = vmatpush1.bf16.msra.mxu1 %v10688_v46  ;;  %8371 = vmatpush1.bf16.msra.mxu0 %v10691_v27  ;;  %v6757_v46 = vrot.slane %v12113_v2, %v2841_v51  ;;  %v6765_v27 = vrot.slane %v12113_v2, %v2849_v52  ;;  %v10775_v52 = vld [vmem:[#allocation11 + $0x7f0] ss:$8 sps:$4 sm:$0xff]  }
0x1356   : > { %8331 = vmatprep.subr.bf16.mxu1 %v10696_v45  ;;  %8372 = vmatprep.subr.bf16.mxu0 %v10699_v49  ;;  %v10766_v45 = vld [vmem:[#allocation11 + $0x6e0] ss:$8 sps:$4 sm:$0xff]  }
0x1357   : > { %v10769_v49 = vld [vmem:[#allocation11 + $0x7e0] ss:$8 sps:$4 sm:$0xff]  }
0x1359   : > { %8332 = vmatpush1.bf16.msra.mxu1 %v10694_v50  ;;  %8373 = vmatpush1.bf16.msra.mxu0 %v10697_v55  ;;  %v10774_v50 = vld [vmem:[#allocation11 + $0x6f4] ss:$8 sps:$4 sm:$0xff]  }
0x135a   : > { %8333 = vmatprep.subr.bf16.mxu1 %v10702_v56  ;;  %8374 = vmatprep.subr.bf16.mxu0 %v10705_v57 }
0x135d   : > { %8334 = vmatpush1.bf16.msra.mxu1 %v10700_v58  ;;  %8375 = vmatpush1.bf16.msra.mxu0 %v10703_v41 }
0x135e   : > { %8335 = vmatprep.subr.bf16.mxu1 %v10708_v59  ;;  %8376 = vmatprep.subr.bf16.mxu0 %v10711_v60 }
0x1361   : > { %8336 = vmatpush1.bf16.msra.mxu1 %v10706_v0  ;;  %8377 = vmatpush1.bf16.msra.mxu0 %v10709_v38 }
0x1362   : > { %8337 = vmatprep.subr.bf16.mxu1 %v10714_v42  ;;  %8378 = vmatprep.subr.bf16.mxu0 %v10717_v61 }
0x1365   : > { %8338 = vmatpush1.bf16.msra.mxu1 %v10712_v40  ;;  %8379 = vmatpush1.bf16.msra.mxu0 %v10715_v5 }
0x1366   : > { %8339 = vmatprep.subr.bf16.mxu1 %v10720_v54  ;;  %8380 = vmatprep.subr.bf16.mxu0 %v10723_v4 }
0x1369   : > { %8340 = vmatpush1.bf16.msra.mxu1 %v10718_v6  ;;  %8381 = vmatpush1.bf16.msra.mxu0 %v10721_v7 }
0x136a   : > { %8341 = vmatprep.subr.bf16.mxu1 %v10726_v10  ;;  %8382 = vmatprep.subr.bf16.mxu0 %v10729_v62  ;;  %v9194_v10 = vld [vmem:[%s12265_s2 + $0x2] sm:$0x3] }
0x136b   : > { %v7598_v62 = vrot.slane %v9194_v10, %v11620_v9 }
0x136d   : > { %8342 = vmatpush1.bf16.msra.mxu1 %v10724_v12  ;;  %8383 = vmatpush1.bf16.msra.mxu0 %v10727_v17  ;;  %v7602_v12 = vrot.slane %v9194_v10, %v11762_v3 }
0x136e   : > { %8343 = vmatprep.subr.bf16.mxu1 %v10732_v13  ;;  %8384 = vmatprep.subr.bf16.mxu0 %v10735_v20 }
0x1371   : > { %8344 = vmatpush1.bf16.msra.mxu1 %v10730_v1  ;;  %8385 = vmatpush1.bf16.msra.mxu0 %v10733_v14 }
0x1372   : > { %8345 = vmatprep.subr.bf16.mxu1 %v10738_v15  ;;  %8386 = vmatprep.subr.bf16.mxu0 %v10741_v24 }
0x1375   : > { %8346 = vmatpush1.bf16.msra.mxu1 %v10736_v16  ;;  %8387 = vmatpush1.bf16.msra.mxu0 %v10739_v18 }
0x1376   : > { %8347 = vmatprep.subr.bf16.mxu1 %v10744_v11  ;;  %8388 = vmatprep.subr.bf16.mxu0 %v10747_v19 }
0x1379   : > { %8348 = vmatpush1.bf16.msra.mxu1 %v10742_v28  ;;  %8389 = vmatpush1.bf16.msra.mxu0 %v10745_v53 }
0x137a   : > { %8349 = vmatprep.subr.bf16.mxu1 %v10750_v29  ;;  %8390 = vmatprep.subr.bf16.mxu0 %v10753_v30 }
0x137d   : > { %8350 = vmatpush1.bf16.msra.mxu1 %v10748_v36  ;;  %8391 = vmatpush1.bf16.msra.mxu0 %v10751_v32 }
0x137e   : > { %8351 = vmatprep.subr.bf16.mxu1 %v10756_v22  ;;  %8392 = vmatprep.subr.bf16.mxu0 %v10759_v33 }
0x1381   : > { %8352 = vmatpush1.bf16.msra.mxu1 %v10754_v63  ;;  %8393 = vmatpush1.bf16.msra.mxu0 %v10757_v34 }
0x1382   : > { %8353 = vmatprep.subr.bf16.mxu1 %v10762_v35  ;;  %8394 = vmatprep.subr.bf16.mxu0 %v10765_v26 }
0x1385   : > { %8354 = vmatpush1.bf16.msra.mxu1 %v10760_v37  ;;  %8395 = vmatpush1.bf16.msra.mxu0 %v10763_v25 }
0x1386   : > { %8355 = vmatprep.subr.bf16.mxu1 %v10768_v21  ;;  %8396 = vmatprep.subr.bf16.mxu0 %v10771_v39 }
0x1387   : > { %v7530_v55 = vpop.f32.mrb[120].mxu1  ;;  %v7571_v56 = vpop.f32.mrb[80].mxu0 }
0x1388   : > { %v7531_v57 = vadd.f32 %v7530_v55, %v6753_v43  ;;  %v7572_v48 = vadd.f32 %v7571_v56, %v6761_v44  ;;  %v7532_v58 = vpop.f32.mrb[121].mxu1  ;;  %v7573_v41 = vpop.f32.mrb[81].mxu0  ;;  %v10778_v43 = vld [vmem:[#allocation13 + $0x40] sm:$0xff]  }
0x1389   : > { %v7533_v59 = vadd.f32 %v7532_v58, %v6757_v46  ;;  %v7574_v60 = vadd.f32 %v7573_v41, %v6765_v27  ;;  %v7534_v0 = vpop.f32.mrb[122].mxu1  ;;  %v7575_v51 = vpop.f32.mrb[82].mxu0  ;;  %8356 = vmatpush1.bf16.msra.mxu1 %v10766_v45  ;;  %8397 = vmatpush1.bf16.msra.mxu0 %v10769_v49  ;;  %v10779_v44 = vld [vmem:[#allocation13] sm:$0xff]   ;;  %v10780_v46 = vld [vmem:[#allocation13 + $0x48] sm:$0xff]   ;;  %v10785_v58 = vld [vmem:[#allocation13 + $0x18] sm:$0xff]  }
0x138a   : > { %v7582_v2 = vmax.f32 %v7531_v57, 0.0  ;;  %v7584_v38 = vmax.f32 %v7572_v48, 0.0  ;;  %v7535_v42 = vpop.f32.mrb[123].mxu1  ;;  %v7576_v61 = vpop.f32.mrb[83].mxu0  ;;  %8357 = vmatprep.subr.bf16.mxu1 %v10774_v50  ;;  %8398 = vmatprep.subr.bf16.mxu0 %v10777_v47  ;;  %v10781_v27 = vld [vmem:[#allocation13 + $0x8] sm:$0xff]   ;;  %v10784_v48 = vld [vmem:[#allocation13 + $0x58] sm:$0xff]  }
0x138b   : > { %v7583_v40 = vmax.f32 %v7533_v59, 0.0  ;;  %v7585_v5 = vmax.f32 %v7574_v60, 0.0  ;;  %v10786_v41 = vld [vmem:[#allocation13 + $0x60] sm:$0xff]   ;;  %v10788_v60 = vld [vmem:[#allocation13 + $0x68] sm:$0xff]   ;;  %v10790_v51 = vld [vmem:[#allocation13 + $0x70] sm:$0xff]  }
0x138c   : > { %v7590_v6 = vpack.c.bf16 %v7582_v2, %v7582_v2  ;;  %v7592_v7 = vpack.c.bf16 %v7584_v38, %v7584_v38  ;;  %v10787_v59 = vld [vmem:[#allocation13 + $0x20] sm:$0xff]   ;;  %v10789_v0 = vld [vmem:[#allocation13 + $0x28] sm:$0xff]   ;;  %v10793_v2 = vld [vmem:[#allocation13 + $0x38] sm:$0xff]  }
0x138d   : > { %v7591_v54 = vpack.c.bf16 %v7583_v40, %v7583_v40  ;;  %v7593_v4 = vpack.c.bf16 %v7585_v5, %v7585_v5  ;;  %8358 = vmatpush1.bf16.msra.mxu1 %v10772_v8  ;;  %8399 = vmatpush1.bf16.msra.mxu0 %v10775_v52  ;;  %v10791_v8 = vld [vmem:[#allocation13 + $0x30] sm:$0xff]   ;;  %v10792_v52 = vld [vmem:[#allocation13 + $0x78] sm:$0xff]   ;;  %v9195_v40 = vld [vmem:[%s12266_s6 + $0x2] sm:$0x3] }
0x138e   : > { %9681 = vmatprep.subr.bf16.mxu1 %v10778_v43  ;;  %v9196_v5 = vld [vmem:[%s12267_s27 + $0x2] sm:$0x3] }
0x138f   : > { %8359 = vmatprep.mubr.bf16.mxu1 %v7591_v54  ;;  %8400 = vmatprep.mubr.bf16.mxu0 %v7593_v4  ;;  %v8431_v54 = vrot.slane %v9195_v40, %v11620_v9  ;;  %v8435_v4 = vrot.slane %v9195_v40, %v11762_v3 }
0x1390   : > { %8360 = vmatmul.mubr.bf16.vlgmr.msra.gmra.mrb[128].mxu1 %v7590_v6  ;;  %8401 = vmatmul.mubr.bf16.vlgmr.msra.gmra.mrb[88].mxu0 %v7592_v7 }
0x1391   : > { %9682 = vmatpush3.bf16.msra.mxu1 %v10779_v44 }
0x1392   : > { %9683 = vmatprep.subr.bf16.mxu1 %v10780_v46 }
0x1395   : > { %9684 = vmatpush3.bf16.msra.mxu1 %v10781_v27 }
0x1423   : > { %v8279_v17 = vpop.f32.mrb[124].mxu1  ;;  %v8320_v13 = vpop.f32.mrb[84].mxu0 }
0x1424   : > { %v8280_v20 = vadd.f32 %v8279_v17, %v7598_v62  ;;  %v8281_v1 = vpop.f32.mrb[125].mxu1  ;;  %v8322_v14 = vpop.f32.mrb[85].mxu0  ;;  %v8444_v62 = vrot.slane %v9196_v5, %v11620_v9 }
0x1425   : > { %v8282_v15 = vadd.f32 %v8281_v1, %v7602_v12  ;;  %v8283_v24 = vpop.f32.mrb[126].mxu1  ;;  %v8324_v16 = vpop.f32.mrb[86].mxu0  ;;  %v8448_v12 = vrot.slane %v9196_v5, %v11762_v3 }
0x1426   : > { %v8321_v18 = vadd.f32 %v8320_v13, %v8280_v20  ;;  %v8284_v11 = vpop.f32.mrb[127].mxu1  ;;  %v8325_v19 = vpop.f32.mrb[87].mxu0  ;;  %v8487_v16 = vld [vmem:[%s12268_s15] sm:$0x1]  ;;  %s11072_s15 = sshll.u32 %s11172_s24, 4  ;;  %s11073_s15 = int_to_ptr.vmem [resolvable:$false] %s11072_s15 }
0x1427   : > { %v8323_v28 = vadd.f32 %v8322_v14, %v8282_v15  ;;  %s11074_s0 = scalar_lea.vmem %s11073_s15, 32  ;;  %p11075_p0 = scmp.lt.s32.totalorder %s12164_s8, %s11073_s15 }
0x1428   : > { %p11076_p5 = scmp.lt.s32.totalorder %s11074_s0, %s11068_s10 }
0x142a   : > { %p11077_p1 = por %p11076_p5, %p11075_p0 }
0x142c   : > { %p11078_p2 = pnand %p11077_p1, %p11071_p9 }
0x1463   : > { %v8361_v53 = vpop.f32.mrb[128].mxu1  ;;  %v8402_v29 = vpop.f32.mrb[88].mxu0 }
0x1464   : > { %v8362_v30 = vadd.f32 %v8361_v53, %v8321_v18  ;;  %v8363_v36 = vpop.f32.mrb[129].mxu1  ;;  %v8404_v32 = vpop.f32.mrb[89].mxu0 }
0x1465   : > { %v8364_v22 = vadd.f32 %v8363_v36, %v8323_v28  ;;  %v8365_v33 = vpop.f32.mrb[130].mxu1  ;;  %v8406_v63 = vpop.f32.mrb[90].mxu0 }
0x1466   : > { %v8403_v34 = vadd.f32 %v8402_v29, %v8362_v30  ;;  %v8366_v35 = vpop.f32.mrb[131].mxu1  ;;  %v8407_v26 = vpop.f32.mrb[91].mxu0 }
0x1467   : > { %v8405_v37 = vadd.f32 %v8404_v32, %v8364_v22 }
0x1468   : > { %v8409_v25 = vadd.f32 %v8403_v34, %v12098_v31  ;;  %v10782_v31 = vld [vmem:[#allocation13 + $0x50] sm:$0xff]  }
0x1469   : > { %v8410_v21 = vadd.f32 %v8405_v37, %v12096_v23  ;;  %v10783_v23 = vld [vmem:[#allocation13 + $0x10] sm:$0xff]   ;;  %9685 = vmatprep.subr.bf16.mxu1 %v10782_v31 }
0x146a   : > { %9686 = vmatpush3.bf16.msra.mxu1 %v10783_v23 }
0x146b   : > { %v8411_v39 = vadd.f32 %v8410_v21, %v8409_v25  ;;  %9687 = vmatprep.subr.bf16.mxu1 %v10784_v48 }
0x146d   : > { %8412 = vadd.xlane.f32.xlu0 %v8411_v39 }
0x146e   : > { %9688 = vmatpush3.bf16.msra.mxu1 %v10785_v58 }
0x146f   : > { %9689 = vmatprep.subr.bf16.mxu1 %v10786_v41 }
0x1472   : > { %9690 = vmatpush3.bf16.msra.mxu1 %v10787_v59 }
0x1473   : > { %9691 = vmatprep.subr.bf16.mxu1 %v10788_v60 }
0x1476   : > { %9692 = vmatpush3.bf16.msra.mxu1 %v10789_v0 }
0x1477   : > { %9693 = vmatprep.subr.bf16.mxu1 %v10790_v51 }
0x147a   : > { %9694 = vmatpush3.bf16.msra.mxu1 %v10791_v8 }
0x147b   : > { %9695 = vmatprep.subr.bf16.mxu1 %v10792_v52 }
0x147e   : > { %9696 = vmatpush3.bf16.msra.mxu1 %v10793_v2 }
0x14fa   : > { %v8413_v45 = vpop.xlane.xlu0 %8412 }
0x14fb   : > { %v8414_v49 = vmul.f32 0.00390625, %v8413_v45 }
0x14fd   : > { %v8415_v50 = vsub.f32 %v8409_v25, %v8414_v49  ;;  %v8416_v47 = vsub.f32 %v8410_v21, %v8414_v49 }
0x14ff   : > { %v8417_v55 = vmul.f32 %v8415_v50, %v8415_v50  ;;  %v8418_v56 = vmul.f32 %v8416_v47, %v8416_v47 }
0x1501   : > { %v8419_v57 = vadd.f32 %v8418_v56, %v8417_v55 }
0x1503   : > { %8420 = vadd.xlane.f32.xlu0 %v8419_v57 }
0x1590   : > { %v8421_v38 = vpop.xlane.xlu0 %8420 }
0x1591   : > { %v8422_v42 = vmul.f32 0.00390625, %v8421_v38 }
0x1593   : > { %v8423_v61 = vadd.f32 1e-05, %v8422_v42 }
0x1595   : > { %10864 = vrsqrt.f32 %v8423_v61 }
0x159f   : > { %v10865_v6 = vpop.eup %10864 }
0x15a0   : > { %v8425_v7 = vmul.f32 %v10865_v6, %v8415_v50  ;;  %v8426_v10 = vmul.f32 %v10865_v6, %v8416_v47 }
0x15a2   : > { %v8439_v17 = vmul.f32 %v8435_v4, %v8426_v10  ;;  %v8438_v13 = vmul.f32 %v8431_v54, %v8425_v7 }
0x15a4   : > { %v8452_v20 = vadd.f32 %v8448_v12, %v8439_v17  ;;  %v8451_v1 = vadd.f32 %v8444_v62, %v8438_v13 }
0x15a6   : > { %v8454_v14 = vpack.c.bf16 %v8452_v20, %v8452_v20  ;;  %v8453_v15 = vpack.c.bf16 %v8451_v1, %v8451_v1 }
0x15a8   : > { %8616 = vmatprep.mubr.bf16.mxu1 %v8454_v14 }
0x15a9   : > { %8617 = vmatmul.mubr.bf16.vlgmr.msra.gmra.mrb[132].mxu1 %v8453_v15 }
0x167c   : > { %v9697_v24 = vpop.f32.mrb[132].mxu1 }
0x167d   : > { %v9698_v18 = vpop.f32.mrb[133].mxu1 }
0x167e   : > { %v9699_v9 = vadd.f32 %v9698_v18, %v9697_v24  ;;  %v9700_v3 = vpop.f32.mrb[134].mxu1 }
0x167f   : > { %v9701_v11 = vpop.f32.mrb[135].mxu1 }
0x1680   : > { %v8619_v19 = vadd.f32 %v9699_v9, %v8487_v16 }
0x1682   : > { %8624 = vst [vmem:[%s615_s16] sm:$0x1] %v8619_v19 }
0x1683   : > { %11081 = shalt.err (!%p11078_p2)
}
0x1684   : > { %s11082_s3 = scalar_lea.hbm %s12162_s17, 16  ;;  %s11086_s12 = scalar_lea.hbm %s12269_s30, 32 }
0x1685   : > { %p11083_p4 = scmp.ne.s32.totalorder %s12162_s17, %s11082_s3  ;;  %p11087_p10 = scmp.lt.u32.totalorder %s12162_s17, %s12269_s30 }
0x1686   : > { %p11088_p11 = scmp.lt.u32.totalorder %s11086_s12, %s11082_s3  ;;  %p11090_p12 = scmp.lt.u32.totalorder %s11082_s3, %s12162_s17 }
0x1687   : > { %p11084_p8 = pnand %p11083_p4, %p12270_p13 }
0x1688   : > { %p11089_p3 = por %p11088_p11, %p11087_p10 }
0x1689   : > { %p11085_p7 = pneg %p11084_p8 }
0x168a   : > { %p11091_p6 = por %p11090_p12, %p11089_p3 }
0x168c   : > { %p11092_p9 = pnand %p11091_p6, %p11085_p7 }
0x168e   : > { %11095 = shalt.err (!%p11092_p9)
}
0x168f   : > { %9919 = dma.vmem_to_hbm [thread:$0]  (%p12270_p13), %s12164_s8, 16, %s12162_s17, %s8626_s25  }
0x1690 PF: > { %s8650_s0 = sand.u32 1, %s11138_s18   ;;  %p12271_p0 = scmp.ne.s32.totalorder %s12251_s14, 0 }
0x1691   : > { %p12272_p5 = scmp.ge.s32.totalorder %s11150_s21, 2  ;;  %s8651_s10 = scalar_lea.sflag [#allocation4], %s8650_s0 }
0x1693   : > { %p9945_p1 = pnand %p12272_p5, %p12271_p0 }
0x1695   : > { %11133 = dma.done.wait (!%p9945_p1), %s8651_s10, 16  }
0x1696   : > { %11135 = vsyncadd (!%p9945_p1), %s8651_s10, 4294967280  ;;  %p33_p2 = scmp.ge.s32.totalorder %s11407_s11, 4   ;;  %s12273_s18 = smov %s11142_s19 }
0x1697   : > { %s12274_s19 = smov %s11146_s20  ;;  %s12275_s20 = smov %s11419_s28 }
0x1698   : > { %s12276_s21 = smov %s11407_s11  ;;  %35 = sbr.rel (!%p33_p2) target bundleno = 20 (0x14), region = 169 }
0x169f   :  { %8655 = vsyncpa [#allocation3], 1 }
0x16a0   :  { %8657 = vsyncpa [#allocation3 + $0x1], 1 }
0x16a1   :  { %8658 = vsyncpa [#allocation6], 1 }
0x16a2   :  { %8660 = vsyncpa [#allocation6 + $0x1], 1 }
0x16a3   :  { %8661 = vsyncpa [#allocation9], 1 }
0x16a4   :  { %8662 = vsyncpa [#allocation12], 1 }
0x16a5   :  { %8663 = vsyncpa [#allocation4], 1 }
0x16a6   :  { %8665 = vsyncpa [#allocation4 + $0x1], 1 }

</bundles_post_ra>
